<compile_context>
chip_gen: v7x
topology: tpu7x:2x2x1
jax: 0.10.0
libtpu: 0.0.40
codegen_flags: <defaults>
</compile_context>

<pallas_src>
import math

import jax
import jax.numpy as jnp
from jax.experimental import pallas as pl
from jax.experimental.pallas import tpu as pltpu

# ---------------- small synthetic CLIP-ViT config ----------------
BATCH = 2
IN_CH = 3
IMG = 16
PATCH = 8
GRID = IMG // PATCH                 # 2
N_PATCH = GRID * GRID               # 4 patches
SEQ = N_PATCH + 1                   # 5 real tokens (CLS + patches)
SEQ_PAD = 8                         # padded to a full sublane tile
WIDTH = 32                          # transformer width
HEADS = 4
HEAD_DIM = WIDTH // HEADS           # 8
LAYERS = 2
MLP = 4 * WIDTH                     # 128
EMBED = 16                          # output embedding dim
PATCH_DIM = IN_CH * PATCH * PATCH   # 192
ROWS_PAD = BATCH * SEQ_PAD          # 16 flattened (sublane-aligned) token rows
EPS = 1e-5


def _ln(x, g, b):
    """LayerNorm over the last axis. g, b broadcast against x."""
    mu = jnp.mean(x, axis=-1, keepdims=True)
    xc = x - mu
    var = jnp.mean(xc * xc, axis=-1, keepdims=True)
    return xc * jax.lax.rsqrt(var + EPS) * g + b


# ---------------- single fused kernel: full image tower ----------------------
def clip_fused_kernel(
        patches_ref, embed_bias_ref, wpatch_ref, lnpre_g_ref, lnpre_b_ref,
        ln1g_ref, ln1b_ref, wqkv_ref, bqkv_ref, wo_ref, bo_ref,
        ln2g_ref, ln2b_ref, w1_ref, b1_ref, w2_ref, b2_ref,
        lnpost_g_ref, lnpost_b_ref, proj_ref,
        out_ref, x_scr):
    # ---- patch embed + CLS + positional embedding -----------------------------
    # patches_ref is already laid out in padded token-row order (CLS / pad rows
    # are zero), embed_bias_ref carries cls+pos rows -> one lane-dense matmul,
    # no sub-tile slice stores.
    x = jnp.dot(patches_ref[...], wpatch_ref[...],
                preferred_element_type=jnp.float32) + embed_bias_ref[...]
    x = _ln(x, lnpre_g_ref[...], lnpre_b_ref[...])               # [ROWS_PAD, W]

    # key mask for the padded rows (columns SEQ..SEQ_PAD-1 of every score tile)
    kid = jax.lax.broadcasted_iota(jnp.int32, (1, SEQ_PAD), 1)
    key_mask = jnp.where(kid < SEQ, 0.0, -1e30).astype(jnp.float32)   # [1, 8]

    # ---- transformer residual blocks (statically unrolled over layers) --------
    for l in range(LAYERS):
        h = _ln(x, ln1g_ref[l], ln1b_ref[l])                     # [ROWS_PAD, W]

        # fused QKV: one [16,32]x[32,96] MXU pass (q-scale pre-folded).
        qkv = jnp.dot(h, wqkv_ref[l],
                      preferred_element_type=jnp.float32) + bqkv_ref[l]
        q = qkv[:, 0 * WIDTH:1 * WIDTH]
        k = qkv[:, 1 * WIDTH:2 * WIDTH]
        v = qkv[:, 2 * WIDTH:3 * WIDTH]

        def to_heads(t):     # [B*S, W] -> [B*H, S, Dh]
            return (t.reshape(BATCH, SEQ_PAD, HEADS, HEAD_DIM)
                    .transpose(0, 2, 1, 3)
                    .reshape(BATCH * HEADS, SEQ_PAD, HEAD_DIM))

        qh, kh, vh = to_heads(q), to_heads(k), to_heads(v)

        # one batched score dot + one batched softmax over all (batch, head)
        # tiles; padded key rows masked out.
        s = jnp.einsum('bqd,bkd->bqk', qh, kh,
                       preferred_element_type=jnp.float32)       # [B*H, 8, 8]
        s = s + key_mask
        s = s - jnp.max(s, axis=-1, keepdims=True)
        p = jnp.exp(s)
        p = p * pl.reciprocal(jnp.sum(p, axis=-1, keepdims=True), approx=True)

        ctx = jnp.einsum('bqk,bkd->bqd', p, vh,
                         preferred_element_type=jnp.float32)     # [B*H, 8, Dh]
        # repack heads onto the lane axis once -> single output projection.
        ctx = (ctx.reshape(BATCH, HEADS, SEQ_PAD, HEAD_DIM)
               .transpose(0, 2, 1, 3)
               .reshape(ROWS_PAD, WIDTH))
        x = x + jnp.dot(ctx, wo_ref[l],
                        preferred_element_type=jnp.float32) + bo_ref[l]

        # MLP with QuickGELU (CLIP)
        h2 = _ln(x, ln2g_ref[l], ln2b_ref[l])
        m = jnp.dot(h2, w1_ref[l], preferred_element_type=jnp.float32) + b1_ref[l]
        m = m * jax.nn.sigmoid(1.702 * m)
        x = x + jnp.dot(m, w2_ref[l], preferred_element_type=jnp.float32) + b2_ref[l]

    # ---- ln_post on CLS rows + output projection ------------------------------
    x_scr[...] = x
    cls_rows = x_scr[pl.ds(0, BATCH, stride=SEQ_PAD), :]         # rows 0 and 8
    hc = _ln(cls_rows, lnpost_g_ref[...], lnpost_b_ref[...])
    out_ref[...] = jnp.dot(hc, proj_ref[...], preferred_element_type=jnp.float32)


def clip_fused_call(*inputs):
    vmem = pl.BlockSpec(memory_space=pltpu.MemorySpace.VMEM)
    return pl.pallas_call(
        clip_fused_kernel,
        out_shape=jax.ShapeDtypeStruct((BATCH, EMBED), jnp.float32),
        in_specs=[vmem] * len(inputs),
        out_specs=vmem,
        scratch_shapes=[pltpu.VMEM((ROWS_PAD, WIDTH), jnp.float32)],
    )(*inputs)


# ---------------- parameter init (deterministic, synthetic) ------------------
def init_params(key):
    def normal(k, shape, scale=0.02):
        return scale * jax.random.normal(k, shape, dtype=jnp.float32)

    keys = jax.random.split(key, 4 + 6 * LAYERS)
    ki = iter(keys)
    params = {
        "wpatch": normal(next(ki), (PATCH_DIM, WIDTH)),       # conv as matmul
        "cls": normal(next(ki), (1, WIDTH)),
        "pos": normal(next(ki), (SEQ, WIDTH)),
        "ln_pre_g": jnp.ones((1, WIDTH), jnp.float32),
        "ln_pre_b": jnp.zeros((1, WIDTH), jnp.float32),
        "ln_post_g": jnp.ones((1, WIDTH), jnp.float32),
        "ln_post_b": jnp.zeros((1, WIDTH), jnp.float32),
        "proj": normal(next(ki), (WIDTH, EMBED)),
        "layers": [],
    }
    for _ in range(LAYERS):
        layer = (
            jnp.ones((1, WIDTH), jnp.float32),                # ln1 gamma
            jnp.zeros((1, WIDTH), jnp.float32),               # ln1 beta
            normal(next(ki), (WIDTH, 3 * WIDTH)),             # W_qkv
            jnp.zeros((1, 3 * WIDTH), jnp.float32),           # b_qkv
            normal(next(ki), (WIDTH, WIDTH)),                 # W_out
            jnp.zeros((1, WIDTH), jnp.float32),               # b_out
            jnp.ones((1, WIDTH), jnp.float32),                # ln2 gamma
            jnp.zeros((1, WIDTH), jnp.float32),               # ln2 beta
            normal(next(ki), (WIDTH, MLP)),                   # W_fc
            jnp.zeros((1, MLP), jnp.float32),                 # b_fc
            normal(next(ki), (MLP, WIDTH)),                   # W_proj
            jnp.zeros((1, WIDTH), jnp.float32),               # b_proj
        )
        params["layers"].append(layer)
    return params


# ---------------- wrapper-side param / token prep (outside the kernel) -------
def _prep_kernel_params(params):
    """Stack per-layer params on a leading layer axis; fold 1/sqrt(Dh) into Q."""
    scale = 1.0 / math.sqrt(HEAD_DIM)
    names = ("ln1g", "ln1b", "wqkv", "bqkv", "wo", "bo",
             "ln2g", "ln2b", "w1", "b1", "w2", "b2")
    acc = {n: [] for n in names}
    for (ln1g, ln1b, wqkv, bqkv, wo, bo, ln2g, ln2b, w1, b1, w2, b2) in params["layers"]:
        acc["ln1g"].append(ln1g)
        acc["ln1b"].append(ln1b)
        acc["wqkv"].append(jnp.concatenate(
            [wqkv[:, :WIDTH] * scale, wqkv[:, WIDTH:]], axis=1))
        acc["bqkv"].append(jnp.concatenate(
            [bqkv[:, :WIDTH] * scale, bqkv[:, WIDTH:]], axis=1))
        acc["wo"].append(wo)
        acc["bo"].append(bo)
        acc["ln2g"].append(ln2g)
        acc["ln2b"].append(ln2b)
        acc["w1"].append(w1)
        acc["b1"].append(b1)
        acc["w2"].append(w2)
        acc["b2"].append(b2)
    return {n: jnp.stack(v, axis=0) for n, v in acc.items()}


def _prep_tokens(image, params):
    """Flatten stride=PATCH conv patches into the padded token-row layout and
    build the (CLS + positional) embedding bias for the same layout."""
    B = image.shape[0]
    patches = image.reshape(B, IN_CH, GRID, PATCH, GRID, PATCH)
    patches = patches.transpose(0, 2, 4, 1, 3, 5).reshape(B, N_PATCH, PATCH_DIM)

    patches_pad = jnp.zeros((B, SEQ_PAD, PATCH_DIM), jnp.float32)
    patches_pad = patches_pad.at[:, 1:SEQ, :].set(patches)      # CLS/pad rows = 0
    patches_pad = patches_pad.reshape(B * SEQ_PAD, PATCH_DIM)

    bias = jnp.zeros((SEQ_PAD, WIDTH), jnp.float32)
    bias = bias.at[0, :].set(params["cls"][0] + params["pos"][0])
    bias = bias.at[1:SEQ, :].set(params["pos"][1:SEQ])
    bias = jnp.broadcast_to(bias[None], (B, SEQ_PAD, WIDTH)).reshape(
        B * SEQ_PAD, WIDTH)
    return patches_pad, bias


# ---------------- ImageCLIP.forward == model.encode_image --------------------
def image_clip_forward(image, params):
    """image: [B, 3, IMG, IMG] float32, NCHW (PyTorch convention)."""
    patches_pad, embed_bias = _prep_tokens(image, params)
    lp = _prep_kernel_params(params)
    inputs = (
        patches_pad, embed_bias, params["wpatch"],
        params["ln_pre_g"], params["ln_pre_b"],
        lp["ln1g"], lp["ln1b"], lp["wqkv"], lp["bqkv"], lp["wo"], lp["bo"],
        lp["ln2g"], lp["ln2b"], lp["w1"], lp["b1"], lp["w2"], lp["b2"],
        params["ln_post_g"], params["ln_post_b"], params["proj"],
    )
    return clip_fused_call(*inputs)


# ---------------- pure-JAX reference (original fused-qkv layout) --------------
def reference_forward(image, params):
    B = image.shape[0]
    patches = image.reshape(B, IN_CH, GRID, PATCH, GRID, PATCH)
    patches = patches.transpose(0, 2, 4, 1, 3, 5).reshape(B, N_PATCH, PATCH_DIM)
    pe = jnp.einsum('bpd,dw->bpw', patches, params["wpatch"])
    cls = jnp.broadcast_to(params["cls"][None, :, :], (B, 1, WIDTH))
    x = jnp.concatenate([cls, pe], axis=1) + params["pos"][None]
    x = _ln(x, params["ln_pre_g"], params["ln_pre_b"])
    scale = 1.0 / math.sqrt(HEAD_DIM)
    for (ln1g, ln1b, wqkv, bqkv, wo, bo, ln2g, ln2b, w1, b1, w2, b2) in params["layers"]:
        h = _ln(x, ln1g, ln1b)
        qkv = jnp.einsum('bsw,wc->bsc', h, wqkv) + bqkv
        q, k, v = jnp.split(qkv, 3, axis=-1)
        q = q.reshape(B, SEQ, HEADS, HEAD_DIM).transpose(0, 2, 1, 3)
        k = k.reshape(B, SEQ, HEADS, HEAD_DIM).transpose(0, 2, 1, 3)
        v = v.reshape(B, SEQ, HEADS, HEAD_DIM).transpose(0, 2, 1, 3)
        s = jnp.einsum('bhqd,bhkd->bhqk', q, k) * scale
        p = jax.nn.softmax(s, axis=-1)
        ctx = jnp.einsum('bhqk,bhkd->bhqd', p, v)
        ctx = ctx.transpose(0, 2, 1, 3).reshape(B, SEQ, WIDTH)
        x = x + jnp.einsum('bsw,wz->bsz', ctx, wo) + bo
        h2 = _ln(x, ln2g, ln2b)
        m = jnp.einsum('bsw,wm->bsm', h2, w1) + b1
        m = m * jax.nn.sigmoid(1.702 * m)
        x = x + jnp.einsum('bsm,mw->bsw', m, w2) + b2
    cls_out = _ln(x[:, 0, :], params["ln_post_g"], params["ln_post_b"])
    return cls_out @ params["proj"]


if __name__ == "__main__":
    key = jax.random.PRNGKey(0)
    k_img, k_params = jax.random.split(key)
    image = jax.random.normal(k_img, (BATCH, IN_CH, IMG, IMG), dtype=jnp.float32)
    params = init_params(k_params)

    # TODO(synk): real CLIP checkpoint weights are not loadable here; parameters
    # are deterministic synthetic values with the correct shapes.
    out = jax.jit(image_clip_forward)(image, params)
    out = jax.block_until_ready(out)
    assert out.shape == (BATCH, EMBED) and out.dtype == jnp.float32

    ref = reference_forward(image, params)
    rel_err = float(jnp.max(jnp.abs(out - ref)) / (jnp.max(jnp.abs(ref)) + 1e-8))
    assert rel_err < 1e-2, f"mismatch vs reference: rel_err={rel_err}"
    print("KERNEL_OK")
</pallas_src>

<mosaic_0001>
module attributes {stable_mosaic.version = 11 : i64} {
  func.func @clip_fused_kernel(%arg0: memref<16x192xf32, #tpu.memory_space<vmem>>, %arg1: memref<16x32xf32, #tpu.memory_space<vmem>>, %arg2: memref<192x32xf32, #tpu.memory_space<vmem>>, %arg3: memref<1x32xf32, #tpu.memory_space<vmem>>, %arg4: memref<1x32xf32, #tpu.memory_space<vmem>>, %arg5: memref<2x1x32xf32, #tpu.memory_space<vmem>>, %arg6: memref<2x1x32xf32, #tpu.memory_space<vmem>>, %arg7: memref<2x32x96xf32, #tpu.memory_space<vmem>>, %arg8: memref<2x1x96xf32, #tpu.memory_space<vmem>>, %arg9: memref<2x32x32xf32, #tpu.memory_space<vmem>>, %arg10: memref<2x1x32xf32, #tpu.memory_space<vmem>>, %arg11: memref<2x1x32xf32, #tpu.memory_space<vmem>>, %arg12: memref<2x1x32xf32, #tpu.memory_space<vmem>>, %arg13: memref<2x32x128xf32, #tpu.memory_space<vmem>>, %arg14: memref<2x1x128xf32, #tpu.memory_space<vmem>>, %arg15: memref<2x128x32xf32, #tpu.memory_space<vmem>>, %arg16: memref<2x1x32xf32, #tpu.memory_space<vmem>>, %arg17: memref<1x32xf32, #tpu.memory_space<vmem>>, %arg18: memref<1x32xf32, #tpu.memory_space<vmem>>, %arg19: memref<32x16xf32, #tpu.memory_space<vmem>>, %arg20: memref<2x16xf32, #tpu.memory_space<vmem>>, %arg21: memref<16x32xf32, #tpu.memory_space<vmem>>) attributes {dimension_semantics = [], scalar_prefetch = 0 : i64, scratch_operands = 1 : i64, tpu.core_type = #tpu.core_type<tc>} {
    %c0 = arith.constant 0 : index
    %c0_0 = arith.constant 0 : index
    %0 = vector.load %arg0[%c0, %c0_0] : memref<16x192xf32, #tpu.memory_space<vmem>>, vector<16x192xf32>
    %c0_1 = arith.constant 0 : index
    %c0_2 = arith.constant 0 : index
    %1 = vector.load %arg2[%c0_1, %c0_2] : memref<192x32xf32, #tpu.memory_space<vmem>>, vector<192x32xf32>
    %cst = arith.constant dense<0.000000e+00> : vector<16x32xf32>
    %2 = tpu.matmul %0, %1, %cst {dimension_numbers = #tpu.dot_dimension_numbers<[1], [0], [0], [1], [0, 0, 1, 1], [], []>} : vector<16x192xf32>, vector<192x32xf32>, vector<16x32xf32> -> vector<16x32xf32>
    %c0_3 = arith.constant 0 : index
    %c0_4 = arith.constant 0 : index
    %3 = vector.load %arg1[%c0_3, %c0_4] : memref<16x32xf32, #tpu.memory_space<vmem>>, vector<16x32xf32>
    %4 = arith.addf %2, %3 : vector<16x32xf32>
    %c0_5 = arith.constant 0 : index
    %c0_6 = arith.constant 0 : index
    %5 = vector.load %arg3[%c0_5, %c0_6] : memref<1x32xf32, #tpu.memory_space<vmem>>, vector<1x32xf32>
    %c0_7 = arith.constant 0 : index
    %c0_8 = arith.constant 0 : index
    %6 = vector.load %arg4[%c0_7, %c0_8] : memref<1x32xf32, #tpu.memory_space<vmem>>, vector<1x32xf32>
    %cst_9 = arith.constant dense<0.000000e+00> : vector<16xf32>
    %7 = vector.multi_reduction <add>, %4, %cst_9 [1] : vector<16x32xf32> to vector<16xf32>
    %8 = vector.shape_cast %7 : vector<16xf32> to vector<16x1xf32>
    %cst_10 = arith.constant 3.200000e+01 : f32
    %9 = vector.broadcast %cst_10 : f32 to vector<16x1xf32>
    %10 = arith.divf %8, %9 : vector<16x1xf32>
    %11 = vector.broadcast %10 : vector<16x1xf32> to vector<16x32xf32>
    %12 = arith.subf %4, %11 : vector<16x32xf32>
    %13 = arith.mulf %12, %12 : vector<16x32xf32>
    %cst_11 = arith.constant dense<0.000000e+00> : vector<16xf32>
    %14 = vector.multi_reduction <add>, %13, %cst_11 [1] : vector<16x32xf32> to vector<16xf32>
    %15 = vector.shape_cast %14 : vector<16xf32> to vector<16x1xf32>
    %cst_12 = arith.constant 3.200000e+01 : f32
    %16 = vector.broadcast %cst_12 : f32 to vector<16x1xf32>
    %17 = arith.divf %15, %16 : vector<16x1xf32>
    %cst_13 = arith.constant 9.99999974E-6 : f32
    %18 = vector.broadcast %cst_13 : f32 to vector<16x1xf32>
    %19 = arith.addf %17, %18 : vector<16x1xf32>
    %20 = math.rsqrt %19 : vector<16x1xf32>
    %21 = vector.broadcast %20 : vector<16x1xf32> to vector<16x32xf32>
    %22 = arith.mulf %12, %21 : vector<16x32xf32>
    %23 = vector.broadcast %5 : vector<1x32xf32> to vector<16x32xf32>
    %24 = arith.mulf %22, %23 : vector<16x32xf32>
    %25 = vector.broadcast %6 : vector<1x32xf32> to vector<16x32xf32>
    %26 = arith.addf %24, %25 : vector<16x32xf32>
    %27 = tpu.iota {dimensions = array<i32: 1>} : vector<1x8xi32>
    %c5_i32 = arith.constant 5 : i32
    %28 = vector.broadcast %c5_i32 : i32 to vector<1x8xi32>
    %29 = arith.cmpi slt, %27, %28 : vector<1x8xi32>
    %cst_14 = arith.constant 0.000000e+00 : f32
    %cst_15 = arith.constant -1.000000e+30 : f32
    %30 = vector.broadcast %cst_14 : f32 to vector<1x8xf32>
    %31 = vector.broadcast %cst_15 : f32 to vector<1x8xf32>
    %32 = arith.select %29, %30, %31 : vector<1x8xi1>, vector<1x8xf32>
    %c0_16 = arith.constant 0 : index
    %c0_17 = arith.constant 0 : index
    %c0_18 = arith.constant 0 : index
    %33 = vector.load %arg5[%c0_16, %c0_17, %c0_18] : memref<2x1x32xf32, #tpu.memory_space<vmem>>, vector<1x1x32xf32>
    %34 = vector.shape_cast %33 : vector<1x1x32xf32> to vector<1x32xf32>
    %c0_19 = arith.constant 0 : index
    %c0_20 = arith.constant 0 : index
    %c0_21 = arith.constant 0 : index
    %35 = vector.load %arg6[%c0_19, %c0_20, %c0_21] : memref<2x1x32xf32, #tpu.memory_space<vmem>>, vector<1x1x32xf32>
    %36 = vector.shape_cast %35 : vector<1x1x32xf32> to vector<1x32xf32>
    %cst_22 = arith.constant dense<0.000000e+00> : vector<16xf32>
    %37 = vector.multi_reduction <add>, %26, %cst_22 [1] : vector<16x32xf32> to vector<16xf32>
    %38 = vector.shape_cast %37 : vector<16xf32> to vector<16x1xf32>
    %cst_23 = arith.constant 3.200000e+01 : f32
    %39 = vector.broadcast %cst_23 : f32 to vector<16x1xf32>
    %40 = arith.divf %38, %39 : vector<16x1xf32>
    %41 = vector.broadcast %40 : vector<16x1xf32> to vector<16x32xf32>
    %42 = arith.subf %26, %41 : vector<16x32xf32>
    %43 = arith.mulf %42, %42 : vector<16x32xf32>
    %cst_24 = arith.constant dense<0.000000e+00> : vector<16xf32>
    %44 = vector.multi_reduction <add>, %43, %cst_24 [1] : vector<16x32xf32> to vector<16xf32>
    %45 = vector.shape_cast %44 : vector<16xf32> to vector<16x1xf32>
    %cst_25 = arith.constant 3.200000e+01 : f32
    %46 = vector.broadcast %cst_25 : f32 to vector<16x1xf32>
    %47 = arith.divf %45, %46 : vector<16x1xf32>
    %cst_26 = arith.constant 9.99999974E-6 : f32
    %48 = vector.broadcast %cst_26 : f32 to vector<16x1xf32>
    %49 = arith.addf %47, %48 : vector<16x1xf32>
    %50 = math.rsqrt %49 : vector<16x1xf32>
    %51 = vector.broadcast %50 : vector<16x1xf32> to vector<16x32xf32>
    %52 = arith.mulf %42, %51 : vector<16x32xf32>
    %53 = vector.broadcast %34 : vector<1x32xf32> to vector<16x32xf32>
    %54 = arith.mulf %52, %53 : vector<16x32xf32>
    %55 = vector.broadcast %36 : vector<1x32xf32> to vector<16x32xf32>
    %56 = arith.addf %54, %55 : vector<16x32xf32>
    %c0_27 = arith.constant 0 : index
    %c0_28 = arith.constant 0 : index
    %c0_29 = arith.constant 0 : index
    %57 = vector.load %arg7[%c0_27, %c0_28, %c0_29] : memref<2x32x96xf32, #tpu.memory_space<vmem>>, vector<1x32x96xf32>
    %58 = vector.shape_cast %57 : vector<1x32x96xf32> to vector<32x96xf32>
    %cst_30 = arith.constant dense<0.000000e+00> : vector<16x96xf32>
    %59 = tpu.matmul %56, %58, %cst_30 {dimension_numbers = #tpu.dot_dimension_numbers<[1], [0], [0], [1], [0, 0, 1, 1], [], []>} : vector<16x32xf32>, vector<32x96xf32>, vector<16x96xf32> -> vector<16x96xf32>
    %c0_31 = arith.constant 0 : index
    %c0_32 = arith.constant 0 : index
    %c0_33 = arith.constant 0 : index
    %60 = vector.load %arg8[%c0_31, %c0_32, %c0_33] : memref<2x1x96xf32, #tpu.memory_space<vmem>>, vector<1x1x96xf32>
    %61 = vector.shape_cast %60 : vector<1x1x96xf32> to vector<1x96xf32>
    %62 = vector.broadcast %61 : vector<1x96xf32> to vector<16x96xf32>
    %63 = arith.addf %59, %62 : vector<16x96xf32>
    %64 = vector.extract_strided_slice %63 {offsets = [0, 0], sizes = [16, 32], strides = [1, 1]} : vector<16x96xf32> to vector<16x32xf32>
    %65 = vector.extract_strided_slice %63 {offsets = [0, 32], sizes = [16, 32], strides = [1, 1]} : vector<16x96xf32> to vector<16x32xf32>
    %66 = vector.extract_strided_slice %63 {offsets = [0, 64], sizes = [16, 32], strides = [1, 1]} : vector<16x96xf32> to vector<16x32xf32>
    %67 = vector.shape_cast %64 : vector<16x32xf32> to vector<2x8x4x8xf32>
    %68 = tpu.transpose %67, [0, 2, 1, 3] : vector<2x8x4x8xf32> -> vector<2x4x8x8xf32>
    %69 = vector.shape_cast %68 : vector<2x4x8x8xf32> to vector<8x8x8xf32>
    %70 = vector.shape_cast %65 : vector<16x32xf32> to vector<2x8x4x8xf32>
    %71 = tpu.transpose %70, [0, 2, 1, 3] : vector<2x8x4x8xf32> -> vector<2x4x8x8xf32>
    %72 = vector.shape_cast %71 : vector<2x4x8x8xf32> to vector<8x8x8xf32>
    %73 = vector.shape_cast %66 : vector<16x32xf32> to vector<2x8x4x8xf32>
    %74 = tpu.transpose %73, [0, 2, 1, 3] : vector<2x8x4x8xf32> -> vector<2x4x8x8xf32>
    %75 = vector.shape_cast %74 : vector<2x4x8x8xf32> to vector<8x8x8xf32>
    "tpu.trace_start"() <{level = 10 : i32, message = "bqd,bkd->bqk"}> : () -> ()
    %cst_34 = arith.constant dense<0.000000e+00> : vector<8x8x8xf32>
    %76 = tpu.matmul %69, %72, %cst_34 {dimension_numbers = #tpu.dot_dimension_numbers<[2], [2], [1], [1], [0, 0, 0, 1, 1, 1], [0], [0]>} : vector<8x8x8xf32>, vector<8x8x8xf32>, vector<8x8x8xf32> -> vector<8x8x8xf32>
    "tpu.trace_stop"() : () -> ()
    %77 = vector.shape_cast %32 : vector<1x8xf32> to vector<1x1x8xf32>
    %78 = vector.broadcast %77 : vector<1x1x8xf32> to vector<8x8x8xf32>
    %79 = arith.addf %76, %78 : vector<8x8x8xf32>
    %cst_35 = arith.constant dense<0xFF800000> : vector<8x8xf32>
    %80 = vector.multi_reduction <maximumf>, %79, %cst_35 [2] : vector<8x8x8xf32> to vector<8x8xf32>
    %81 = vector.shape_cast %80 : vector<8x8xf32> to vector<8x8x1xf32>
    %82 = vector.broadcast %81 : vector<8x8x1xf32> to vector<8x8x8xf32>
    %83 = arith.subf %79, %82 : vector<8x8x8xf32>
    %84 = math.exp %83 : vector<8x8x8xf32>
    %cst_36 = arith.constant dense<0.000000e+00> : vector<8x8xf32>
    %85 = vector.multi_reduction <add>, %84, %cst_36 [2] : vector<8x8x8xf32> to vector<8x8xf32>
    %86 = vector.shape_cast %85 : vector<8x8xf32> to vector<8x8x1xf32>
    %87 = tpu.reciprocal %86 {approx = true} : vector<8x8x1xf32> -> vector<8x8x1xf32>
    %88 = vector.broadcast %87 : vector<8x8x1xf32> to vector<8x8x8xf32>
    %89 = arith.mulf %84, %88 : vector<8x8x8xf32>
    "tpu.trace_start"() <{level = 10 : i32, message = "bqk,bkd->bqd"}> : () -> ()
    %cst_37 = arith.constant dense<0.000000e+00> : vector<8x8x8xf32>
    %90 = tpu.matmul %89, %75, %cst_37 {dimension_numbers = #tpu.dot_dimension_numbers<[2], [1], [1], [2], [0, 0, 0, 1, 1, 2], [0], [0]>} : vector<8x8x8xf32>, vector<8x8x8xf32>, vector<8x8x8xf32> -> vector<8x8x8xf32>
    "tpu.trace_stop"() : () -> ()
    %91 = vector.shape_cast %90 : vector<8x8x8xf32> to vector<2x4x8x8xf32>
    %92 = tpu.transpose %91, [0, 2, 1, 3] : vector<2x4x8x8xf32> -> vector<2x8x4x8xf32>
    %93 = vector.shape_cast %92 : vector<2x8x4x8xf32> to vector<16x32xf32>
    %c0_38 = arith.constant 0 : index
    %c0_39 = arith.constant 0 : index
    %c0_40 = arith.constant 0 : index
    %94 = vector.load %arg9[%c0_38, %c0_39, %c0_40] : memref<2x32x32xf32, #tpu.memory_space<vmem>>, vector<1x32x32xf32>
    %95 = vector.shape_cast %94 : vector<1x32x32xf32> to vector<32x32xf32>
    %cst_41 = arith.constant dense<0.000000e+00> : vector<16x32xf32>
    %96 = tpu.matmul %93, %95, %cst_41 {dimension_numbers = #tpu.dot_dimension_numbers<[1], [0], [0], [1], [0, 0, 1, 1], [], []>} : vector<16x32xf32>, vector<32x32xf32>, vector<16x32xf32> -> vector<16x32xf32>
    %97 = arith.addf %26, %96 : vector<16x32xf32>
    %c0_42 = arith.constant 0 : index
    %c0_43 = arith.constant 0 : index
    %c0_44 = arith.constant 0 : index
    %98 = vector.load %arg10[%c0_42, %c0_43, %c0_44] : memref<2x1x32xf32, #tpu.memory_space<vmem>>, vector<1x1x32xf32>
    %99 = vector.shape_cast %98 : vector<1x1x32xf32> to vector<1x32xf32>
    %100 = vector.broadcast %99 : vector<1x32xf32> to vector<16x32xf32>
    %101 = arith.addf %97, %100 : vector<16x32xf32>
    %c0_45 = arith.constant 0 : index
    %c0_46 = arith.constant 0 : index
    %c0_47 = arith.constant 0 : index
    %102 = vector.load %arg11[%c0_45, %c0_46, %c0_47] : memref<2x1x32xf32, #tpu.memory_space<vmem>>, vector<1x1x32xf32>
    %103 = vector.shape_cast %102 : vector<1x1x32xf32> to vector<1x32xf32>
    %c0_48 = arith.constant 0 : index
    %c0_49 = arith.constant 0 : index
    %c0_50 = arith.constant 0 : index
    %104 = vector.load %arg12[%c0_48, %c0_49, %c0_50] : memref<2x1x32xf32, #tpu.memory_space<vmem>>, vector<1x1x32xf32>
    %105 = vector.shape_cast %104 : vector<1x1x32xf32> to vector<1x32xf32>
    %cst_51 = arith.constant dense<0.000000e+00> : vector<16xf32>
    %106 = vector.multi_reduction <add>, %101, %cst_51 [1] : vector<16x32xf32> to vector<16xf32>
    %107 = vector.shape_cast %106 : vector<16xf32> to vector<16x1xf32>
    %cst_52 = arith.constant 3.200000e+01 : f32
    %108 = vector.broadcast %cst_52 : f32 to vector<16x1xf32>
    %109 = arith.divf %107, %108 : vector<16x1xf32>
    %110 = vector.broadcast %109 : vector<16x1xf32> to vector<16x32xf32>
    %111 = arith.subf %101, %110 : vector<16x32xf32>
    %112 = arith.mulf %111, %111 : vector<16x32xf32>
    %cst_53 = arith.constant dense<0.000000e+00> : vector<16xf32>
    %113 = vector.multi_reduction <add>, %112, %cst_53 [1] : vector<16x32xf32> to vector<16xf32>
    %114 = vector.shape_cast %113 : vector<16xf32> to vector<16x1xf32>
    %cst_54 = arith.constant 3.200000e+01 : f32
    %115 = vector.broadcast %cst_54 : f32 to vector<16x1xf32>
    %116 = arith.divf %114, %115 : vector<16x1xf32>
    %cst_55 = arith.constant 9.99999974E-6 : f32
    %117 = vector.broadcast %cst_55 : f32 to vector<16x1xf32>
    %118 = arith.addf %116, %117 : vector<16x1xf32>
    %119 = math.rsqrt %118 : vector<16x1xf32>
    %120 = vector.broadcast %119 : vector<16x1xf32> to vector<16x32xf32>
    %121 = arith.mulf %111, %120 : vector<16x32xf32>
    %122 = vector.broadcast %103 : vector<1x32xf32> to vector<16x32xf32>
    %123 = arith.mulf %121, %122 : vector<16x32xf32>
    %124 = vector.broadcast %105 : vector<1x32xf32> to vector<16x32xf32>
    %125 = arith.addf %123, %124 : vector<16x32xf32>
    %c0_56 = arith.constant 0 : index
    %c0_57 = arith.constant 0 : index
    %c0_58 = arith.constant 0 : index
    %126 = vector.load %arg13[%c0_56, %c0_57, %c0_58] : memref<2x32x128xf32, #tpu.memory_space<vmem>>, vector<1x32x128xf32>
    %127 = vector.shape_cast %126 : vector<1x32x128xf32> to vector<32x128xf32>
    %cst_59 = arith.constant dense<0.000000e+00> : vector<16x128xf32>
    %128 = tpu.matmul %125, %127, %cst_59 {dimension_numbers = #tpu.dot_dimension_numbers<[1], [0], [0], [1], [0, 0, 1, 1], [], []>} : vector<16x32xf32>, vector<32x128xf32>, vector<16x128xf32> -> vector<16x128xf32>
    %c0_60 = arith.constant 0 : index
    %c0_61 = arith.constant 0 : index
    %c0_62 = arith.constant 0 : index
    %129 = vector.load %arg14[%c0_60, %c0_61, %c0_62] : memref<2x1x128xf32, #tpu.memory_space<vmem>>, vector<1x1x128xf32>
    %130 = vector.shape_cast %129 : vector<1x1x128xf32> to vector<1x128xf32>
    %131 = vector.broadcast %130 : vector<1x128xf32> to vector<16x128xf32>
    %132 = arith.addf %128, %131 : vector<16x128xf32>
    %cst_63 = arith.constant 1.702000e+00 : f32
    %133 = vector.broadcast %cst_63 : f32 to vector<16x128xf32>
    %134 = arith.mulf %133, %132 : vector<16x128xf32>
    %135 = arith.negf %134 : vector<16x128xf32>
    %136 = math.exp %135 : vector<16x128xf32>
    %cst_64 = arith.constant 1.000000e+00 : f32
    %137 = vector.broadcast %cst_64 : f32 to vector<16x128xf32>
    %138 = arith.addf %137, %136 : vector<16x128xf32>
    %139 = arith.divf %137, %138 : vector<16x128xf32>
    %140 = arith.mulf %132, %139 : vector<16x128xf32>
    %c0_65 = arith.constant 0 : index
    %c0_66 = arith.constant 0 : index
    %c0_67 = arith.constant 0 : index
    %141 = vector.load %arg15[%c0_65, %c0_66, %c0_67] : memref<2x128x32xf32, #tpu.memory_space<vmem>>, vector<1x128x32xf32>
    %142 = vector.shape_cast %141 : vector<1x128x32xf32> to vector<128x32xf32>
    %cst_68 = arith.constant dense<0.000000e+00> : vector<16x32xf32>
    %143 = tpu.matmul %140, %142, %cst_68 {dimension_numbers = #tpu.dot_dimension_numbers<[1], [0], [0], [1], [0, 0, 1, 1], [], []>} : vector<16x128xf32>, vector<128x32xf32>, vector<16x32xf32> -> vector<16x32xf32>
    %144 = arith.addf %101, %143 : vector<16x32xf32>
    %c0_69 = arith.constant 0 : index
    %c0_70 = arith.constant 0 : index
    %c0_71 = arith.constant 0 : index
    %145 = vector.load %arg16[%c0_69, %c0_70, %c0_71] : memref<2x1x32xf32, #tpu.memory_space<vmem>>, vector<1x1x32xf32>
    %146 = vector.shape_cast %145 : vector<1x1x32xf32> to vector<1x32xf32>
    %147 = vector.broadcast %146 : vector<1x32xf32> to vector<16x32xf32>
    %148 = arith.addf %144, %147 : vector<16x32xf32>
    %c1 = arith.constant 1 : index
    %c0_72 = arith.constant 0 : index
    %c0_73 = arith.constant 0 : index
    %149 = vector.load %arg5[%c1, %c0_72, %c0_73] : memref<2x1x32xf32, #tpu.memory_space<vmem>>, vector<1x1x32xf32>
    %150 = vector.shape_cast %149 : vector<1x1x32xf32> to vector<1x32xf32>
    %c1_74 = arith.constant 1 : index
    %c0_75 = arith.constant 0 : index
    %c0_76 = arith.constant 0 : index
    %151 = vector.load %arg6[%c1_74, %c0_75, %c0_76] : memref<2x1x32xf32, #tpu.memory_space<vmem>>, vector<1x1x32xf32>
    %152 = vector.shape_cast %151 : vector<1x1x32xf32> to vector<1x32xf32>
    %cst_77 = arith.constant dense<0.000000e+00> : vector<16xf32>
    %153 = vector.multi_reduction <add>, %148, %cst_77 [1] : vector<16x32xf32> to vector<16xf32>
    %154 = vector.shape_cast %153 : vector<16xf32> to vector<16x1xf32>
    %cst_78 = arith.constant 3.200000e+01 : f32
    %155 = vector.broadcast %cst_78 : f32 to vector<16x1xf32>
    %156 = arith.divf %154, %155 : vector<16x1xf32>
    %157 = vector.broadcast %156 : vector<16x1xf32> to vector<16x32xf32>
    %158 = arith.subf %148, %157 : vector<16x32xf32>
    %159 = arith.mulf %158, %158 : vector<16x32xf32>
    %cst_79 = arith.constant dense<0.000000e+00> : vector<16xf32>
    %160 = vector.multi_reduction <add>, %159, %cst_79 [1] : vector<16x32xf32> to vector<16xf32>
    %161 = vector.shape_cast %160 : vector<16xf32> to vector<16x1xf32>
    %cst_80 = arith.constant 3.200000e+01 : f32
    %162 = vector.broadcast %cst_80 : f32 to vector<16x1xf32>
    %163 = arith.divf %161, %162 : vector<16x1xf32>
    %cst_81 = arith.constant 9.99999974E-6 : f32
    %164 = vector.broadcast %cst_81 : f32 to vector<16x1xf32>
    %165 = arith.addf %163, %164 : vector<16x1xf32>
    %166 = math.rsqrt %165 : vector<16x1xf32>
    %167 = vector.broadcast %166 : vector<16x1xf32> to vector<16x32xf32>
    %168 = arith.mulf %158, %167 : vector<16x32xf32>
    %169 = vector.broadcast %150 : vector<1x32xf32> to vector<16x32xf32>
    %170 = arith.mulf %168, %169 : vector<16x32xf32>
    %171 = vector.broadcast %152 : vector<1x32xf32> to vector<16x32xf32>
    %172 = arith.addf %170, %171 : vector<16x32xf32>
    %c1_82 = arith.constant 1 : index
    %c0_83 = arith.constant 0 : index
    %c0_84 = arith.constant 0 : index
    %173 = vector.load %arg7[%c1_82, %c0_83, %c0_84] : memref<2x32x96xf32, #tpu.memory_space<vmem>>, vector<1x32x96xf32>
    %174 = vector.shape_cast %173 : vector<1x32x96xf32> to vector<32x96xf32>
    %cst_85 = arith.constant dense<0.000000e+00> : vector<16x96xf32>
    %175 = tpu.matmul %172, %174, %cst_85 {dimension_numbers = #tpu.dot_dimension_numbers<[1], [0], [0], [1], [0, 0, 1, 1], [], []>} : vector<16x32xf32>, vector<32x96xf32>, vector<16x96xf32> -> vector<16x96xf32>
    %c1_86 = arith.constant 1 : index
    %c0_87 = arith.constant 0 : index
    %c0_88 = arith.constant 0 : index
    %176 = vector.load %arg8[%c1_86, %c0_87, %c0_88] : memref<2x1x96xf32, #tpu.memory_space<vmem>>, vector<1x1x96xf32>
    %177 = vector.shape_cast %176 : vector<1x1x96xf32> to vector<1x96xf32>
    %178 = vector.broadcast %177 : vector<1x96xf32> to vector<16x96xf32>
    %179 = arith.addf %175, %178 : vector<16x96xf32>
    %180 = vector.extract_strided_slice %179 {offsets = [0, 0], sizes = [16, 32], strides = [1, 1]} : vector<16x96xf32> to vector<16x32xf32>
    %181 = vector.extract_strided_slice %179 {offsets = [0, 32], sizes = [16, 32], strides = [1, 1]} : vector<16x96xf32> to vector<16x32xf32>
    %182 = vector.extract_strided_slice %179 {offsets = [0, 64], sizes = [16, 32], strides = [1, 1]} : vector<16x96xf32> to vector<16x32xf32>
    %183 = vector.shape_cast %180 : vector<16x32xf32> to vector<2x8x4x8xf32>
    %184 = tpu.transpose %183, [0, 2, 1, 3] : vector<2x8x4x8xf32> -> vector<2x4x8x8xf32>
    %185 = vector.shape_cast %184 : vector<2x4x8x8xf32> to vector<8x8x8xf32>
    %186 = vector.shape_cast %181 : vector<16x32xf32> to vector<2x8x4x8xf32>
    %187 = tpu.transpose %186, [0, 2, 1, 3] : vector<2x8x4x8xf32> -> vector<2x4x8x8xf32>
    %188 = vector.shape_cast %187 : vector<2x4x8x8xf32> to vector<8x8x8xf32>
    %189 = vector.shape_cast %182 : vector<16x32xf32> to vector<2x8x4x8xf32>
    %190 = tpu.transpose %189, [0, 2, 1, 3] : vector<2x8x4x8xf32> -> vector<2x4x8x8xf32>
    %191 = vector.shape_cast %190 : vector<2x4x8x8xf32> to vector<8x8x8xf32>
    "tpu.trace_start"() <{level = 10 : i32, message = "bqd,bkd->bqk"}> : () -> ()
    %cst_89 = arith.constant dense<0.000000e+00> : vector<8x8x8xf32>
    %192 = tpu.matmul %185, %188, %cst_89 {dimension_numbers = #tpu.dot_dimension_numbers<[2], [2], [1], [1], [0, 0, 0, 1, 1, 1], [0], [0]>} : vector<8x8x8xf32>, vector<8x8x8xf32>, vector<8x8x8xf32> -> vector<8x8x8xf32>
    "tpu.trace_stop"() : () -> ()
    %193 = vector.shape_cast %32 : vector<1x8xf32> to vector<1x1x8xf32>
    %194 = vector.broadcast %193 : vector<1x1x8xf32> to vector<8x8x8xf32>
    %195 = arith.addf %192, %194 : vector<8x8x8xf32>
    %cst_90 = arith.constant dense<0xFF800000> : vector<8x8xf32>
    %196 = vector.multi_reduction <maximumf>, %195, %cst_90 [2] : vector<8x8x8xf32> to vector<8x8xf32>
    %197 = vector.shape_cast %196 : vector<8x8xf32> to vector<8x8x1xf32>
    %198 = vector.broadcast %197 : vector<8x8x1xf32> to vector<8x8x8xf32>
    %199 = arith.subf %195, %198 : vector<8x8x8xf32>
    %200 = math.exp %199 : vector<8x8x8xf32>
    %cst_91 = arith.constant dense<0.000000e+00> : vector<8x8xf32>
    %201 = vector.multi_reduction <add>, %200, %cst_91 [2] : vector<8x8x8xf32> to vector<8x8xf32>
    %202 = vector.shape_cast %201 : vector<8x8xf32> to vector<8x8x1xf32>
    %203 = tpu.reciprocal %202 {approx = true} : vector<8x8x1xf32> -> vector<8x8x1xf32>
    %204 = vector.broadcast %203 : vector<8x8x1xf32> to vector<8x8x8xf32>
    %205 = arith.mulf %200, %204 : vector<8x8x8xf32>
    "tpu.trace_start"() <{level = 10 : i32, message = "bqk,bkd->bqd"}> : () -> ()
    %cst_92 = arith.constant dense<0.000000e+00> : vector<8x8x8xf32>
    %206 = tpu.matmul %205, %191, %cst_92 {dimension_numbers = #tpu.dot_dimension_numbers<[2], [1], [1], [2], [0, 0, 0, 1, 1, 2], [0], [0]>} : vector<8x8x8xf32>, vector<8x8x8xf32>, vector<8x8x8xf32> -> vector<8x8x8xf32>
    "tpu.trace_stop"() : () -> ()
    %207 = vector.shape_cast %206 : vector<8x8x8xf32> to vector<2x4x8x8xf32>
    %208 = tpu.transpose %207, [0, 2, 1, 3] : vector<2x4x8x8xf32> -> vector<2x8x4x8xf32>
    %209 = vector.shape_cast %208 : vector<2x8x4x8xf32> to vector<16x32xf32>
    %c1_93 = arith.constant 1 : index
    %c0_94 = arith.constant 0 : index
    %c0_95 = arith.constant 0 : index
    %210 = vector.load %arg9[%c1_93, %c0_94, %c0_95] : memref<2x32x32xf32, #tpu.memory_space<vmem>>, vector<1x32x32xf32>
    %211 = vector.shape_cast %210 : vector<1x32x32xf32> to vector<32x32xf32>
    %cst_96 = arith.constant dense<0.000000e+00> : vector<16x32xf32>
    %212 = tpu.matmul %209, %211, %cst_96 {dimension_numbers = #tpu.dot_dimension_numbers<[1], [0], [0], [1], [0, 0, 1, 1], [], []>} : vector<16x32xf32>, vector<32x32xf32>, vector<16x32xf32> -> vector<16x32xf32>
    %213 = arith.addf %148, %212 : vector<16x32xf32>
    %c1_97 = arith.constant 1 : index
    %c0_98 = arith.constant 0 : index
    %c0_99 = arith.constant 0 : index
    %214 = vector.load %arg10[%c1_97, %c0_98, %c0_99] : memref<2x1x32xf32, #tpu.memory_space<vmem>>, vector<1x1x32xf32>
    %215 = vector.shape_cast %214 : vector<1x1x32xf32> to vector<1x32xf32>
    %216 = vector.broadcast %215 : vector<1x32xf32> to vector<16x32xf32>
    %217 = arith.addf %213, %216 : vector<16x32xf32>
    %c1_100 = arith.constant 1 : index
    %c0_101 = arith.constant 0 : index
    %c0_102 = arith.constant 0 : index
    %218 = vector.load %arg11[%c1_100, %c0_101, %c0_102] : memref<2x1x32xf32, #tpu.memory_space<vmem>>, vector<1x1x32xf32>
    %219 = vector.shape_cast %218 : vector<1x1x32xf32> to vector<1x32xf32>
    %c1_103 = arith.constant 1 : index
    %c0_104 = arith.constant 0 : index
    %c0_105 = arith.constant 0 : index
    %220 = vector.load %arg12[%c1_103, %c0_104, %c0_105] : memref<2x1x32xf32, #tpu.memory_space<vmem>>, vector<1x1x32xf32>
    %221 = vector.shape_cast %220 : vector<1x1x32xf32> to vector<1x32xf32>
    %cst_106 = arith.constant dense<0.000000e+00> : vector<16xf32>
    %222 = vector.multi_reduction <add>, %217, %cst_106 [1] : vector<16x32xf32> to vector<16xf32>
    %223 = vector.shape_cast %222 : vector<16xf32> to vector<16x1xf32>
    %cst_107 = arith.constant 3.200000e+01 : f32
    %224 = vector.broadcast %cst_107 : f32 to vector<16x1xf32>
    %225 = arith.divf %223, %224 : vector<16x1xf32>
    %226 = vector.broadcast %225 : vector<16x1xf32> to vector<16x32xf32>
    %227 = arith.subf %217, %226 : vector<16x32xf32>
    %228 = arith.mulf %227, %227 : vector<16x32xf32>
    %cst_108 = arith.constant dense<0.000000e+00> : vector<16xf32>
    %229 = vector.multi_reduction <add>, %228, %cst_108 [1] : vector<16x32xf32> to vector<16xf32>
    %230 = vector.shape_cast %229 : vector<16xf32> to vector<16x1xf32>
    %cst_109 = arith.constant 3.200000e+01 : f32
    %231 = vector.broadcast %cst_109 : f32 to vector<16x1xf32>
    %232 = arith.divf %230, %231 : vector<16x1xf32>
    %cst_110 = arith.constant 9.99999974E-6 : f32
    %233 = vector.broadcast %cst_110 : f32 to vector<16x1xf32>
    %234 = arith.addf %232, %233 : vector<16x1xf32>
    %235 = math.rsqrt %234 : vector<16x1xf32>
    %236 = vector.broadcast %235 : vector<16x1xf32> to vector<16x32xf32>
    %237 = arith.mulf %227, %236 : vector<16x32xf32>
    %238 = vector.broadcast %219 : vector<1x32xf32> to vector<16x32xf32>
    %239 = arith.mulf %237, %238 : vector<16x32xf32>
    %240 = vector.broadcast %221 : vector<1x32xf32> to vector<16x32xf32>
    %241 = arith.addf %239, %240 : vector<16x32xf32>
    %c1_111 = arith.constant 1 : index
    %c0_112 = arith.constant 0 : index
    %c0_113 = arith.constant 0 : index
    %242 = vector.load %arg13[%c1_111, %c0_112, %c0_113] : memref<2x32x128xf32, #tpu.memory_space<vmem>>, vector<1x32x128xf32>
    %243 = vector.shape_cast %242 : vector<1x32x128xf32> to vector<32x128xf32>
    %cst_114 = arith.constant dense<0.000000e+00> : vector<16x128xf32>
    %244 = tpu.matmul %241, %243, %cst_114 {dimension_numbers = #tpu.dot_dimension_numbers<[1], [0], [0], [1], [0, 0, 1, 1], [], []>} : vector<16x32xf32>, vector<32x128xf32>, vector<16x128xf32> -> vector<16x128xf32>
    %c1_115 = arith.constant 1 : index
    %c0_116 = arith.constant 0 : index
    %c0_117 = arith.constant 0 : index
    %245 = vector.load %arg14[%c1_115, %c0_116, %c0_117] : memref<2x1x128xf32, #tpu.memory_space<vmem>>, vector<1x1x128xf32>
    %246 = vector.shape_cast %245 : vector<1x1x128xf32> to vector<1x128xf32>
    %247 = vector.broadcast %246 : vector<1x128xf32> to vector<16x128xf32>
    %248 = arith.addf %244, %247 : vector<16x128xf32>
    %cst_118 = arith.constant 1.702000e+00 : f32
    %249 = vector.broadcast %cst_118 : f32 to vector<16x128xf32>
    %250 = arith.mulf %249, %248 : vector<16x128xf32>
    %251 = arith.negf %250 : vector<16x128xf32>
    %252 = math.exp %251 : vector<16x128xf32>
    %cst_119 = arith.constant 1.000000e+00 : f32
    %253 = vector.broadcast %cst_119 : f32 to vector<16x128xf32>
    %254 = arith.addf %253, %252 : vector<16x128xf32>
    %255 = arith.divf %253, %254 : vector<16x128xf32>
    %256 = arith.mulf %248, %255 : vector<16x128xf32>
    %c1_120 = arith.constant 1 : index
    %c0_121 = arith.constant 0 : index
    %c0_122 = arith.constant 0 : index
    %257 = vector.load %arg15[%c1_120, %c0_121, %c0_122] : memref<2x128x32xf32, #tpu.memory_space<vmem>>, vector<1x128x32xf32>
    %258 = vector.shape_cast %257 : vector<1x128x32xf32> to vector<128x32xf32>
    %cst_123 = arith.constant dense<0.000000e+00> : vector<16x32xf32>
    %259 = tpu.matmul %256, %258, %cst_123 {dimension_numbers = #tpu.dot_dimension_numbers<[1], [0], [0], [1], [0, 0, 1, 1], [], []>} : vector<16x128xf32>, vector<128x32xf32>, vector<16x32xf32> -> vector<16x32xf32>
    %260 = arith.addf %217, %259 : vector<16x32xf32>
    %c1_124 = arith.constant 1 : index
    %c0_125 = arith.constant 0 : index
    %c0_126 = arith.constant 0 : index
    %261 = vector.load %arg16[%c1_124, %c0_125, %c0_126] : memref<2x1x32xf32, #tpu.memory_space<vmem>>, vector<1x1x32xf32>
    %262 = vector.shape_cast %261 : vector<1x1x32xf32> to vector<1x32xf32>
    %263 = vector.broadcast %262 : vector<1x32xf32> to vector<16x32xf32>
    %264 = arith.addf %260, %263 : vector<16x32xf32>
    %c0_127 = arith.constant 0 : index
    %c0_128 = arith.constant 0 : index
    %265 = vector.load %arg21[%c0_127, %c0_128] : memref<16x32xf32, #tpu.memory_space<vmem>>, vector<16x32xf32>
    tpu.vector_store %arg21[%c0_127, %c0_128], %264 {strides = array<i32>} : memref<16x32xf32, #tpu.memory_space<vmem>>, vector<16x32xf32>,
    %c0_129 = arith.constant 0 : index
    %c0_130 = arith.constant 0 : index
    %266 = tpu.strided_load %arg21[%c0_129, %c0_130] {strides = array<i32: 8, 1>} : memref<16x32xf32, #tpu.memory_space<vmem>>, vector<2x32xf32>
    %c0_131 = arith.constant 0 : index
    %c0_132 = arith.constant 0 : index
    %267 = vector.load %arg17[%c0_131, %c0_132] : memref<1x32xf32, #tpu.memory_space<vmem>>, vector<1x32xf32>
    %c0_133 = arith.constant 0 : index
    %c0_134 = arith.constant 0 : index
    %268 = vector.load %arg18[%c0_133, %c0_134] : memref<1x32xf32, #tpu.memory_space<vmem>>, vector<1x32xf32>
    %cst_135 = arith.constant dense<0.000000e+00> : vector<2xf32>
    %269 = vector.multi_reduction <add>, %266, %cst_135 [1] : vector<2x32xf32> to vector<2xf32>
    %270 = vector.shape_cast %269 : vector<2xf32> to vector<2x1xf32>
    %cst_136 = arith.constant 3.200000e+01 : f32
    %271 = vector.broadcast %cst_136 : f32 to vector<2x1xf32>
    %272 = arith.divf %270, %271 : vector<2x1xf32>
    %273 = vector.broadcast %272 : vector<2x1xf32> to vector<2x32xf32>
    %274 = arith.subf %266, %273 : vector<2x32xf32>
    %275 = arith.mulf %274, %274 : vector<2x32xf32>
    %cst_137 = arith.constant dense<0.000000e+00> : vector<2xf32>
    %276 = vector.multi_reduction <add>, %275, %cst_137 [1] : vector<2x32xf32> to vector<2xf32>
    %277 = vector.shape_cast %276 : vector<2xf32> to vector<2x1xf32>
    %cst_138 = arith.constant 3.200000e+01 : f32
    %278 = vector.broadcast %cst_138 : f32 to vector<2x1xf32>
    %279 = arith.divf %277, %278 : vector<2x1xf32>
    %cst_139 = arith.constant 9.99999974E-6 : f32
    %280 = vector.broadcast %cst_139 : f32 to vector<2x1xf32>
    %281 = arith.addf %279, %280 : vector<2x1xf32>
    %282 = math.rsqrt %281 : vector<2x1xf32>
    %283 = vector.broadcast %282 : vector<2x1xf32> to vector<2x32xf32>
    %284 = arith.mulf %274, %283 : vector<2x32xf32>
    %285 = vector.broadcast %267 : vector<1x32xf32> to vector<2x32xf32>
    %286 = arith.mulf %284, %285 : vector<2x32xf32>
    %287 = vector.broadcast %268 : vector<1x32xf32> to vector<2x32xf32>
    %288 = arith.addf %286, %287 : vector<2x32xf32>
    %c0_140 = arith.constant 0 : index
    %c0_141 = arith.constant 0 : index
    %289 = vector.load %arg19[%c0_140, %c0_141] : memref<32x16xf32, #tpu.memory_space<vmem>>, vector<32x16xf32>
    %cst_142 = arith.constant dense<0.000000e+00> : vector<2x16xf32>
    %290 = tpu.matmul %288, %289, %cst_142 {dimension_numbers = #tpu.dot_dimension_numbers<[1], [0], [0], [1], [0, 0, 1, 1], [], []>} : vector<2x32xf32>, vector<32x16xf32>, vector<2x16xf32> -> vector<2x16xf32>
    %c0_143 = arith.constant 0 : index
    %c0_144 = arith.constant 0 : index
    %291 = vector.load %arg20[%c0_143, %c0_144] : memref<2x16xf32, #tpu.memory_space<vmem>>, vector<2x16xf32>
    tpu.vector_store %arg20[%c0_143, %c0_144], %290 {strides = array<i32>} : memref<2x16xf32, #tpu.memory_space<vmem>>, vector<2x16xf32>,
    return
  }
}

</mosaic_0001>

<bundles_post_ra>
// kernel: image_clip_forward.1
= control target key start
LH: loop header
LB: loop body
LE: loop exit
PB: predicated region body
PF: predicated region fallthrough
CT: control target
= control target key end

     0   :  { %s8512_s0 = inlined_call_operand.vmem [shape: f32[16,192], index: 0, kind: input, shape index: {}]   ;;  %s8513_s1 = inlined_call_operand.vmem [shape: f32[16,32], index: 1, kind: input, shape index: {}]   ;;  %s8514_s2 = inlined_call_operand.vmem [shape: f32[192,32], index: 2, kind: input, shape index: {}]   ;;  %s8515_s3 = inlined_call_operand.vmem [shape: f32[1,32], index: 3, kind: input, shape index: {}]   ;;  %s8516_s4 = inlined_call_operand.vmem [shape: f32[1,32], index: 4, kind: input, shape index: {}]   ;;  %s8517_s5 = inlined_call_operand.vmem [shape: f32[2,1,32], index: 5, kind: input, shape index: {}]   ;;  %s8518_s6 = inlined_call_operand.vmem [shape: f32[2,1,32], index: 6, kind: input, shape index: {}]   ;;  %s8519_s7 = inlined_call_operand.vmem [shape: f32[2,32,96], index: 7, kind: input, shape index: {}]   ;;  %s8520_s8 = inlined_call_operand.vmem [shape: f32[2,1,96], index: 8, kind: input, shape index: {}]   ;;  %s8521_s9 = inlined_call_operand.vmem [shape: f32[2,32,32], index: 9, kind: input, shape index: {}]   ;;  %s8522_s10 = inlined_call_operand.vmem [shape: f32[2,1,32], index: 10, kind: input, shape index: {}]   ;;  %s8523_s11 = inlined_call_operand.vmem [shape: f32[2,1,32], index: 11, kind: input, shape index: {}]   ;;  %s8524_s12 = inlined_call_operand.vmem [shape: f32[2,1,32], index: 12, kind: input, shape index: {}]   ;;  %s8525_s13 = inlined_call_operand.vmem [shape: f32[2,32,128], index: 13, kind: input, shape index: {}]   ;;  %s8526_s14 = inlined_call_operand.vmem [shape: f32[2,1,128], index: 14, kind: input, shape index: {}]   ;;  %s8527_s15 = inlined_call_operand.vmem [shape: f32[2,128,32], index: 15, kind: input, shape index: {}]   ;;  %s8528_s16 = inlined_call_operand.vmem [shape: f32[2,1,32], index: 16, kind: input, shape index: {}]   ;;  %s8529_s17 = inlined_call_operand.vmem [shape: f32[1,32], index: 17, kind: input, shape index: {}]   ;;  %s8530_s18 = inlined_call_operand.vmem [shape: f32[1,32], index: 18, kind: input, shape index: {}]   ;;  %s8531_s19 = inlined_call_operand.vmem [shape: f32[32,16], index: 19, kind: input, shape index: {}]   ;;  %s8532_s20 = inlined_call_operand.hbm [shape: f32[2,16], index: 20, kind: output, shape index: {}]  }
   0x1   :  { %8538 = sst [smem:[#allocation6_spill]] %s8512_s0 }
   0x2   :  { %8539 = sst [smem:[#allocation7_spill]] %s8513_s1 }
   0x3   :  { %8540 = sst [smem:[#allocation8_spill]] %s8514_s2 }
   0x4   :  { %8541 = sst [smem:[#allocation9_spill]] %s8515_s3 }
   0x5   :  { %8542 = sst [smem:[#allocation10_spill]] %s8516_s4 }
   0x6   :  { %s8543_s23 = sld [smem:[#allocation8_spill]]  ;;  %v7171_v3 = vmov 0.0|0.0   ;;  %vm96_vm0 = vcmask 523264   ;;  %s8544_s25 = sld [smem:[#allocation6_spill]] }
   0x7   :  { %6876 = vmatprep.subr.bf16.mxu0 %v7171_v3 }
   0xc   :  { %v70_v0 = vld [vmem:[%s8543_s23] sm:$0xff]  ;;  %v71_v1 = vld [vmem:[%s8543_s23 + $0x8] sm:$0xff]  ;;  %v72_v2 = vld [vmem:[%s8543_s23 + $0x10] sm:$0xff] }
   0xd   :  { %v6877_v4 = vpack.c.bf16 %v71_v1, %v70_v0  ;;  %v73_v5 = vld [vmem:[%s8543_s23 + $0x18] sm:$0xff]  ;;  %v74_v7 = vld [vmem:[%s8543_s23 + $0x20] sm:$0xff]  ;;  %v75_v8 = vld [vmem:[%s8543_s23 + $0x28] sm:$0xff] }
   0xe   :  { %v6880_v6 = vpack.c.bf16 %v73_v5, %v72_v2  ;;  %v6883_v9 = vpack.c.bf16 %v75_v8, %v74_v7  ;;  %v76_v10 = vld [vmem:[%s8543_s23 + $0x30] sm:$0xff]  ;;  %v77_v11 = vld [vmem:[%s8543_s23 + $0x38] sm:$0xff]  ;;  %v67_v12 = vld [vmem:[%s8544_s25 + $0x8] sm:$0xff] }
   0xf   :  { %6878 = vmatpush1.bf16.msra.mxu0 %v6877_v4  ;;  %6273 = vmatprep.mubr.msk.f32.mxu0 %vm96_vm0, %v67_v12 }
  0x10   :  { %6879 = vmatprep.subr.bf16.mxu0 %v7171_v3 }
  0x13   :  { %6881 = vmatpush1.bf16.msra.mxu0 %v6880_v6 }
  0x14   :  { %6882 = vmatprep.subr.bf16.mxu0 %v7171_v3 }
  0x15   :  { %25 = vsyncpa [#allocation4], 0  ;;  %v6886_v13 = vpack.c.bf16 %v77_v11, %v76_v10  ;;  %v78_v14 = vld [vmem:[%s8543_s23 + $0x40] sm:$0xff]  ;;  %v79_v15 = vld [vmem:[%s8543_s23 + $0x48] sm:$0xff]  ;;  %s8545_s3 = sld [smem:[#allocation7_spill]]  ;;  %vm180_vm1 = vcmask 261120  }
  0x16   :  { %v6889_v16 = vpack.c.bf16 %v79_v15, %v78_v14  ;;  %v80_v17 = vld [vmem:[%s8543_s23 + $0x50] sm:$0xff]  ;;  %v81_v18 = vld [vmem:[%s8543_s23 + $0x58] sm:$0xff]  ;;  %v82_v20 = vld [vmem:[%s8543_s23 + $0x60] sm:$0xff]  ;;  %s8546_s4 = sld [smem:[#allocation9_spill]]  ;;  %s8547_s0 = sld [smem:[#allocation10_spill]]  ;;  %vm7177_vm2 = vmmov 0  }
  0x17   :  { %6884 = vmatpush1.bf16.msra.mxu0 %v6883_v9  ;;  %v6892_v19 = vpack.c.bf16 %v81_v18, %v80_v17  ;;  %v83_v21 = vld [vmem:[%s8543_s23 + $0x68] sm:$0xff]  ;;  %v84_v23 = vld [vmem:[%s8543_s23 + $0x70] sm:$0xff]  ;;  %v85_v24 = vld [vmem:[%s8543_s23 + $0x78] sm:$0xff]  ;;  %s7173_s21 = smov 120   ;;  %s7174_s1 = smov 104   ;;  %vm1248_vm3 = vcmask 64512  }
  0x18   :  { %6885 = vmatprep.subr.bf16.mxu0 %v7171_v3  ;;  %v6895_v22 = vpack.c.bf16 %v83_v21, %v82_v20  ;;  %v6898_v25 = vpack.c.bf16 %v85_v24, %v84_v23  ;;  %v86_v26 = vld [vmem:[%s8543_s23 + $0x80] sm:$0xff]  ;;  %v87_v27 = vld [vmem:[%s8543_s23 + $0x88] sm:$0xff]  ;;  %v88_v29 = vld [vmem:[%s8543_s23 + $0x90] sm:$0xff]  ;;  %s7175_s22 = smov 96   ;;  %s7181_s24 = smov 64   ;;  %vm2827_vm5 = vcmask 130048  }
  0x19   :  { %v6901_v28 = vpack.c.bf16 %v87_v27, %v86_v26  ;;  %v89_v30 = vld [vmem:[%s8543_s23 + $0x98] sm:$0xff]  ;;  %v90_v32 = vld [vmem:[%s8543_s23 + $0xa0] sm:$0xff]  ;;  %v91_v33 = vld [vmem:[%s8543_s23 + $0xa8] sm:$0xff]  ;;  %s7183_s2 = smov 16   ;;  %vm2830_vm6 = vcmask 195584   ;;  %vm6152_vm7 = vcmask 254976  }
  0x1a   :  { %v6904_v31 = vpack.c.bf16 %v89_v30, %v88_v29  ;;  %v6907_v34 = vpack.c.bf16 %v91_v33, %v90_v32  ;;  %v92_v35 = vld [vmem:[%s8543_s23 + $0xb0] sm:$0xff]  ;;  %v93_v36 = vld [vmem:[%s8543_s23 + $0xb8] sm:$0xff]  ;;  %v66_v38 = vld [vmem:[%s8544_s25] sm:$0xff]  ;;  %s7182_s23 = smov 8   ;;  %vm6257_vm8 = vcmask 123904  }
  0x1b   :  { %6887 = vmatpush1.bf16.msra.mxu0 %v6886_v13  ;;  %v6910_v37 = vpack.c.bf16 %v93_v36, %v92_v35  ;;  %v69_v39 = vld [vmem:[%s8544_s25 + $0x18] sm:$0xff]  ;;  %v68_v40 = vld [vmem:[%s8544_s25 + $0x10] sm:$0xff]  ;;  %v94_v41 = vld [vmem:[%s8545_s3] sm:$0xff] }
  0x1c   :  { %6888 = vmatprep.subr.bf16.mxu0 %v7171_v3  ;;  %v95_v45 = vld [vmem:[%s8545_s3 + $0x8] sm:$0xff]  ;;  %v6275_v5 = vld [vmem:[%s8546_s4] ss:$0 sm:$0xff]  ;;  %v275_v30 = vld [vmem:[%s8519_s7 + $0x18] sm:$0xff]  ;;  %s8536_s3 = smov 24  }
  0x1d   :  { %v6276_v7 = vld [vmem:[%s8547_s0] ss:$0 sm:$0xff]  ;;  %v273_v27 = vld [vmem:[%s8519_s7 + $0x8] sm:$0xff]  ;;  %s7172_s0 = smov 112  }
  0x1e   :  { %v272_v26 = vld [vmem:[%s8519_s7] sm:$0xff] }
  0x1f   :  { %6890 = vmatpush1.bf16.msra.mxu0 %v6889_v16  ;;  %v6912_v29 = vpack.c.bf16 %v273_v27, %v272_v26 }
  0x20   :  { %6891 = vmatprep.subr.bf16.mxu0 %v7171_v3 }
  0x23   :  { %6893 = vmatpush1.bf16.msra.mxu0 %v6892_v19 }
  0x24   :  { %6894 = vmatprep.subr.bf16.mxu0 %v7171_v3 }
  0x27   :  { %6896 = vmatpush1.bf16.msra.mxu0 %v6895_v22 }
  0x28   :  { %6897 = vmatprep.subr.bf16.mxu0 %v7171_v3 }
  0x2b   :  { %6899 = vmatpush1.bf16.msra.mxu0 %v6898_v25 }
  0x2c   :  { %6900 = vmatprep.subr.bf16.mxu0 %v7171_v3 }
  0x2f   :  { %6902 = vmatpush1.bf16.msra.mxu0 %v6901_v28  ;;  %v274_v28 = vld [vmem:[%s8519_s7 + $0x10] sm:$0xff] }
  0x30   :  { %6903 = vmatprep.subr.bf16.mxu0 %v7171_v3 }
  0x33   :  { %6905 = vmatpush1.bf16.msra.mxu0 %v6904_v31  ;;  %v6916_v31 = vpack.c.bf16 %v275_v30, %v274_v28 }
  0x34   :  { %6906 = vmatprep.subr.bf16.mxu0 %v7171_v3 }
  0x37   :  { %6908 = vmatpush1.bf16.msra.mxu0 %v6907_v34 }
  0x38   :  { %6909 = vmatprep.subr.bf16.mxu0 %v7171_v3 }
  0x3b   :  { %6911 = vmatpush1.bf16.msra.mxu0 %v6910_v37 }
  0x3c   :  { %6913 = vmatprep.subr.bf16.mxu0 %v6912_v29 }
  0x3e   :  { %168 = vmatmul.mubr.f32.vlgmr.msra.gmra.mrb[0].mxu0 %v66_v38 }
  0x3f   :  { %6274 = vmatprep.mubr.msk.f32.mxu0 %vm96_vm0, %v69_v39  ;;  %6915 = vmatpush3.bf16.msra.mxu0 %v6912_v29  ;;  %v6277_v39 = vld [vmem:[%s8517_s5] ss:$0 sm:$0xff] }
  0x40   :  { %6917 = vmatprep.subr.bf16.mxu0 %v6916_v31 }
  0x42   :  { %173 = vmatmul.mubr.f32.gmra.mrb[2].mxu0 %v68_v40 }
  0x43   :  { %6919 = vmatpush3.bf16.msra.mxu0 %v6916_v31 }
 0x111   :  { %v169_v42 = vpop.f32.mrb[0].mxu0 }
 0x112   :  { %v170_v43 = vadd.f32 %v169_v42, %v94_v41  ;;  %v171_v44 = vpop.f32.mrb[1].mxu0  ;;  %v6278_v41 = vld [vmem:[%s8518_s6] ss:$0 sm:$0xff] }
 0x114   :  { %v181_v46 = vsel %vm180_vm1, %v170_v43, 0.0 }
 0x115   :  { %v174_v47 = vpop.f32.mrb[2].mxu0  ;;  %182 = vadd.xlane.f32.xlu0 %v181_v46 }
 0x116   :  { %v175_v48 = vadd.f32 %v174_v47, %v95_v45  ;;  %v176_v49 = vpop.f32.mrb[3].mxu0 }
 0x118   :  { %v184_v50 = vsel %vm180_vm1, %v175_v48, 0.0 }
 0x119   :  { %185 = vadd.xlane.f32.xlu0 %v184_v50 }
 0x1a2   :  { %v183_v51 = vpop.xlane.xlu0 %182 }
 0x1a3   :  { %v188_v52 = vmul.f32 0.03125, %v183_v51 }
 0x1a5   :  { %v190_v53 = vsub.f32 %v170_v43, %v188_v52 }
 0x1a6   :  { %v186_v54 = vpop.xlane.xlu0 %185 }
 0x1a7   :  { %v189_v55 = vmul.f32 0.03125, %v186_v54  ;;  %v192_v56 = vmul.f32 %v190_v53, %v190_v53 }
 0x1a9   :  { %v191_v57 = vsub.f32 %v175_v48, %v189_v55  ;;  %v194_v58 = vsel %vm180_vm1, %v192_v56, 0.0  ;;  %v6279_v48 = vld [vmem:[%s8520_s8] ss:$0 sm:$0xff] }
 0x1aa   :  { %195 = vadd.xlane.f32.xlu1 %v194_v58  ;;  %v7176_v58 = vmov 0.0  }
 0x1ab   :  { %v193_v59 = vmul.f32 %v191_v57, %v191_v57  ;;  %6580 = vmatprep.subr.mxu0 %v7176_v58  ;;  %6585 = vmatprep.subr.mxu1 %v7176_v58 }
 0x1ac   :  { %6587 = vmatprep.mubr.msk.f32.mxu1 %vm7177_vm2, %v7176_v58 }
 0x1ad   :  { %v197_v60 = vsel %vm180_vm1, %v193_v59, 0.0 }
 0x1ae   :  { %198 = vadd.xlane.f32.xlu1 %v197_v60  ;;  %v224_v60 = vlaneseq }
 0x237   :  { %v196_v61 = vpop.xlane.xlu1 %195 }
 0x238   :  { %v200_v62 = vmul.f32 0.03125, %v196_v61  ;;  %v7178_v61 = vmov 1983009808  }
 0x23a   :  { %v202_v63 = vadd.f32 1e-05, %v200_v62  ;;  %v387_v62 = vunpack.c.l.s4 %v7178_v61 }
 0x23b   :  { %v199_v0 = vpop.xlane.xlu1 %198 }
 0x23c   :  { %7045 = vrsqrt.f32 %v202_v63  ;;  %v201_v1 = vmul.f32 0.03125, %v199_v0  ;;  %v388_v63 = vunpack.c.0.s8 %v387_v62  ;;  %v390_v0 = vshrl.u32 %v224_v60, 7 }
 0x23e   :  { %v203_v2 = vadd.f32 1e-05, %v201_v1  ;;  %v7179_v1 = vmov 1934713408  }
 0x240   :  { %7047 = vrsqrt.f32 %v203_v2  ;;  %v419_v2 = vunpack.c.l.s4 %v7179_v1 }
 0x246   :  { %v7046_v4 = vpop.eup %7045 }
 0x247   :  { %v206_v6 = vmul.f32 %v7046_v4, %v190_v53 }
 0x249   :  { %v214_v8 = vmul.f32 %v6275_v5, %v206_v6 }
 0x24a   :  { %v7048_v9 = vpop.eup %7047 }
 0x24b   :  { %v7405_v10 = vadd.f32 %v6276_v7, %v214_v8  ;;  %v207_v11 = vmul.f32 %v7048_v9, %v191_v57 }
 0x24d   :  { %v230_v12 = vsel %vm180_vm1, %v7405_v10, 0.0  ;;  %v215_v13 = vmul.f32 %v6275_v5, %v207_v11  ;;  %v7493_v5 = vsub.s32 %v388_v63, %v390_v0 }
 0x24e   :  { %231 = vadd.xlane.f32.xlu0 %v230_v12 }
 0x24f   :  { %v7409_v14 = vadd.f32 %v6276_v7, %v215_v13  ;;  %v420_v7 = vunpack.c.0.s8 %v419_v2 }
 0x251   :  { %v233_v15 = vsel %vm180_vm1, %v7409_v14, 0.0  ;;  %v7503_v13 = vsub.s32 %v420_v7, %v390_v0 }
 0x252   :  { %234 = vadd.xlane.f32.xlu1 %v233_v15 }
 0x2db   :  { %v232_v16 = vpop.xlane.xlu0 %231 }
 0x2dc   :  { %v236_v17 = vmul.f32 0.03125, %v232_v16 }
 0x2de   :  { %v238_v18 = vsub.f32 %v7405_v10, %v236_v17 }
 0x2df   :  { %v235_v19 = vpop.xlane.xlu1 %234 }
 0x2e0   :  { %v237_v20 = vmul.f32 0.03125, %v235_v19  ;;  %v240_v21 = vmul.f32 %v238_v18, %v238_v18 }
 0x2e2   :  { %v239_v22 = vsub.f32 %v7409_v14, %v237_v20  ;;  %v242_v23 = vsel %vm180_vm1, %v240_v21, 0.0 }
 0x2e3   :  { %243 = vadd.xlane.f32.xlu0 %v242_v23 }
 0x2e4   :  { %v241_v24 = vmul.f32 %v239_v22, %v239_v22 }
 0x2e6   :  { %v245_v25 = vsel %vm180_vm1, %v241_v24, 0.0 }
 0x2e7   :  { %246 = vadd.xlane.f32.xlu1 %v245_v25 }
 0x370   :  { %v244_v32 = vpop.xlane.xlu0 %243 }
 0x371   :  { %v248_v33 = vmul.f32 0.03125, %v244_v32 }
 0x373   :  { %v250_v34 = vadd.f32 1e-05, %v248_v33 }
 0x374   :  { %v247_v35 = vpop.xlane.xlu1 %246 }
 0x375   :  { %7049 = vrsqrt.f32 %v250_v34  ;;  %v249_v36 = vmul.f32 0.03125, %v247_v35 }
 0x377   :  { %v251_v37 = vadd.f32 1e-05, %v249_v36 }
 0x379   :  { %7051 = vrsqrt.f32 %v251_v37 }
 0x37f   :  { %v7050_v38 = vpop.eup %7049 }
 0x380   :  { %v254_v40 = vmul.f32 %v7050_v38, %v238_v18 }
 0x382   :  { %v262_v42 = vmul.f32 %v6277_v39, %v254_v40 }
 0x383   :  { %v7052_v43 = vpop.eup %7051 }
 0x384   :  { %v255_v44 = vmul.f32 %v7052_v43, %v239_v22  ;;  %v270_v45 = vadd.f32 %v6278_v41, %v262_v42 }
 0x386   :  { %v263_v46 = vmul.f32 %v6277_v39, %v255_v44  ;;  %6577 = vmatprep.mubr.msk.f32.mxu0 %vm180_vm1, %v270_v45 }
 0x388   :  { %v271_v47 = vadd.f32 %v6278_v41, %v263_v46 }
 0x38a   :  { %6578 = vmatmul.mubr.msk.f32.vlgmr.msra.gmra.mrb[4].mxu0 %vm180_vm1, %v271_v47 }
 0x38b   :  { %6582 = vmatprep.mubr.msk.f32.mxu0 %vm7177_vm2, %v7176_v58 }
 0x45d   :  { %v6579_v49 = vpop.f32.mrb[4].mxu0 }
 0x45e   :  { %v355_v50 = vpop.f32.mrb[5].mxu0  ;;  %v7446_v52 = vadd.f32 %v6579_v49, %v6279_v48 }
 0x45f   :  { %v7440_v51 = vadd.f32 %v6279_v48, %v355_v50 }
 0x461   :  { %372 = vrot.lane.b32.xlu1 %v7440_v51, %s7172_s0  ;;  %366 = vrot.lane.b32.xlu0 %v7440_v51, %s7173_s21 }
 0x465   :  { %378 = vrot.lane.b32.xlu1 %v7440_v51, %s7174_s1  ;;  %374 = vrot.lane.b32.xlu0 %v7446_v52, %s7172_s0 }
 0x469   :  { %368 = vrot.lane.b32.xlu1 %v7446_v52, %s7173_s21  ;;  %656 = vrot.lane.b32.xlu0 %v7440_v51, %s7175_s22 }
 0x46d   :  { %380 = vrot.lane.b32.xlu1 %v7446_v52, %s7174_s1 }
 0x4d3   :  { %v7458_v53 = vpop.permute.xlu1 %372  ;;  %v7460_v54 = vpop.permute.xlu0 %366 }
 0x4d4   :  { %664 = vrot.lane.b32.xlu0 %v7458_v53, %s7175_s22  ;;  %660 = vrot.lane.b32.xlu1 %v7460_v54, %s7175_s22  ;;  %v384_v6 = vcombine.low %v7440_v51, %v7458_v53  ;;  %v385_v11 = vcombine.high %v7440_v51, %v7458_v53 }
 0x4d6   :  { %v392_v12 = vrot.slane %v384_v6, %v7493_v5  ;;  %v399_v18 = vrot.slane %v385_v11, %v7493_v5 }
 0x4d7   :  { %v7466_v55 = vpop.permute.xlu1 %378  ;;  %v7472_v56 = vpop.permute.xlu0 %374 }
 0x4d8   :  { %658 = vrot.lane.b32.xlu0 %v7446_v52, %s7175_s22  ;;  %668 = vrot.lane.b32.xlu1 %v7466_v55, %s7175_s22  ;;  %v400_v4 = vcombine.low %v7460_v54, %v7466_v55  ;;  %v401_v8 = vcombine.high %v7460_v54, %v7466_v55  ;;  %v452_v30 = vcombine.low %v7446_v52, %v7472_v56 }
 0x4d9   :  { %v453_v31 = vcombine.high %v7446_v52, %v7472_v56 }
 0x4da   :  { %v408_v9 = vrot.slane %v400_v4, %v7493_v5  ;;  %v415_v15 = vrot.slane %v401_v8, %v7493_v5  ;;  %v460_v40 = vrot.slane %v452_v30, %v7493_v5 }
 0x4db   :  { %v7474_v57 = vpop.permute.xlu1 %368  ;;  %v657_v23 = vpop.permute.xlu0 %656  ;;  %v467_v41 = vrot.slane %v453_v31, %v7493_v5 }
 0x4dc   :  { %666 = vrot.lane.b32.xlu0 %v7472_v56, %s7175_s22  ;;  %662 = vrot.lane.b32.xlu1 %v7474_v57, %s7175_s22  ;;  %v416_v16 = vcombine.low %v392_v12, %v408_v9  ;;  %v417_v17 = vcombine.high %v392_v12, %v408_v9  ;;  %v432_v21 = vcombine.low %v399_v18, %v415_v15 }
 0x4dd   :  { %v433_v22 = vcombine.high %v399_v18, %v415_v15 }
 0x4de   :  { %v424_v19 = vrot.slane %v416_v16, %v7503_v13  ;;  %v431_v20 = vrot.slane %v417_v17, %v7503_v13  ;;  %v440_v24 = vrot.slane %v432_v21, %v7503_v13 }
 0x4df   :  { %v7481_v59 = vpop.permute.xlu1 %380  ;;  %v447_v25 = vrot.slane %v433_v22, %v7503_v13 }
 0x4e0   :  { %670 = vrot.lane.b32.xlu1 %v7481_v59, %s7175_s22  ;;  %v520_v26 = vcombine.low %v424_v19, %v431_v20  ;;  %v6282_v27 = vcombine.high %v424_v19, %v431_v20  ;;  %v468_v28 = vcombine.low %v7474_v57, %v7481_v59  ;;  %v469_v29 = vcombine.high %v7474_v57, %v7481_v59 }
 0x4e1   :  { %v536_v34 = vcombine.low %v440_v24, %v447_v25  ;;  %v6283_v35 = vcombine.high %v440_v24, %v447_v25 }
 0x4e2   :  { %v527_v36 = vrot.slane %v520_v26, %v7493_v5  ;;  %v535_v37 = vrot.slane %v6282_v27, %v7493_v5  ;;  %v476_v38 = vrot.slane %v468_v28, %v7493_v5  ;;  %v483_v39 = vrot.slane %v469_v29, %v7493_v5 }
 0x4e3   :  { %v7526_v46 = vrot.slane %v536_v34, %v7493_v5  ;;  %v7529_v47 = vrot.slane %v6283_v35, %v7493_v5 }
 0x4e4   :  { %v552_v48 = vcombine.low %v527_v36, %v535_v37  ;;  %v553_v49 = vcombine.high %v527_v36, %v535_v37  ;;  %v484_v62 = vcombine.low %v460_v40, %v476_v38  ;;  %v485_v63 = vcombine.high %v460_v40, %v476_v38 }
 0x4e5   :  { %v500_v0 = vcombine.low %v467_v41, %v483_v39  ;;  %v501_v7 = vcombine.high %v467_v41, %v483_v39  ;;  %v568_v11 = vcombine.low %v7526_v46, %v7529_v47 }
 0x4e6   :  { %v7536_v9 = vrot.slane %v552_v48, %v7503_v13  ;;  %v7541_v12 = vrot.slane %v553_v49, %v7503_v13  ;;  %v7544_v20 = vrot.slane %v484_v62, %v7503_v13  ;;  %v7547_v21 = vrot.slane %v485_v63, %v7503_v13 }
 0x4e7   :  { %v7550_v22 = vrot.slane %v500_v0, %v7503_v13  ;;  %v515_v28 = vrot.slane %v501_v7, %v7503_v13 }
 0x4e8   :  { %v588_v37 = vcombine.low %v7544_v20, %v7547_v21  ;;  %v6284_v38 = vcombine.high %v7544_v20, %v7547_v21 }
 0x546   :  { %v661_v32 = vpop.permute.xlu1 %660  ;;  %v665_v33 = vpop.permute.xlu0 %664 }
 0x547   :  { %v680_v42 = vcombine.low %v657_v23, %v665_v33  ;;  %v681_v43 = vcombine.high %v657_v23, %v665_v33  ;;  %v569_v23 = vcombine.high %v7526_v46, %v7529_v47 }
 0x549   :  { %v688_v1 = vrot.slane %v680_v42, %v7493_v5  ;;  %v695_v2 = vrot.slane %v681_v43, %v7493_v5 }
 0x54a   :  { %v659_v44 = vpop.permute.xlu0 %658  ;;  %v669_v45 = vpop.permute.xlu1 %668 }
 0x54b   :  { %v696_v50 = vcombine.low %v661_v32, %v669_v45  ;;  %v697_v61 = vcombine.high %v661_v32, %v669_v45  ;;  %v576_v32 = vrot.slane %v568_v11, %v7503_v13 }
 0x54d   :  { %v704_v4 = vrot.slane %v696_v50, %v7493_v5  ;;  %v711_v6 = vrot.slane %v697_v61, %v7493_v5 }
 0x54e   :  { %v663_v8 = vpop.permute.xlu1 %662  ;;  %v667_v19 = vpop.permute.xlu0 %666 }
 0x54f   :  { %v712_v15 = vcombine.low %v688_v1, %v704_v4  ;;  %v713_v16 = vcombine.high %v688_v1, %v704_v4  ;;  %v728_v17 = vcombine.low %v695_v2, %v711_v6  ;;  %v729_v18 = vcombine.high %v695_v2, %v711_v6 }
 0x550   :  { %v748_v29 = vcombine.low %v659_v44, %v667_v19  ;;  %v749_v30 = vcombine.high %v659_v44, %v667_v19  ;;  %v604_v4 = vcombine.low %v7550_v22, %v515_v28  ;;  %v6285_v6 = vcombine.high %v7550_v22, %v515_v28 }
 0x551   :  { %v720_v24 = vrot.slane %v712_v15, %v7503_v13  ;;  %v727_v25 = vrot.slane %v713_v16, %v7503_v13  ;;  %v736_v26 = vrot.slane %v728_v17, %v7503_v13  ;;  %v743_v27 = vrot.slane %v729_v18, %v7503_v13 }
 0x552   :  { %v671_v31 = vpop.permute.xlu1 %670  ;;  %v756_v45 = vrot.slane %v748_v29, %v7493_v5  ;;  %v763_v46 = vrot.slane %v749_v30, %v7493_v5  ;;  %v585_v28 = vcombine.high %v7536_v9, %v576_v32  ;;  %v583_v29 = vrot.slane %v569_v23, %v7503_v13 }
 0x553   :  { %v816_v33 = vcombine.low %v720_v24, %v727_v25  ;;  %v6286_v34 = vcombine.high %v720_v24, %v727_v25  ;;  %v832_v35 = vcombine.low %v736_v26, %v743_v27  ;;  %v6287_v36 = vcombine.high %v736_v26, %v743_v27 }
 0x554   :  { %v764_v39 = vcombine.low %v663_v8, %v671_v31  ;;  %v765_v40 = vcombine.high %v663_v8, %v671_v31  ;;  %v584_v27 = vcombine.low %v7536_v9, %v576_v32  ;;  %v619_v9 = vrot.slane %v6285_v6, %v7493_v5 }
 0x555   :  { %v823_v41 = vrot.slane %v816_v33, %v7493_v5  ;;  %v831_v42 = vrot.slane %v6286_v34, %v7493_v5  ;;  %v839_v43 = vrot.slane %v832_v35, %v7493_v5  ;;  %v847_v44 = vrot.slane %v6287_v36, %v7493_v5 }
 0x556   :  { %v772_v47 = vrot.slane %v764_v39, %v7493_v5  ;;  %v779_v48 = vrot.slane %v765_v40, %v7493_v5  ;;  %v595_v35 = vrot.slane %v588_v37, %v7493_v5  ;;  %v603_v36 = vrot.slane %v6284_v38, %v7493_v5 }
 0x557   :  { %v848_v49 = vcombine.low %v823_v41, %v831_v42  ;;  %v849_v50 = vcombine.high %v823_v41, %v831_v42  ;;  %v864_v61 = vcombine.low %v839_v43, %v847_v44  ;;  %v865_v62 = vcombine.high %v839_v43, %v847_v44 }
 0x558   :  { %v780_v63 = vcombine.low %v756_v45, %v772_v47  ;;  %v781_v0 = vcombine.high %v756_v45, %v772_v47  ;;  %v796_v1 = vcombine.low %v763_v46, %v779_v48  ;;  %v797_v2 = vcombine.high %v763_v46, %v779_v48 }
 0x559   :  { %v856_v7 = vrot.slane %v848_v49, %v7503_v13  ;;  %v872_v8 = vrot.slane %v864_v61, %v7503_v13  ;;  %v863_v20 = vrot.slane %v849_v50, %v7503_v13  ;;  %v879_v21 = vrot.slane %v865_v62, %v7503_v13 }
 0x55a   :  { %v788_v11 = vrot.slane %v780_v63, %v7503_v13  ;;  %v795_v15 = vrot.slane %v781_v0, %v7503_v13  ;;  %v804_v16 = vrot.slane %v796_v1, %v7503_v13  ;;  %v811_v17 = vrot.slane %v797_v2, %v7503_v13 }
 0x55b   :  { %v880_v18 = vcombine.low %v856_v7, %v872_v8  ;;  %v881_v19 = vcombine.high %v856_v7, %v872_v8  ;;  %v611_v39 = vrot.slane %v604_v4, %v7493_v5  ;;  %v882_v40 = vcombine.low %v863_v20, %v879_v21 }
 0x55c   :  { %v884_v24 = vcombine.low %v788_v11, %v795_v15  ;;  %v6288_v22 = vcombine.high %v788_v11, %v795_v15  ;;  %v900_v25 = vcombine.low %v804_v16, %v811_v17  ;;  %v6289_v26 = vcombine.high %v804_v16, %v811_v17 }
 0x55d   :  { %6581 = vmatpush3.xpose.msk.msra.mxu0 %vm1248_vm3, %v880_v18  ;;  %6586 = vmatpush3.xpose.msk.msra.mxu1 %vm1248_vm3, %v881_v19  ;;  %v586_v37 = vcombine.low %v7541_v12, %v583_v29  ;;  %v620_v38 = vcombine.low %v595_v35, %v603_v36  ;;  %v636_v41 = vcombine.low %v611_v39, %v619_v9  ;;  %v225_v16 = vand.u32 127, %v224_v60 }
 0x55e   :  { %v891_v30 = vrot.slane %v884_v24, %v7493_v5  ;;  %v899_v31 = vrot.slane %v6288_v22, %v7493_v5  ;;  %v907_v33 = vrot.slane %v900_v25, %v7493_v5  ;;  %v915_v34 = vrot.slane %v6289_v26, %v7493_v5  ;;  %6590 = vmatprep.subr.mxu1 %v7176_v58 }
 0x55f   :  { %6635 = vmatprep.subr.mxu0 %v7176_v58  ;;  %v883_v42 = vcombine.high %v863_v20, %v879_v21  ;;  %v587_v45 = vcombine.high %v7541_v12, %v583_v29  ;;  %v628_v46 = vrot.slane %v620_v38, %v7503_v13  ;;  %v644_v47 = vrot.slane %v636_v41, %v7503_v13 }
 0x560   :  { %v916_v23 = vcombine.low %v891_v30, %v899_v31  ;;  %v932_v32 = vcombine.low %v907_v33, %v915_v34  ;;  %6583 = vmatmul.mubr.msk.f32.vlgmr.msra.gmra.mrb[6].mxu0 %vm1248_vm3, %v584_v27  ;;  %6588 = vmatmul.mubr.msk.f32.vlgmr.msra.gmra.mrb[0].mxu1 %vm1248_vm3, %v585_v28  ;;  %v917_v48 = vcombine.high %v891_v30, %v899_v31  ;;  %vm226_vm4 = vcmp.lt.s32.totalorder %v225_v16, 5 }
 0x561   :  { %6637 = vmatprep.mubr.msk.f32.mxu0 %vm7177_vm2, %v7176_v58  ;;  %6591 = vmatpush3.xpose.msk.msra.mxu1 %vm1248_vm3, %v882_v40  ;;  %v933_v49 = vcombine.high %v907_v33, %v915_v34  ;;  %v652_v61 = vcombine.low %v628_v46, %v644_v47  ;;  %v621_v12 = vcombine.high %v595_v35, %v603_v36  ;;  %v7180_v17 = vmov -1e+30  }
 0x562   :  { %6592 = vmatprep.mubr.msk.f32.mxu1 %vm7177_vm2, %v7176_v58  ;;  %6595 = vmatprep.subr.mxu1 %v7176_v58  ;;  %v924_v43 = vrot.slane %v916_v23, %v7503_v13  ;;  %v940_v44 = vrot.slane %v932_v32, %v7503_v13  ;;  %v637_v62 = vcombine.high %v611_v39, %v619_v9  ;;  %v7644_v18 = vsel %vm226_vm4, 0.0, %v7180_v17 }
 0x563   :  { %v931_v0 = vrot.slane %v917_v48, %v7503_v13  ;;  %v947_v1 = vrot.slane %v933_v49, %v7503_v13  ;;  %v653_v2 = vcombine.high %v628_v46, %v644_v47  ;;  %v635_v4 = vrot.slane %v621_v12, %v7503_v13 }
 0x564   :  { %6593 = vmatmul.mubr.msk.f32.vlgmr.msra.gmra.mrb[2].mxu1 %vm1248_vm3, %v586_v37  ;;  %v948_v50 = vcombine.low %v924_v43, %v940_v44  ;;  %v949_v63 = vcombine.high %v924_v43, %v940_v44  ;;  %v651_v6 = vrot.slane %v637_v62, %v7503_v13 }
 0x565   :  { %6596 = vmatpush3.xpose.msk.msra.mxu1 %vm1248_vm3, %v883_v42  ;;  %6597 = vmatprep.mubr.msk.f32.mxu1 %vm7177_vm2, %v7176_v58  ;;  %v950_v7 = vcombine.low %v931_v0, %v947_v1  ;;  %v951_v11 = vcombine.high %v931_v0, %v947_v1 }
 0x566   :  { %6600 = vmatprep.subr.mxu1 %v7176_v58  ;;  %v654_v8 = vcombine.low %v635_v4, %v651_v6  ;;  %v655_v15 = vcombine.high %v635_v4, %v651_v6 }
 0x568   :  { %6598 = vmatmul.mubr.msk.f32.vlgmr.msra.gmra.mrb[4].mxu1 %vm1248_vm3, %v587_v45 }
 0x569   :  { %6601 = vmatpush3.xpose.msk.msra.mxu1 %vm1248_vm3, %v948_v50  ;;  %6602 = vmatprep.mubr.msk.f32.mxu1 %vm7177_vm2, %v7176_v58 }
 0x56a   :  { %6605 = vmatprep.subr.mxu1 %v7176_v58 }
 0x56c   :  { %6603 = vmatmul.mubr.msk.f32.vlgmr.msra.gmra.mrb[6].mxu1 %vm1248_vm3, %v652_v61 }
 0x56d   :  { %6606 = vmatpush3.xpose.msk.msra.mxu1 %vm1248_vm3, %v949_v63  ;;  %6607 = vmatprep.mubr.msk.f32.mxu1 %vm7177_vm2, %v7176_v58 }
 0x56e   :  { %6610 = vmatprep.subr.mxu1 %v7176_v58 }
 0x570   :  { %6608 = vmatmul.mubr.msk.f32.vlgmr.msra.gmra.mrb[8].mxu1 %vm1248_vm3, %v653_v2 }
 0x571   :  { %6611 = vmatpush3.xpose.msk.msra.mxu1 %vm1248_vm3, %v950_v7  ;;  %6612 = vmatprep.mubr.msk.f32.mxu1 %vm7177_vm2, %v7176_v58 }
 0x572   :  { %6615 = vmatprep.subr.mxu1 %v7176_v58 }
 0x574   :  { %6613 = vmatmul.mubr.msk.f32.vlgmr.msra.gmra.mrb[10].mxu1 %vm1248_vm3, %v654_v8 }
 0x575   :  { %6616 = vmatpush3.xpose.msk.msra.mxu1 %vm1248_vm3, %v951_v11  ;;  %6617 = vmatprep.mubr.msk.f32.mxu1 %vm7177_vm2, %v7176_v58 }
 0x576   :  { %6620 = vmatprep.subr.mxu1 %v7176_v58 }
 0x578   :  { %6618 = vmatmul.mubr.msk.f32.vlgmr.msra.gmra.mrb[12].mxu1 %vm1248_vm3, %v655_v15 }
 0x579   :  { %6622 = vmatprep.mubr.msk.f32.mxu1 %vm7177_vm2, %v7176_v58 }
 0x633   :  { %v1321_v19 = vpop.f32.mrb[6].mxu0  ;;  %v1397_v21 = vpop.f32.mrb[0].mxu1 }
 0x634   :  { %v1322_v20 = vadd.f32 %v1321_v19, %v7644_v18  ;;  %v6584_v24 = vpop.f32.mrb[7].mxu0  ;;  %v1398_v22 = vadd.f32 %v1397_v21, %v7644_v18  ;;  %v6589_v25 = vpop.f32.mrb[1].mxu1 }
 0x636   :  { %v1857_v26 = vsel %vm1248_vm3, %v1322_v20, -inf  ;;  %v1860_v27 = vsel %vm1248_vm3, %v1398_v22, -inf }
 0x637   :  { %1858 = vmax.xlane.f32.xlu0 %v1857_v26  ;;  %1861 = vmax.xlane.f32.xlu1 %v1860_v27  ;;  %v1473_v28 = vpop.f32.mrb[2].mxu1 }
 0x638   :  { %v1474_v60 = vadd.f32 %v1473_v28, %v7644_v18  ;;  %v6594_v29 = vpop.f32.mrb[3].mxu1 }
 0x63a   :  { %v1863_v30 = vsel %vm1248_vm3, %v1474_v60, -inf }
 0x63b   :  { %v1549_v31 = vpop.f32.mrb[4].mxu1  ;;  %1864 = vmax.xlane.f32.xlu0 %v1863_v30 }
 0x63c   :  { %v1550_v33 = vadd.f32 %v1549_v31, %v7644_v18  ;;  %v6599_v34 = vpop.f32.mrb[5].mxu1 }
 0x63e   :  { %v1866_v35 = vsel %vm1248_vm3, %v1550_v33, -inf }
 0x63f   :  { %1867 = vmax.xlane.f32.xlu0 %v1866_v35  ;;  %v1625_v36 = vpop.f32.mrb[6].mxu1 }
 0x640   :  { %v1626_v39 = vadd.f32 %v1625_v36, %v7644_v18  ;;  %v6604_v9 = vpop.f32.mrb[7].mxu1 }
 0x642   :  { %v1869_v23 = vsel %vm1248_vm3, %v1626_v39, -inf }
 0x643   :  { %1870 = vmax.xlane.f32.xlu0 %v1869_v23  ;;  %v1701_v32 = vpop.f32.mrb[8].mxu1 }
 0x644   :  { %v1702_v40 = vadd.f32 %v1701_v32, %v7644_v18  ;;  %v6609_v37 = vpop.f32.mrb[9].mxu1 }
 0x646   :  { %v1872_v38 = vsel %vm1248_vm3, %v1702_v40, -inf }
 0x647   :  { %1873 = vmax.xlane.f32.xlu1 %v1872_v38  ;;  %v1777_v41 = vpop.f32.mrb[10].mxu1 }
 0x648   :  { %v1778_v42 = vadd.f32 %v1777_v41, %v7644_v18  ;;  %v6614_v43 = vpop.f32.mrb[11].mxu1 }
 0x64a   :  { %v1875_v44 = vsel %vm1248_vm3, %v1778_v42, -inf }
 0x64b   :  { %1876 = vmax.xlane.f32.xlu0 %v1875_v44  ;;  %v1853_v45 = vpop.f32.mrb[12].mxu1 }
 0x64c   :  { %v6619_v46 = vpop.f32.mrb[13].mxu1  ;;  %v7669_v47 = vadd.f32 %v1853_v45, %v7644_v18 }
 0x64e   :  { %v1878_v48 = vsel %vm1248_vm3, %v7669_v47, -inf }
 0x658   :  { %956 = vrot.lane.b32.xlu1 %v7460_v54, %s7181_s24 }
 0x65c   :  { %960 = vrot.lane.b32.xlu1 %v7458_v53, %s7181_s24 }
 0x660   :  { %964 = vrot.lane.b32.xlu1 %v7466_v55, %s7181_s24 }
 0x661   :  { %952 = vrot.lane.b32.xlu0 %v7440_v51, %s7181_s24 }
 0x684   :  { %1879 = vmax.xlane.f32.xlu1 %v1878_v48 }
 0x6c4   :  { %v1859_v49 = vpop.xlane.xlu0 %1858  ;;  %v1862_v50 = vpop.xlane.xlu1 %1861 }
 0x6c5   :  { %v1881_v61 = vsub.f32 %v1322_v20, %v1859_v49  ;;  %v1882_v54 = vsub.f32 %v1398_v22, %v1862_v50 }
 0x6c7   :  { %v1889_v12 = vmul.f32 1.442695, %v1881_v61  ;;  %v1891_v62 = vmul.f32 1.442695, %v1882_v54 }
 0x6c8   :  { %v1865_v53 = vpop.xlane.xlu0 %1864 }
 0x6c9   :  { %7053 = vpow2.f32 %v1889_v12  ;;  %v1883_v55 = vsub.f32 %v1474_v60, %v1865_v53 }
 0x6ca   :  { %7055 = vpow2.f32 %v1891_v62 }
 0x6cb   :  { %v1893_v63 = vmul.f32 1.442695, %v1883_v55 }
 0x6cc   :  { %v1868_v0 = vpop.xlane.xlu0 %1867 }
 0x6cd   :  { %7057 = vpow2.f32 %v1893_v63  ;;  %v1884_v51 = vsub.f32 %v1550_v33, %v1868_v0 }
 0x6cf   :  { %v1895_v1 = vmul.f32 1.442695, %v1884_v51 }
 0x6d0   :  { %v1871_v2 = vpop.xlane.xlu0 %1870 }
 0x6d1   :  { %7059 = vpow2.f32 %v1895_v1  ;;  %v1885_v4 = vsub.f32 %v1626_v39, %v1871_v2 }
 0x6d3   :  { %v7673_v6 = vpop.eup %7053  ;;  %v1897_v8 = vmul.f32 1.442695, %v1885_v4 }
 0x6d4   :  { %v7675_v7 = vpop.eup %7055  ;;  %v1905_v11 = vsel %vm1248_vm3, %v7673_v6, 0.0  ;;  %v1874_v15 = vpop.xlane.xlu1 %1873 }
 0x6d5   :  { %v1908_v16 = vsel %vm1248_vm3, %v7675_v7, 0.0  ;;  %1906 = vadd.xlane.f32.xlu0 %v1905_v11  ;;  %7061 = vpow2.f32 %v1897_v8  ;;  %v1886_v17 = vsub.f32 %v1702_v40, %v1874_v15 }
 0x6d6   :  { %1909 = vadd.xlane.f32.xlu1 %v1908_v16 }
 0x6d7   :  { %v7681_v19 = vpop.eup %7057  ;;  %v1899_v20 = vmul.f32 1.442695, %v1886_v17 }
 0x6d8   :  { %v957_v21 = vpop.permute.xlu1 %956  ;;  %v1877_v24 = vpop.xlane.xlu0 %1876  ;;  %v1911_v22 = vsel %vm1248_vm3, %v7681_v19, 0.0 }
 0x6d9   :  { %7063 = vpow2.f32 %v1899_v20  ;;  %v1887_v25 = vsub.f32 %v1778_v42, %v1877_v24  ;;  %1912 = vadd.xlane.f32.xlu0 %v1911_v22 }
 0x6db   :  { %v7685_v26 = vpop.eup %7059  ;;  %v1901_v27 = vmul.f32 1.442695, %v1887_v25 }
 0x6dc   :  { %v961_v28 = vpop.permute.xlu1 %960  ;;  %v953_v60 = vpop.permute.xlu0 %952  ;;  %v1914_v29 = vsel %vm1248_vm3, %v7685_v26, 0.0 }
 0x6dd   :  { %7065 = vpow2.f32 %v1901_v27  ;;  %1915 = vadd.xlane.f32.xlu1 %v1914_v29  ;;  %v976_v31 = vcombine.low %v953_v60, %v961_v28  ;;  %v977_v33 = vcombine.high %v953_v60, %v961_v28 }
 0x6df   :  { %v7689_v30 = vpop.eup %7061  ;;  %v984_v23 = vrot.slane %v976_v31, %v7493_v5  ;;  %v991_v32 = vrot.slane %v977_v33, %v7493_v5 }
 0x6e0   :  { %v965_v34 = vpop.permute.xlu1 %964  ;;  %v1917_v35 = vsel %vm1248_vm3, %v7689_v30, 0.0 }
 0x6e1   :  { %v992_v36 = vcombine.low %v957_v21, %v965_v34  ;;  %v993_v39 = vcombine.high %v957_v21, %v965_v34  ;;  %1918 = vadd.xlane.f32.xlu0 %v1917_v35 }
 0x6e3   :  { %v7693_v9 = vpop.eup %7063  ;;  %v1000_v40 = vrot.slane %v992_v36, %v7493_v5  ;;  %v1007_v37 = vrot.slane %v993_v39, %v7493_v5 }
 0x6e4   :  { %v1920_v38 = vsel %vm1248_vm3, %v7693_v9, 0.0 }
 0x6e5   :  { %v1008_v41 = vcombine.low %v984_v23, %v1000_v40  ;;  %v1009_v42 = vcombine.high %v984_v23, %v1000_v40  ;;  %v1024_v43 = vcombine.low %v991_v32, %v1007_v37  ;;  %v1025_v44 = vcombine.high %v991_v32, %v1007_v37  ;;  %1921 = vadd.xlane.f32.xlu0 %v1920_v38 }
 0x6e7   :  { %v7701_v45 = vpop.eup %7065  ;;  %v1016_v46 = vrot.slane %v1008_v41, %v7503_v13  ;;  %v1023_v48 = vrot.slane %v1009_v42, %v7503_v13  ;;  %v1032_v49 = vrot.slane %v1024_v43, %v7503_v13  ;;  %v1039_v50 = vrot.slane %v1025_v44, %v7503_v13 }
 0x6e8   :  { %v1923_v61 = vsel %vm1248_vm3, %v7701_v45, 0.0 }
 0x6e9   :  { %v1112_v54 = vcombine.low %v1016_v46, %v1023_v48  ;;  %v6290_v12 = vcombine.high %v1016_v46, %v1023_v48  ;;  %v1128_v62 = vcombine.low %v1032_v49, %v1039_v50  ;;  %v6291_v53 = vcombine.high %v1032_v49, %v1039_v50  ;;  %1924 = vadd.xlane.f32.xlu0 %v1923_v61 }
 0x6eb   :  { %v1119_v55 = vrot.slane %v1112_v54, %v7493_v5  ;;  %v1127_v63 = vrot.slane %v6290_v12, %v7493_v5  ;;  %v1135_v0 = vrot.slane %v1128_v62, %v7493_v5  ;;  %v1143_v51 = vrot.slane %v6291_v53, %v7493_v5 }
 0x6ed   :  { %v1144_v1 = vcombine.low %v1119_v55, %v1127_v63  ;;  %v1160_v2 = vcombine.low %v1135_v0, %v1143_v51  ;;  %v1145_v4 = vcombine.high %v1119_v55, %v1127_v63  ;;  %v1161_v8 = vcombine.high %v1135_v0, %v1143_v51 }
 0x6ee   :  { %958 = vrot.lane.b32.xlu1 %v7474_v57, %s7181_s24 }
 0x6ef   :  { %v1152_v11 = vrot.slane %v1144_v1, %v7503_v13  ;;  %v1168_v15 = vrot.slane %v1160_v2, %v7503_v13  ;;  %v1159_v16 = vrot.slane %v1145_v4, %v7503_v13  ;;  %v1175_v17 = vrot.slane %v1161_v8, %v7503_v13 }
 0x6f1   :  { %v1176_v20 = vcombine.low %v1152_v11, %v1168_v15  ;;  %v1179_v21 = vcombine.high %v1159_v16, %v1175_v17  ;;  %v1177_v24 = vcombine.high %v1152_v11, %v1168_v15  ;;  %v1178_v22 = vcombine.low %v1159_v16, %v1175_v17 }
 0x6f2   :  { %962 = vrot.lane.b32.xlu1 %v7472_v56, %s7181_s24 }
 0x6f3   :  { %6621 = vmatpush3.msra.mxu1 %v1176_v20  ;;  %6636 = vmatpush3.msra.mxu0 %v1179_v21 }
 0x6f4   :  { %6625 = vmatprep.subr.mxu1 %v7176_v58  ;;  %6645 = vmatprep.subr.mxu0 %v7176_v58 }
 0x6ff   :  { %954 = vrot.lane.b32.xlu0 %v7446_v52, %s7181_s24 }
 0x711   :  { %v1880_v57 = vpop.xlane.xlu1 %1879 }
 0x712   :  { %v1888_v25 = vsub.f32 %v7669_v47, %v1880_v57 }
 0x714   :  { %v1903_v27 = vmul.f32 1.442695, %v1888_v25 }
 0x716   :  { %7067 = vpow2.f32 %v1903_v27 }
 0x720   :  { %v7726_v28 = vpop.eup %7067 }
 0x721   :  { %v1926_v60 = vsel %vm1248_vm3, %v7726_v28, 0.0 }
 0x722   :  { %1927 = vadd.xlane.f32.xlu1 %v1926_v60 }
 0x733   :  { %966 = vrot.lane.b32.xlu1 %v7481_v59, %s7181_s24 }
 0x762   :  { %v1907_v56 = vpop.xlane.xlu0 %1906 }
 0x763   :  { %v1910_v29 = vpop.xlane.xlu1 %1909  ;;  %7069 = vrcp.f32 %v1907_v56 }
 0x764   :  { %7071 = vrcp.f32 %v1910_v29 }
 0x766   :  { %v1913_v31 = vpop.xlane.xlu0 %1912 }
 0x767   :  { %7073 = vrcp.f32 %v1913_v31 }
 0x76a   :  { %v1916_v52 = vpop.xlane.xlu1 %1915 }
 0x76b   :  { %7075 = vrcp.f32 %v1916_v52 }
 0x76d   :  { %v7070_v47 = vpop.eup %7069 }
 0x76e   :  { %v1937_v33 = vmul.f32 %v7070_v47, %v7673_v6  ;;  %v7072_v34 = vpop.eup %7071  ;;  %v959_v32 = vpop.permute.xlu1 %958 }
 0x76f   :  { %v1938_v59 = vmul.f32 %v7072_v34, %v7675_v7  ;;  %v1919_v7 = vpop.xlane.xlu0 %1918 }
 0x770   :  { %6623 = vmatmul.mubr.msk.f32.vlgmr.msra.gmra.mrb[14].mxu1 %vm1248_vm3, %v1937_v33  ;;  %7077 = vrcp.f32 %v1919_v7 }
 0x771   :  { %6626 = vmatpush3.msra.mxu1 %v1177_v24  ;;  %6627 = vmatprep.mubr.msk.f32.mxu1 %vm7177_vm2, %v7176_v58  ;;  %v7074_v35 = vpop.eup %7073 }
 0x772   :  { %6630 = vmatprep.subr.mxu1 %v7176_v58  ;;  %v1939_v6 = vmul.f32 %v7074_v35, %v7681_v19  ;;  %v963_v37 = vpop.permute.xlu1 %962 }
 0x773   :  { %v1922_v23 = vpop.xlane.xlu0 %1921 }
 0x774   :  { %6628 = vmatmul.mubr.msk.f32.vlgmr.msra.gmra.mrb[16].mxu1 %vm1248_vm3, %v1938_v59  ;;  %7079 = vrcp.f32 %v1922_v23 }
 0x775   :  { %6631 = vmatpush3.msra.mxu1 %v1178_v22  ;;  %6632 = vmatprep.mubr.msk.f32.mxu1 %vm7177_vm2, %v7176_v58  ;;  %v7076_v36 = vpop.eup %7075 }
 0x776   :  { %6640 = vmatprep.subr.mxu1 %v7176_v58  ;;  %v1940_v39 = vmul.f32 %v7076_v36, %v7685_v26 }
 0x777   :  { %v1925_v40 = vpop.xlane.xlu0 %1924 }
 0x778   :  { %6633 = vmatmul.mubr.msk.f32.vlgmr.msra.gmra.mrb[18].mxu1 %vm1248_vm3, %v1939_v6  ;;  %6638 = vmatmul.mubr.msk.f32.vlgmr.msra.gmra.mrb[8].mxu0 %vm1248_vm3, %v1940_v39  ;;  %7081 = vrcp.f32 %v1925_v40 }
 0x779   :  { %6642 = vmatprep.mubr.msk.f32.mxu1 %vm7177_vm2, %v7176_v58  ;;  %6647 = vmatprep.mubr.msk.f32.mxu0 %vm7177_vm2, %v7176_v58 }
 0x77a   :  { %v7078_v17 = vpop.eup %7077 }
 0x77b   :  { %v955_v19 = vpop.permute.xlu0 %954  ;;  %v1941_v33 = vmul.f32 %v7078_v17, %v7689_v30 }
 0x77c   :  { %v1044_v41 = vcombine.low %v955_v19, %v963_v37  ;;  %v1045_v42 = vcombine.high %v955_v19, %v963_v37 }
 0x77e   :  { %v1052_v46 = vrot.slane %v1044_v41, %v7493_v5  ;;  %v1059_v48 = vrot.slane %v1045_v42, %v7493_v5  ;;  %v7080_v57 = vpop.eup %7079 }
 0x77f   :  { %v1942_v34 = vmul.f32 %v7080_v57, %v7693_v9 }
 0x782   :  { %v7082_v60 = vpop.eup %7081 }
 0x783   :  { %v1943_v36 = vmul.f32 %v7082_v60, %v7701_v45 }
 0x7af   :  { %v1928_v38 = vpop.xlane.xlu1 %1927 }
 0x7b0   :  { %7083 = vrcp.f32 %v1928_v38 }
 0x7b3   :  { %v967_v26 = vpop.permute.xlu1 %966 }
 0x7b4   :  { %v1060_v43 = vcombine.low %v959_v32, %v967_v26  ;;  %v1061_v44 = vcombine.high %v959_v32, %v967_v26 }
 0x7b6   :  { %v1068_v49 = vrot.slane %v1060_v43, %v7493_v5  ;;  %v1075_v50 = vrot.slane %v1061_v44, %v7493_v5 }
 0x7b8   :  { %v1076_v61 = vcombine.low %v1052_v46, %v1068_v49  ;;  %v1077_v54 = vcombine.high %v1052_v46, %v1068_v49  ;;  %v1092_v12 = vcombine.low %v1059_v48, %v1075_v50  ;;  %v1093_v62 = vcombine.high %v1059_v48, %v1075_v50 }
 0x7ba   :  { %v1084_v53 = vrot.slane %v1076_v61, %v7503_v13  ;;  %v1091_v55 = vrot.slane %v1077_v54, %v7503_v13  ;;  %v1100_v63 = vrot.slane %v1092_v12, %v7503_v13  ;;  %v1107_v0 = vrot.slane %v1093_v62, %v7503_v13  ;;  %v7084_v47 = vpop.eup %7083 }
 0x7bb   :  { %v1944_v6 = vmul.f32 %v7084_v47, %v7726_v28 }
 0x7bc   :  { %v1180_v51 = vcombine.low %v1084_v53, %v1091_v55  ;;  %v6292_v1 = vcombine.high %v1084_v53, %v1091_v55  ;;  %v1196_v2 = vcombine.low %v1100_v63, %v1107_v0  ;;  %v6293_v4 = vcombine.high %v1100_v63, %v1107_v0 }
 0x7be   :  { %v1187_v8 = vrot.slane %v1180_v51, %v7493_v5  ;;  %v1195_v11 = vrot.slane %v6292_v1, %v7493_v5  ;;  %v1203_v15 = vrot.slane %v1196_v2, %v7493_v5  ;;  %v1211_v16 = vrot.slane %v6293_v4, %v7493_v5 }
 0x7c0   :  { %v1212_v20 = vcombine.low %v1187_v8, %v1195_v11  ;;  %v1228_v21 = vcombine.low %v1203_v15, %v1211_v16  ;;  %v1213_v24 = vcombine.high %v1187_v8, %v1195_v11  ;;  %v1229_v22 = vcombine.high %v1203_v15, %v1211_v16 }
 0x7c2   :  { %v1220_v25 = vrot.slane %v1212_v20, %v7503_v13  ;;  %v1236_v27 = vrot.slane %v1228_v21, %v7503_v13  ;;  %v1227_v56 = vrot.slane %v1213_v24, %v7503_v13  ;;  %v1243_v29 = vrot.slane %v1229_v22, %v7503_v13 }
 0x7c4   :  { %v1244_v31 = vcombine.low %v1220_v25, %v1236_v27  ;;  %v1245_v52 = vcombine.high %v1220_v25, %v1236_v27  ;;  %v1246_v59 = vcombine.low %v1227_v56, %v1243_v29  ;;  %v1247_v35 = vcombine.high %v1227_v56, %v1243_v29 }
 0x7c6   :  { %6641 = vmatpush3.msra.mxu1 %v1244_v31  ;;  %6646 = vmatpush3.msra.mxu0 %v1245_v52 }
 0x7c7   :  { %6643 = vmatmul.mubr.msk.f32.vlgmr.msra.gmra.mrb[20].mxu1 %vm1248_vm3, %v1941_v33  ;;  %6648 = vmatmul.mubr.msk.f32.vlgmr.msra.gmra.mrb[10].mxu0 %vm1248_vm3, %v1942_v34 }
 0x7c8   :  { %6650 = vmatprep.subr.mxu1 %v7176_v58  ;;  %6655 = vmatprep.subr.mxu0 %v7176_v58 }
 0x7c9   :  { %6651 = vmatpush3.msra.mxu1 %v1246_v59  ;;  %6656 = vmatpush3.msra.mxu0 %v1247_v35 }
 0x7ca   :  { %6652 = vmatprep.mubr.msk.f32.mxu1 %vm7177_vm2, %v7176_v58  ;;  %6657 = vmatprep.mubr.msk.f32.mxu0 %vm7177_vm2, %v7176_v58 }
 0x7cb   :  { %6653 = vmatmul.mubr.msk.f32.vlgmr.msra.gmra.mrb[22].mxu1 %vm1248_vm3, %v1943_v36  ;;  %6658 = vmatmul.mubr.msk.f32.vlgmr.msra.gmra.mrb[12].mxu0 %vm1248_vm3, %v1944_v6 }
 0x843   :  { %v2014_v30 = vpop.f32.mrb[14].mxu1 }
 0x844   :  { %v6624_v9 = vpop.f32.mrb[15].mxu1 }
 0x847   :  { %v2087_v39 = vpop.f32.mrb[16].mxu1 }
 0x848   :  { %v6629_v7 = vpop.f32.mrb[17].mxu1 }
 0x84b   :  { %v2160_v23 = vpop.f32.mrb[18].mxu1  ;;  %v2233_v28 = vpop.f32.mrb[8].mxu0 }
 0x84c   :  { %v2529_v45 = vcombine.low %v2014_v30, %v2160_v23  ;;  %v2530_v32 = vcombine.high %v2014_v30, %v2160_v23  ;;  %v6634_v40 = vpop.f32.mrb[19].mxu1  ;;  %v2545_v37 = vcombine.low %v2087_v39, %v2233_v28  ;;  %v2546_v19 = vcombine.high %v2087_v39, %v2233_v28  ;;  %v6639_v38 = vpop.f32.mrb[9].mxu0  ;;  %v2833_v28 = vld [vmem:[%s8521_s9] sm:$0xff] }
 0x84d   :  { %v2834_v40 = vld [vmem:[%s8521_s9 + $0x8] sm:$0xff] }
 0x84e   :  { %v2537_v41 = vrot.slane %v2529_v45, %v7493_v5  ;;  %v2544_v42 = vrot.slane %v2530_v32, %v7493_v5  ;;  %v2553_v26 = vrot.slane %v2545_v37, %v7493_v5  ;;  %v2560_v43 = vrot.slane %v2546_v19, %v7493_v5 }
 0x84f   :  { %v6920_v37 = vpack.c.bf16 %v2834_v40, %v2833_v28 }
 0x850   :  { %v2561_v44 = vcombine.low %v2537_v41, %v2553_v26  ;;  %v2562_v46 = vcombine.high %v2537_v41, %v2553_v26  ;;  %v2577_v48 = vcombine.low %v2544_v42, %v2560_v43  ;;  %v2578_v49 = vcombine.high %v2544_v42, %v2560_v43 }
 0x851   :  { %6921 = vmatprep.subr.bf16.mxu1 %v6920_v37 }
 0x852   :  { %v2569_v50 = vrot.slane %v2561_v44, %v7503_v13  ;;  %v2576_v61 = vrot.slane %v2562_v46, %v7503_v13  ;;  %v2585_v54 = vrot.slane %v2577_v48, %v7503_v13  ;;  %v2592_v12 = vrot.slane %v2578_v49, %v7503_v13  ;;  %6923 = vmatpush3.bf16.msra.mxu1 %v6920_v37  ;;  %v2835_v48 = vld [vmem:[%s8521_s9 + $0x10] sm:$0xff]  ;;  %v2836_v49 = vld [vmem:[%s8521_s9 + $0x18] sm:$0xff]  ;;  %v2973_v37 = vld [vmem:[%s8525_s13] sm:$0xff] }
 0x854   :  { %v2665_v62 = vcombine.low %v2569_v50, %v2576_v61  ;;  %v6318_v53 = vcombine.high %v2569_v50, %v2576_v61  ;;  %v2681_v55 = vcombine.low %v2585_v54, %v2592_v12  ;;  %v6319_v63 = vcombine.high %v2585_v54, %v2592_v12 }
 0x855   :  { %v6924_v50 = vpack.c.bf16 %v2836_v49, %v2835_v48 }
 0x856   :  { %v2672_v0 = vrot.slane %v2665_v62, %v7493_v5  ;;  %v2680_v51 = vrot.slane %v6318_v53, %v7493_v5  ;;  %v2688_v1 = vrot.slane %v2681_v55, %v7493_v5  ;;  %v2696_v2 = vrot.slane %v6319_v63, %v7493_v5 }
 0x857   :  { %6925 = vmatprep.subr.bf16.mxu1 %v6924_v50 }
 0x858   :  { %v2697_v4 = vcombine.low %v2672_v0, %v2680_v51  ;;  %v2713_v8 = vcombine.low %v2688_v1, %v2696_v2  ;;  %v2698_v11 = vcombine.high %v2672_v0, %v2680_v51  ;;  %v2714_v15 = vcombine.high %v2688_v1, %v2696_v2  ;;  %6927 = vmatpush3.bf16.msra.mxu1 %v6924_v50 }
 0x85a   :  { %v7793_v16 = vrot.slane %v2697_v4, %v7503_v13  ;;  %v7796_v17 = vrot.slane %v2713_v8, %v7503_v13  ;;  %v2712_v20 = vrot.slane %v2698_v11, %v7503_v13  ;;  %v2728_v21 = vrot.slane %v2714_v15, %v7503_v13 }
 0x85c   :  { %v2730_v24 = vcombine.high %v7793_v16, %v7796_v17  ;;  %v2731_v22 = vcombine.low %v2712_v20, %v2728_v21  ;;  %v2732_v57 = vcombine.high %v2712_v20, %v2728_v21  ;;  %v2729_v25 = vcombine.low %v7793_v16, %v7796_v17  ;;  %v6324_v17 = vld [vmem:[%s8522_s10] ss:$0 sm:$0xff] }
 0x85e   :  { %2803 = vrot.lane.b32.xlu0 %v2730_v24, %s7182_s23 }
 0x862   :  { %2811 = vrot.lane.b32.xlu0 %v2731_v22, %s7183_s2 }
 0x866   :  { %2819 = vrot.lane.b32.xlu0 %v2732_v57, %s8536_s3 }
 0x89a   :  { %v2306_v27 = vpop.f32.mrb[20].mxu1  ;;  %v2379_v60 = vpop.f32.mrb[10].mxu0 }
 0x89b   :  { %v6644_v56 = vpop.f32.mrb[21].mxu1  ;;  %v6649_v29 = vpop.f32.mrb[11].mxu0 }
 0x89e   :  { %v2452_v31 = vpop.f32.mrb[22].mxu1  ;;  %v2525_v52 = vpop.f32.mrb[12].mxu0 }
 0x89f   :  { %v2597_v47 = vcombine.low %v2306_v27, %v2452_v31  ;;  %v2598_v33 = vcombine.high %v2306_v27, %v2452_v31  ;;  %v2613_v34 = vcombine.low %v2379_v60, %v2525_v52  ;;  %v2614_v59 = vcombine.high %v2379_v60, %v2525_v52  ;;  %v6654_v35 = vpop.f32.mrb[23].mxu1  ;;  %v6659_v36 = vpop.f32.mrb[13].mxu0 }
 0x8a1   :  { %v2605_v6 = vrot.slane %v2597_v47, %v7493_v5  ;;  %v2612_v30 = vrot.slane %v2598_v33, %v7493_v5  ;;  %v2621_v9 = vrot.slane %v2613_v34, %v7493_v5  ;;  %v2628_v39 = vrot.slane %v2614_v59, %v7493_v5 }
 0x8a3   :  { %v2629_v7 = vcombine.low %v2605_v6, %v2621_v9  ;;  %v2630_v23 = vcombine.high %v2605_v6, %v2621_v9  ;;  %v2645_v45 = vcombine.low %v2612_v30, %v2628_v39  ;;  %v2646_v32 = vcombine.high %v2612_v30, %v2628_v39 }
 0x8a5   :  { %v2637_v19 = vrot.slane %v2629_v7, %v7503_v13  ;;  %v2644_v38 = vrot.slane %v2630_v23, %v7503_v13  ;;  %v2653_v41 = vrot.slane %v2645_v45, %v7503_v13  ;;  %v2660_v42 = vrot.slane %v2646_v32, %v7503_v13 }
 0x8a7   :  { %v2733_v26 = vcombine.low %v2637_v19, %v2644_v38  ;;  %v6320_v43 = vcombine.high %v2637_v19, %v2644_v38  ;;  %v2749_v44 = vcombine.low %v2653_v41, %v2660_v42  ;;  %v6321_v46 = vcombine.high %v2653_v41, %v2660_v42  ;;  %v2974_v19 = vld [vmem:[%s8525_s13 + $0x8] sm:$0xff]  ;;  %v2975_v41 = vld [vmem:[%s8525_s13 + $0x10] sm:$0xff]  ;;  %v2976_v42 = vld [vmem:[%s8525_s13 + $0x18] sm:$0xff] }
 0x8a8   :  { %v6928_v38 = vpack.c.bf16 %v2974_v19, %v2973_v37 }
 0x8a9   :  { %v2740_v61 = vrot.slane %v2733_v26, %v7493_v5  ;;  %v2748_v54 = vrot.slane %v6320_v43, %v7493_v5  ;;  %v2756_v12 = vrot.slane %v2749_v44, %v7493_v5  ;;  %v2764_v62 = vrot.slane %v6321_v46, %v7493_v5 }
 0x8aa   :  { %6929 = vmatprep.subr.bf16.mxu0 %v6928_v38  ;;  %v6932_v26 = vpack.c.bf16 %v2976_v42, %v2975_v41 }
 0x8ab   :  { %v2765_v53 = vcombine.low %v2740_v61, %v2748_v54  ;;  %v2781_v55 = vcombine.low %v2756_v12, %v2764_v62  ;;  %v2766_v63 = vcombine.high %v2740_v61, %v2748_v54  ;;  %v2782_v0 = vcombine.high %v2756_v12, %v2764_v62  ;;  %6931 = vmatpush3.bf16.msra.mxu0 %v6928_v38  ;;  %v6325_v54 = vld [vmem:[%s8523_s11] ss:$0 sm:$0xff] }
 0x8ac   :  { %6933 = vmatprep.subr.bf16.mxu0 %v6932_v26  ;;  %v6326_v62 = vld [vmem:[%s8524_s12] ss:$0 sm:$0xff] }
 0x8ad   :  { %v2773_v51 = vrot.slane %v2765_v53, %v7503_v13  ;;  %v2789_v1 = vrot.slane %v2781_v55, %v7503_v13  ;;  %v2780_v2 = vrot.slane %v2766_v63, %v7503_v13  ;;  %v2796_v4 = vrot.slane %v2782_v0, %v7503_v13 }
 0x8af   :  { %v2798_v8 = vcombine.high %v2773_v51, %v2789_v1  ;;  %v2799_v11 = vcombine.low %v2780_v2, %v2796_v4  ;;  %v2800_v15 = vcombine.high %v2780_v2, %v2796_v4  ;;  %v2797_v20 = vcombine.low %v2773_v51, %v2789_v1  ;;  %6935 = vmatpush3.bf16.msra.mxu0 %v6932_v26  ;;  %v3081_v2 = vld [vmem:[%s8527_s15] sm:$0xff]  ;;  %v3082_v4 = vld [vmem:[%s8527_s15 + $0x8] sm:$0xff] }
 0x8b1   :  { %2805 = vrot.lane.b32.xlu1 %v2798_v8, %s7182_s23  ;;  %v6936_v8 = vpack.c.bf16 %v3082_v4, %v3081_v2  ;;  %v6337_v4 = vld [vmem:[%s8519_s7 + $0x20] sm:$0xff] }
 0x8b3   :  { %6937 = vmatprep.subr.bf16.mxu1 %v6936_v8 }
 0x8b5   :  { %2813 = vrot.lane.b32.xlu1 %v2799_v11, %s7183_s2  ;;  %v3083_v11 = vld [vmem:[%s8527_s15 + $0x10] sm:$0xff] }
 0x8b9   :  { %2821 = vrot.lane.b32.xlu1 %v2800_v15, %s8536_s3  ;;  %v3084_v15 = vld [vmem:[%s8527_s15 + $0x18] sm:$0xff] }
 0x8d0   :  { %v2804_v21 = vpop.permute.xlu0 %2803 }
 0x8d1   :  { %v2825_v22 = vsel %vm1248_vm3, %v2729_v25, %v2804_v21  ;;  %v3085_v21 = vld [vmem:[%s8527_s15 + $0x20] sm:$0xff] }
 0x8d4   :  { %v2812_v24 = vpop.permute.xlu0 %2811 }
 0x8d5   :  { %v2828_v57 = vsel %vm2827_vm5, %v2825_v22, %v2812_v24  ;;  %v3086_v24 = vld [vmem:[%s8527_s15 + $0x28] sm:$0xff] }
 0x8d6   :  { %v6944_v22 = vpack.c.bf16 %v3086_v24, %v3085_v21 }
 0x8d8   :  { %v2820_v27 = vpop.permute.xlu0 %2819 }
 0x8d9   :  { %v2831_v60 = vsel %vm2830_vm6, %v2828_v57, %v2820_v27  ;;  %v3087_v57 = vld [vmem:[%s8527_s15 + $0x30] sm:$0xff]  ;;  %v3088_v27 = vld [vmem:[%s8527_s15 + $0x38] sm:$0xff] }
 0x8da   :  { %6668 = vmatprep.mubr.msk.f32.mxu1 %vm180_vm1, %v2831_v60  ;;  %v6948_v60 = vpack.c.bf16 %v3088_v27, %v3087_v57 }
 0x923   :  { %v2806_v56 = vpop.permute.xlu1 %2805 }
 0x924   :  { %v2826_v31 = vsel %vm1248_vm3, %v2797_v20, %v2806_v56  ;;  %v6940_v20 = vpack.c.bf16 %v3084_v15, %v3083_v11  ;;  %v3089_v56 = vld [vmem:[%s8527_s15 + $0x40] sm:$0xff]  ;;  %v6339_v15 = vld [vmem:[%s8519_s7 + $0x30] sm:$0xff] }
 0x927   :  { %v2814_v29 = vpop.permute.xlu1 %2813 }
 0x928   :  { %v2829_v52 = vsel %vm2827_vm5, %v2826_v31, %v2814_v29  ;;  %v3090_v29 = vld [vmem:[%s8527_s15 + $0x48] sm:$0xff] }
 0x929   :  { %v6952_v31 = vpack.c.bf16 %v3090_v29, %v3089_v56 }
 0x92b   :  { %v2822_v47 = vpop.permute.xlu1 %2821 }
 0x92c   :  { %v2832_v33 = vsel %vm2830_vm6, %v2829_v52, %v2822_v47  ;;  %v3091_v52 = vld [vmem:[%s8527_s15 + $0x50] sm:$0xff]  ;;  %v3092_v47 = vld [vmem:[%s8527_s15 + $0x58] sm:$0xff] }
 0x92d   :  { %6669 = vmatmul.mubr.msk.f32.vlgmr.msra.gmra.mrb[24].mxu1 %vm180_vm1, %v2832_v33  ;;  %v6956_v33 = vpack.c.bf16 %v3092_v47, %v3091_v52 }
 0x92e   :  { %6939 = vmatpush3.bf16.msra.mxu1 %v6936_v8  ;;  %v6338_v8 = vld [vmem:[%s8519_s7 + $0x28] sm:$0xff] }
 0x92f   :  { %6941 = vmatprep.subr.bf16.mxu1 %v6940_v20  ;;  %v6968_v11 = vpack.c.bf16 %v6338_v8, %v6337_v4 }
 0x931   :  { %6969 = vmatprep.subr.bf16.mxu0 %v6968_v11 }
 0x932   :  { %6943 = vmatpush3.bf16.msra.mxu1 %v6940_v20  ;;  %v6340_v20 = vld [vmem:[%s8519_s7 + $0x38] sm:$0xff] }
 0x933   :  { %6945 = vmatprep.subr.bf16.mxu1 %v6944_v22  ;;  %v6972_v21 = vpack.c.bf16 %v6340_v20, %v6339_v15 }
 0x936   :  { %6947 = vmatpush3.bf16.msra.mxu1 %v6944_v22 }
 0x937   :  { %6949 = vmatprep.subr.bf16.mxu1 %v6948_v60 }
 0x93a   :  { %6951 = vmatpush3.bf16.msra.mxu1 %v6948_v60 }
 0x93b   :  { %6953 = vmatprep.subr.bf16.mxu1 %v6952_v31 }
 0x93e   :  { %6955 = vmatpush3.bf16.msra.mxu1 %v6952_v31  ;;  %v6335_v31 = vld [vmem:[%s8517_s5 + $0x1] ss:$0 sm:$0xff] }
 0x93f   :  { %6957 = vmatprep.subr.bf16.mxu1 %v6956_v33 }
 0x942   :  { %6959 = vmatpush3.bf16.msra.mxu1 %v6956_v33 }
 0xa00   :  { %v6670_v16 = vpop.f32.mrb[24].mxu1 }
 0xa01   :  { %v2919_v25 = vadd.f32 %v6670_v16, %v7409_v14  ;;  %v2909_v34 = vpop.f32.mrb[25].mxu1  ;;  %v3093_v16 = vld [vmem:[%s8527_s15 + $0x60] sm:$0xff] }
 0xa02   :  { %v2918_v59 = vadd.f32 %v2909_v34, %v7405_v10  ;;  %v3095_v34 = vld [vmem:[%s8527_s15 + $0x70] sm:$0xff] }
 0xa03   :  { %v7854_v35 = vadd.f32 %v6324_v17, %v2919_v25 }
 0xa04   :  { %v7856_v36 = vadd.f32 %v6324_v17, %v2918_v59  ;;  %v3094_v17 = vld [vmem:[%s8527_s15 + $0x68] sm:$0xff]  ;;  %v3096_v59 = vld [vmem:[%s8527_s15 + $0x78] sm:$0xff] }
 0xa05   :  { %v2934_v6 = vsel %vm180_vm1, %v7854_v35, 0.0  ;;  %v6960_v25 = vpack.c.bf16 %v3094_v17, %v3093_v16  ;;  %v6336_v16 = vld [vmem:[%s8518_s6 + $0x1] ss:$0 sm:$0xff]  ;;  %s8548_s6 = smov 24  }
 0xa06   :  { %2935 = vadd.xlane.f32.xlu1 %v2934_v6  ;;  %v2931_v30 = vsel %vm180_vm1, %v7856_v36, 0.0  ;;  %v6964_v6 = vpack.c.bf16 %v3096_v59, %v3095_v34 }
 0xa07   :  { %2932 = vadd.xlane.f32.xlu0 %v2931_v30  ;;  %6961 = vmatprep.subr.bf16.mxu1 %v6960_v25  ;;  %v6327_v30 = vld [vmem:[%s8526_s14] ss:$0 sm:$0xff] }
 0xa08   :  { %6963 = vmatpush3.bf16.msra.mxu1 %v6960_v25 }
 0xa09   :  { %6965 = vmatprep.subr.bf16.mxu1 %v6964_v6 }
 0xa0c   :  { %6967 = vmatpush3.bf16.msra.mxu1 %v6964_v6  ;;  %v6342_v6 = vld [vmem:[%s8520_s8 + $0x1] ss:$0 sm:$0xff] }
 0xa0d   :  { %6758 = vmatprep.subr.mxu1 %v7176_v58 }
 0xa93   :  { %v2936_v9 = vpop.xlane.xlu1 %2935 }
 0xa94   :  { %v2938_v39 = vmul.f32 0.03125, %v2936_v9  ;;  %v2933_v7 = vpop.xlane.xlu0 %2932 }
 0xa95   :  { %v2937_v23 = vmul.f32 0.03125, %v2933_v7 }
 0xa96   :  { %v2940_v14 = vsub.f32 %v7854_v35, %v2938_v39 }
 0xa97   :  { %v2939_v10 = vsub.f32 %v7856_v36, %v2937_v23 }
 0xa98   :  { %v2942_v28 = vmul.f32 %v2940_v14, %v2940_v14 }
 0xa99   :  { %v2941_v45 = vmul.f32 %v2939_v10, %v2939_v10 }
 0xa9a   :  { %v2946_v40 = vsel %vm180_vm1, %v2942_v28, 0.0 }
 0xa9b   :  { %v2943_v32 = vsel %vm180_vm1, %v2941_v45, 0.0 }
 0xa9c   :  { %2944 = vadd.xlane.f32.xlu0 %v2943_v32 }
 0xaa0   :  { %2947 = vadd.xlane.f32.xlu0 %v2946_v40 }
 0xb29   :  { %v2945_v43 = vpop.xlane.xlu0 %2944 }
 0xb2a   :  { %v2949_v44 = vmul.f32 0.03125, %v2945_v43 }
 0xb2c   :  { %v2951_v46 = vadd.f32 1e-05, %v2949_v44  ;;  %v6332_v44 = vld [vmem:[%s8528_s16] ss:$0 sm:$0xff] }
 0xb2d   :  { %v2948_v48 = vpop.xlane.xlu0 %2947 }
 0xb2e   :  { %7085 = vrsqrt.f32 %v2951_v46  ;;  %v2950_v49 = vmul.f32 0.03125, %v2948_v48 }
 0xb30   :  { %v2952_v50 = vadd.f32 1e-05, %v2950_v49 }
 0xb32   :  { %7087 = vrsqrt.f32 %v2952_v50 }
 0xb38   :  { %v7086_v61 = vpop.eup %7085 }
 0xb39   :  { %v2955_v12 = vmul.f32 %v7086_v61, %v2939_v10 }
 0xb3b   :  { %v2963_v53 = vmul.f32 %v6325_v54, %v2955_v12 }
 0xb3c   :  { %v7088_v55 = vpop.eup %7087 }
 0xb3d   :  { %v2956_v63 = vmul.f32 %v7088_v55, %v2940_v14  ;;  %v2971_v0 = vadd.f32 %v6326_v62, %v2963_v53 }
 0xb3f   :  { %v2964_v51 = vmul.f32 %v6325_v54, %v2956_v63  ;;  %6679 = vmatprep.mubr.msk.f32.mxu0 %vm180_vm1, %v2971_v0 }
 0xb41   :  { %v2972_v1 = vadd.f32 %v6326_v62, %v2964_v51 }
 0xb43   :  { %6680 = vmatmul.mubr.msk.f32.vlgmr.msra.gmra.mrb[14].mxu0 %vm180_vm1, %v2972_v1 }
 0xb44   :  { %6971 = vmatpush3.bf16.msra.mxu0 %v6968_v11 }
 0xb45   :  { %6973 = vmatprep.subr.bf16.mxu0 %v6972_v21 }
 0xb48   :  { %6975 = vmatpush3.bf16.msra.mxu0 %v6972_v21 }
 0xb49   :  { %6728 = vmatprep.subr.mxu0 %v7176_v58 }
 0xc16   :  { %v6681_v9 = vpop.f32.mrb[14].mxu0 }
 0xc17   :  { %v3062_v39 = vadd.f32 %v6681_v9, %v6327_v30  ;;  %v3056_v7 = vpop.f32.mrb[15].mxu0 }
 0xc18   :  { %v3057_v23 = vadd.f32 %v6327_v30, %v3056_v7 }
 0xc19   :  { %v6331_v14 = vmul.f32 -1.702, %v3062_v39 }
 0xc1a   :  { %v6330_v10 = vmul.f32 -1.702, %v3057_v23 }
 0xc1b   :  { %v3071_v45 = vmul.f32 1.442695, %v6331_v14 }
 0xc1c   :  { %v3069_v32 = vmul.f32 1.442695, %v6330_v10 }
 0xc1d   :  { %7089 = vpow2.f32 %v3071_v45 }
 0xc1e   :  { %7091 = vpow2.f32 %v3069_v32 }
 0xc27   :  { %v7090_v28 = vpop.eup %7089 }
 0xc28   :  { %v7092_v40 = vpop.eup %7091  ;;  %v3074_v37 = vadd.f32 1.0, %v7090_v28 }
 0xc29   :  { %v3073_v19 = vadd.f32 1.0, %v7092_v40 }
 0xc2a   :  { %7093 = vrcp.f32 %v3074_v37 }
 0xc2b   :  { %7095 = vrcp.f32 %v3073_v19 }
 0xc34   :  { %v7094_v38 = vpop.eup %7093 }
 0xc35   :  { %v7096_v41 = vpop.eup %7095  ;;  %v3080_v26 = vmul.f32 %v7094_v38, %v3062_v39 }
 0xc36   :  { %v3079_v42 = vmul.f32 %v7096_v41, %v3057_v23 }
 0xc38   :  { %6714 = vmatprep.mubr.f32.mxu1 %v3079_v42 }
 0xc39   :  { %6715 = vmatmul.mubr.f32.vlgmr.msra.gmra.mrb[26].mxu1 %v3080_v26 }
 0xc3a   :  { %6760 = vmatprep.mubr.msk.f32.mxu1 %vm7177_vm2, %v7176_v58 }
 0xd0c   :  { %v6716_v43 = vpop.f32.mrb[26].mxu1 }
 0xd0d   :  { %v3173_v46 = vadd.f32 %v6716_v43, %v7854_v35  ;;  %v3163_v48 = vpop.f32.mrb[27].mxu1 }
 0xd0e   :  { %v3172_v49 = vadd.f32 %v3163_v48, %v7856_v36 }
 0xd0f   :  { %v7945_v50 = vadd.f32 %v6332_v44, %v3173_v46 }
 0xd10   :  { %v7947_v61 = vadd.f32 %v6332_v44, %v3172_v49 }
 0xd11   :  { %v3190_v54 = vsel %vm180_vm1, %v7945_v50, 0.0 }
 0xd12   :  { %3191 = vadd.xlane.f32.xlu1 %v3190_v54  ;;  %v3187_v12 = vsel %vm180_vm1, %v7947_v61, 0.0 }
 0xd13   :  { %3188 = vadd.xlane.f32.xlu0 %v3187_v12 }
 0xd9f   :  { %v3192_v62 = vpop.xlane.xlu1 %3191 }
 0xda0   :  { %v3194_v53 = vmul.f32 0.03125, %v3192_v62  ;;  %v3189_v55 = vpop.xlane.xlu0 %3188 }
 0xda1   :  { %v3193_v63 = vmul.f32 0.03125, %v3189_v55 }
 0xda2   :  { %v3196_v35 = vsub.f32 %v7945_v50, %v3194_v53 }
 0xda3   :  { %v3195_v36 = vsub.f32 %v7947_v61, %v3193_v63 }
 0xda4   :  { %v3198_v0 = vmul.f32 %v3196_v35, %v3196_v35 }
 0xda5   :  { %v3197_v51 = vmul.f32 %v3195_v36, %v3195_v36 }
 0xda6   :  { %v3202_v1 = vsel %vm180_vm1, %v3198_v0, 0.0 }
 0xda7   :  { %3203 = vadd.xlane.f32.xlu1 %v3202_v1  ;;  %v3199_v2 = vsel %vm180_vm1, %v3197_v51, 0.0 }
 0xda8   :  { %3200 = vadd.xlane.f32.xlu0 %v3199_v2 }
 0xe34   :  { %v3204_v24 = vpop.xlane.xlu1 %3203 }
 0xe35   :  { %v3206_v22 = vmul.f32 0.03125, %v3204_v24  ;;  %v3201_v57 = vpop.xlane.xlu0 %3200 }
 0xe36   :  { %v3205_v27 = vmul.f32 0.03125, %v3201_v57 }
 0xe37   :  { %v3208_v60 = vadd.f32 1e-05, %v3206_v22 }
 0xe38   :  { %v3207_v56 = vadd.f32 1e-05, %v3205_v27 }
 0xe39   :  { %7097 = vrsqrt.f32 %v3208_v60 }
 0xe3a   :  { %7099 = vrsqrt.f32 %v3207_v56 }
 0xe43   :  { %v7098_v29 = vpop.eup %7097 }
 0xe44   :  { %v7100_v52 = vpop.eup %7099  ;;  %v3212_v47 = vmul.f32 %v7098_v29, %v3196_v35 }
 0xe45   :  { %v3211_v33 = vmul.f32 %v7100_v52, %v3195_v36 }
 0xe46   :  { %v3220_v17 = vmul.f32 %v6335_v31, %v3212_v47 }
 0xe47   :  { %v3219_v25 = vmul.f32 %v6335_v31, %v3211_v33 }
 0xe48   :  { %v3228_v59 = vadd.f32 %v6336_v16, %v3220_v17 }
 0xe49   :  { %v3227_v34 = vadd.f32 %v6336_v16, %v3219_v25 }
 0xe4b   :  { %6725 = vmatprep.mubr.msk.f32.mxu0 %vm180_vm1, %v3227_v34 }
 0xe4c   :  { %6726 = vmatmul.mubr.msk.f32.vlgmr.msra.gmra.mrb[16].mxu0 %vm180_vm1, %v3228_v59 }
 0xe4d   :  { %6730 = vmatprep.mubr.msk.f32.mxu0 %vm7177_vm2, %v7176_v58 }
 0xf1f   :  { %v6727_v30 = vpop.f32.mrb[16].mxu0 }
 0xf20   :  { %v3314_v9 = vpop.f32.mrb[17].mxu0  ;;  %v7989_v7 = vadd.f32 %v6727_v30, %v6342_v6 }
 0xf21   :  { %v7983_v39 = vadd.f32 %v6342_v6, %v3314_v9 }
 0xf23   :  { %3331 = vrot.lane.b32.xlu1 %v7983_v39, %s7172_s0  ;;  %3325 = vrot.lane.b32.xlu0 %v7983_v39, %s7173_s21 }
 0xf27   :  { %3337 = vrot.lane.b32.xlu1 %v7983_v39, %s7174_s1  ;;  %3333 = vrot.lane.b32.xlu0 %v7989_v7, %s7172_s0 }
 0xf2b   :  { %3327 = vrot.lane.b32.xlu1 %v7989_v7, %s7173_s21  ;;  %3615 = vrot.lane.b32.xlu0 %v7983_v39, %s7175_s22 }
 0xf2f   :  { %3339 = vrot.lane.b32.xlu1 %v7989_v7, %s7174_s1 }
 0xf95   :  { %v8001_v23 = vpop.permute.xlu1 %3331  ;;  %v8003_v14 = vpop.permute.xlu0 %3325 }
 0xf96   :  { %3623 = vrot.lane.b32.xlu0 %v8001_v23, %s7175_s22  ;;  %3619 = vrot.lane.b32.xlu1 %v8003_v14, %s7175_s22  ;;  %v3343_v37 = vcombine.low %v7983_v39, %v8001_v23  ;;  %v3344_v38 = vcombine.high %v7983_v39, %v8001_v23 }
 0xf98   :  { %v3351_v42 = vrot.slane %v3343_v37, %v7493_v5  ;;  %v3358_v43 = vrot.slane %v3344_v38, %v7493_v5 }
 0xf99   :  { %v8009_v10 = vpop.permute.xlu1 %3337  ;;  %v8015_v45 = vpop.permute.xlu0 %3333 }
 0xf9a   :  { %3617 = vrot.lane.b32.xlu0 %v7989_v7, %s7175_s22  ;;  %3627 = vrot.lane.b32.xlu1 %v8009_v10, %s7175_s22  ;;  %v3359_v40 = vcombine.low %v8003_v14, %v8009_v10  ;;  %v3360_v19 = vcombine.high %v8003_v14, %v8009_v10  ;;  %v3411_v0 = vcombine.low %v7989_v7, %v8015_v45 }
 0xf9b   :  { %v3412_v1 = vcombine.high %v7989_v7, %v8015_v45 }
 0xf9c   :  { %v3367_v41 = vrot.slane %v3359_v40, %v7493_v5  ;;  %v3374_v26 = vrot.slane %v3360_v19, %v7493_v5  ;;  %v3419_v24 = vrot.slane %v3411_v0, %v7493_v5 }
 0xf9d   :  { %v8017_v32 = vpop.permute.xlu1 %3327  ;;  %v3616_v62 = vpop.permute.xlu0 %3615  ;;  %v3426_v57 = vrot.slane %v3412_v1, %v7493_v5 }
 0xf9e   :  { %3625 = vrot.lane.b32.xlu0 %v8015_v45, %s7175_s22  ;;  %3621 = vrot.lane.b32.xlu1 %v8017_v32, %s7175_s22  ;;  %v3375_v44 = vcombine.low %v3351_v42, %v3367_v41  ;;  %v3376_v46 = vcombine.high %v3351_v42, %v3367_v41  ;;  %v3391_v48 = vcombine.low %v3358_v43, %v3374_v26 }
 0xf9f   :  { %v3392_v49 = vcombine.high %v3358_v43, %v3374_v26 }
 0xfa0   :  { %v3383_v54 = vrot.slane %v3375_v44, %v7503_v13  ;;  %v3390_v12 = vrot.slane %v3376_v46, %v7503_v13  ;;  %v3399_v53 = vrot.slane %v3391_v48, %v7503_v13 }
 0xfa1   :  { %v8023_v28 = vpop.permute.xlu1 %3339  ;;  %v3406_v55 = vrot.slane %v3392_v49, %v7503_v13 }
 0xfa2   :  { %3629 = vrot.lane.b32.xlu1 %v8023_v28, %s7175_s22  ;;  %v3427_v63 = vcombine.low %v8017_v32, %v8023_v28  ;;  %v3479_v35 = vcombine.low %v3383_v54, %v3390_v12  ;;  %v6345_v36 = vcombine.high %v3383_v54, %v3390_v12  ;;  %v3428_v51 = vcombine.high %v8017_v32, %v8023_v28 }
 0xfa3   :  { %v3495_v8 = vcombine.low %v3399_v53, %v3406_v55  ;;  %v6346_v11 = vcombine.high %v3399_v53, %v3406_v55 }
 0xfa4   :  { %v3435_v15 = vrot.slane %v3427_v63, %v7493_v5  ;;  %v8053_v20 = vrot.slane %v3479_v35, %v7493_v5  ;;  %v8056_v21 = vrot.slane %v6345_v36, %v7493_v5  ;;  %v3442_v22 = vrot.slane %v3428_v51, %v7493_v5 }
 0xfa5   :  { %v8062_v29 = vrot.slane %v3495_v8, %v7493_v5  ;;  %v8065_v31 = vrot.slane %v6346_v11, %v7493_v5 }
 0xfa6   :  { %v3443_v52 = vcombine.low %v3419_v24, %v3435_v15  ;;  %v3444_v47 = vcombine.high %v3419_v24, %v3435_v15  ;;  %v3459_v25 = vcombine.low %v3426_v57, %v3442_v22  ;;  %v3460_v34 = vcombine.high %v3426_v57, %v3442_v22 }
 0xfa7   :  { %v3511_v59 = vcombine.low %v8053_v20, %v8056_v21  ;;  %v3527_v41 = vcombine.low %v8062_v29, %v8065_v31 }
 0xfa8   :  { %v3451_v37 = vrot.slane %v3443_v52, %v7503_v13  ;;  %v3458_v19 = vrot.slane %v3444_v47, %v7503_v13  ;;  %v3467_v48 = vrot.slane %v3459_v25, %v7503_v13  ;;  %v3474_v49 = vrot.slane %v3460_v34, %v7503_v13 }
 0xfa9   :  { %v8080_v54 = vrot.slane %v3511_v59, %v7503_v13  ;;  %v8087_v51 = vrot.slane %v3527_v41, %v7503_v13 }
 0xfaa   :  { %v3547_v63 = vcombine.low %v3451_v37, %v3458_v19  ;;  %v6347_v11 = vcombine.high %v3451_v37, %v3458_v19  ;;  %v3563_v15 = vcombine.low %v3467_v48, %v3474_v49  ;;  %v6348_v25 = vcombine.high %v3467_v48, %v3474_v49 }
 0xfac   :  { %v8101_v37 = vrot.slane %v6347_v11, %v7493_v5  ;;  %v8104_v19 = vrot.slane %v3563_v15, %v7493_v5 }
0x1008   :  { %v3620_v2 = vpop.permute.xlu1 %3619  ;;  %v3624_v4 = vpop.permute.xlu0 %3623 }
0x1009   :  { %v3639_v27 = vcombine.low %v3616_v62, %v3624_v4  ;;  %v3640_v60 = vcombine.high %v3616_v62, %v3624_v4 }
0x100b   :  { %v3647_v6 = vrot.slane %v3639_v27, %v7493_v5  ;;  %v3654_v30 = vrot.slane %v3640_v60, %v7493_v5 }
0x100c   :  { %v3618_v56 = vpop.permute.xlu0 %3617  ;;  %v3628_v33 = vpop.permute.xlu1 %3627 }
0x100d   :  { %v3655_v16 = vcombine.low %v3620_v2, %v3628_v33  ;;  %v3656_v17 = vcombine.high %v3620_v2, %v3628_v33 }
0x100f   :  { %v3663_v9 = vrot.slane %v3655_v16, %v7493_v5  ;;  %v3670_v40 = vrot.slane %v3656_v17, %v7493_v5  ;;  %v8098_v17 = vrot.slane %v3547_v63, %v7493_v5 }
0x1010   :  { %v3622_v38 = vpop.permute.xlu1 %3621  ;;  %v3626_v46 = vpop.permute.xlu0 %3625 }
0x1011   :  { %v3671_v42 = vcombine.low %v3647_v6, %v3663_v9  ;;  %v3672_v26 = vcombine.high %v3647_v6, %v3663_v9  ;;  %v3687_v43 = vcombine.low %v3654_v30, %v3670_v40  ;;  %v3688_v44 = vcombine.high %v3654_v30, %v3670_v40 }
0x1012   :  { %v3707_v35 = vcombine.low %v3618_v56, %v3626_v46  ;;  %v3708_v36 = vcombine.high %v3618_v56, %v3626_v46  ;;  %v3578_v46 = vrot.slane %v6348_v25, %v7493_v5 }
0x1013   :  { %v3679_v12 = vrot.slane %v3671_v42, %v7503_v13  ;;  %v3686_v62 = vrot.slane %v3672_v26, %v7503_v13  ;;  %v3695_v53 = vrot.slane %v3687_v43, %v7503_v13  ;;  %v3702_v55 = vrot.slane %v3688_v44, %v7503_v13 }
0x1014   :  { %v3630_v0 = vpop.permute.xlu1 %3629  ;;  %v3715_v52 = vrot.slane %v3707_v35, %v7493_v5  ;;  %v3722_v47 = vrot.slane %v3708_v36, %v7493_v5  ;;  %v3543_v35 = vcombine.low %v8080_v54, %v8087_v51  ;;  %v3512_v36 = vcombine.high %v8053_v20, %v8056_v21 }
0x1015   :  { %v3775_v1 = vcombine.low %v3679_v12, %v3686_v62  ;;  %v6349_v2 = vcombine.high %v3679_v12, %v3686_v62  ;;  %v3791_v4 = vcombine.low %v3695_v53, %v3702_v55  ;;  %v6350_v8 = vcombine.high %v3695_v53, %v3702_v55 }
0x1016   :  { %v3723_v24 = vcombine.low %v3622_v38, %v3630_v0  ;;  %v3724_v22 = vcombine.high %v3622_v38, %v3630_v0  ;;  %v3528_v0 = vcombine.high %v8062_v29, %v8065_v31  ;;  %v3596_v21 = vcombine.high %v8104_v19, %v3578_v46 }
0x1017   :  { %v3782_v57 = vrot.slane %v3775_v1, %v7493_v5  ;;  %v3790_v27 = vrot.slane %v6349_v2, %v7493_v5  ;;  %v3798_v60 = vrot.slane %v3791_v4, %v7493_v5  ;;  %v3806_v56 = vrot.slane %v6350_v8, %v7493_v5 }
0x1018   :  { %v3731_v33 = vrot.slane %v3723_v24, %v7493_v5  ;;  %v3738_v16 = vrot.slane %v3724_v22, %v7493_v5  ;;  %v3580_v1 = vcombine.high %v8098_v17, %v8101_v37  ;;  %v3526_v22 = vrot.slane %v3512_v36, %v7503_v13 }
0x1019   :  { %v3807_v34 = vcombine.low %v3782_v57, %v3790_v27  ;;  %v3823_v59 = vcombine.low %v3798_v60, %v3806_v56  ;;  %v3808_v48 = vcombine.high %v3782_v57, %v3790_v27  ;;  %v3824_v49 = vcombine.high %v3798_v60, %v3806_v56 }
0x101a   :  { %v3739_v6 = vcombine.low %v3715_v52, %v3731_v33  ;;  %v3740_v30 = vcombine.high %v3715_v52, %v3731_v33  ;;  %v3755_v9 = vcombine.low %v3722_v47, %v3738_v16  ;;  %v3756_v40 = vcombine.high %v3722_v47, %v3738_v16 }
0x101b   :  { %v3815_v38 = vrot.slane %v3807_v34, %v7503_v13  ;;  %v3831_v41 = vrot.slane %v3823_v59, %v7503_v13  ;;  %v3822_v24 = vrot.slane %v3808_v48, %v7503_v13  ;;  %v3838_v20 = vrot.slane %v3824_v49, %v7503_v13 }
0x101c   :  { %v3747_v42 = vrot.slane %v3739_v6, %v7503_v13  ;;  %v3754_v26 = vrot.slane %v3740_v30, %v7503_v13  ;;  %v3763_v43 = vrot.slane %v3755_v9, %v7503_v13  ;;  %v3770_v44 = vrot.slane %v3756_v40, %v7503_v13 }
0x101d   :  { %v3839_v12 = vcombine.low %v3815_v38, %v3831_v41  ;;  %v3840_v15 = vcombine.high %v3815_v38, %v3831_v41  ;;  %v3542_v57 = vrot.slane %v3528_v0, %v7503_v13  ;;  %v3544_v27 = vcombine.high %v8080_v54, %v8087_v51 }
0x101e   :  { %v3843_v62 = vcombine.low %v3747_v42, %v3754_v26  ;;  %v6351_v53 = vcombine.high %v3747_v42, %v3754_v26  ;;  %v3859_v55 = vcombine.low %v3763_v43, %v3770_v44  ;;  %v6352_v63 = vcombine.high %v3763_v43, %v3770_v44 }
0x101f   :  { %6729 = vmatpush3.xpose.msk.msra.mxu0 %vm1248_vm3, %v3839_v12  ;;  %v3594_v52 = vrot.slane %v3580_v1, %v7503_v13  ;;  %v3841_v16 = vcombine.low %v3822_v24, %v3838_v20  ;;  %v3610_v25 = vrot.slane %v3596_v21, %v7503_v13  ;;  %v3545_v54 = vcombine.low %v3526_v22, %v3542_v57 }
0x1020   :  { %v3850_v2 = vrot.slane %v3843_v62, %v7493_v5  ;;  %v3858_v4 = vrot.slane %v6351_v53, %v7493_v5  ;;  %v3866_v8 = vrot.slane %v3859_v55, %v7493_v5  ;;  %v3874_v11 = vrot.slane %v6352_v63, %v7493_v5  ;;  %6733 = vmatprep.subr.mxu0 %v7176_v58 }
0x1021   :  { %v3579_v51 = vcombine.low %v8098_v17, %v8101_v37  ;;  %v3595_v59 = vcombine.low %v8104_v19, %v3578_v46  ;;  %v3613_v6 = vcombine.low %v3594_v52, %v3610_v25  ;;  %v3842_v30 = vcombine.high %v3822_v24, %v3838_v20 }
0x1022   :  { %v3876_v29 = vcombine.high %v3850_v2, %v3858_v4  ;;  %v3892_v31 = vcombine.high %v3866_v8, %v3874_v11  ;;  %6731 = vmatmul.mubr.msk.f32.vlgmr.msra.gmra.mrb[18].mxu0 %vm1248_vm3, %v3543_v35  ;;  %v3875_v47 = vcombine.low %v3850_v2, %v3858_v4  ;;  %v3891_v33 = vcombine.low %v3866_v8, %v3874_v11 }
0x1023   :  { %6734 = vmatpush3.xpose.msk.msra.mxu0 %vm1248_vm3, %v3840_v15  ;;  %6735 = vmatprep.mubr.msk.f32.mxu0 %vm7177_vm2, %v7176_v58  ;;  %v3546_v17 = vcombine.high %v3526_v22, %v3542_v57  ;;  %v3587_v37 = vrot.slane %v3579_v51, %v7503_v13  ;;  %v3603_v19 = vrot.slane %v3595_v59, %v7503_v13 }
0x1024   :  { %6738 = vmatprep.subr.mxu0 %v7176_v58  ;;  %v3890_v60 = vrot.slane %v3876_v29, %v7503_v13  ;;  %v3906_v56 = vrot.slane %v3892_v31, %v7503_v13  ;;  %v3883_v9 = vrot.slane %v3875_v47, %v7503_v13  ;;  %v3899_v40 = vrot.slane %v3891_v33, %v7503_v13 }
0x1025   :  { %v3611_v41 = vcombine.low %v3587_v37, %v3603_v19  ;;  %v3612_v26 = vcombine.high %v3587_v37, %v3603_v19  ;;  %v3614_v44 = vcombine.high %v3594_v52, %v3610_v25 }
0x1026   :  { %6736 = vmatmul.mubr.msk.f32.vlgmr.msra.gmra.mrb[20].mxu0 %vm1248_vm3, %v3544_v27  ;;  %v3909_v34 = vcombine.low %v3890_v60, %v3906_v56  ;;  %v3907_v38 = vcombine.low %v3883_v9, %v3899_v40  ;;  %v3908_v42 = vcombine.high %v3883_v9, %v3899_v40  ;;  %v3910_v43 = vcombine.high %v3890_v60, %v3906_v56 }
0x1027   :  { %6739 = vmatpush3.xpose.msk.msra.mxu0 %vm1248_vm3, %v3841_v16  ;;  %6740 = vmatprep.mubr.msk.f32.mxu0 %vm7177_vm2, %v7176_v58 }
0x1028   :  { %6759 = vmatpush3.xpose.msk.msra.mxu1 %vm1248_vm3, %v3909_v34  ;;  %6743 = vmatprep.subr.mxu0 %v7176_v58 }
0x1029   :  { %6768 = vmatprep.subr.mxu1 %v7176_v58 }
0x102a   :  { %6741 = vmatmul.mubr.msk.f32.vlgmr.msra.gmra.mrb[22].mxu0 %vm1248_vm3, %v3545_v54 }
0x102b   :  { %6761 = vmatmul.mubr.msk.f32.vlgmr.msra.gmra.mrb[28].mxu1 %vm1248_vm3, %v3613_v6  ;;  %6744 = vmatpush3.xpose.msk.msra.mxu0 %vm1248_vm3, %v3842_v30 }
0x102c   :  { %6745 = vmatprep.mubr.msk.f32.mxu0 %vm7177_vm2, %v7176_v58  ;;  %6748 = vmatprep.subr.mxu0 %v7176_v58 }
0x102d   :  { %6770 = vmatprep.mubr.msk.f32.mxu1 %vm7177_vm2, %v7176_v58 }
0x102e   :  { %6746 = vmatmul.mubr.msk.f32.vlgmr.msra.gmra.mrb[24].mxu0 %vm1248_vm3, %v3546_v17 }
0x102f   :  { %6749 = vmatpush3.xpose.msk.msra.mxu0 %vm1248_vm3, %v3907_v38  ;;  %6750 = vmatprep.mubr.msk.f32.mxu0 %vm7177_vm2, %v7176_v58 }
0x1030   :  { %6753 = vmatprep.subr.mxu0 %v7176_v58 }
0x1032   :  { %6751 = vmatmul.mubr.msk.f32.vlgmr.msra.gmra.mrb[26].mxu0 %vm1248_vm3, %v3611_v41 }
0x1033   :  { %6754 = vmatpush3.xpose.msk.msra.mxu0 %vm1248_vm3, %v3908_v42  ;;  %6755 = vmatprep.mubr.msk.f32.mxu0 %vm7177_vm2, %v7176_v58 }
0x1034   :  { %6763 = vmatprep.subr.mxu0 %v7176_v58 }
0x1036   :  { %6756 = vmatmul.mubr.msk.f32.vlgmr.msra.gmra.mrb[28].mxu0 %vm1248_vm3, %v3612_v26 }
0x1037   :  { %6764 = vmatpush3.xpose.msk.msra.mxu0 %vm1248_vm3, %v3910_v43  ;;  %6765 = vmatprep.mubr.msk.f32.mxu0 %vm7177_vm2, %v7176_v58 }
0x1038   :  { %6773 = vmatprep.subr.mxu0 %v7176_v58 }
0x103a   :  { %6766 = vmatmul.mubr.msk.f32.vlgmr.msra.gmra.mrb[30].mxu0 %vm1248_vm3, %v3614_v44 }
0x103b   :  { %6775 = vmatprep.mubr.msk.f32.mxu0 %vm7177_vm2, %v7176_v58 }
0x10f5   :  { %v4279_v46 = vpop.f32.mrb[18].mxu0 }
0x10f6   :  { %v6732_v48 = vpop.f32.mrb[19].mxu0  ;;  %v4280_v1 = vadd.f32 %v4279_v46, %v7644_v18 }
0x10f8   :  { %v4815_v15 = vsel %vm1248_vm3, %v4280_v1, -inf }
0x10f9   :  { %v4355_v49 = vpop.f32.mrb[20].mxu0 }
0x10fa   :  { %v4356_v12 = vadd.f32 %v4355_v49, %v7644_v18  ;;  %v6737_v62 = vpop.f32.mrb[21].mxu0 }
0x10fc   :  { %v4818_v53 = vsel %vm1248_vm3, %v4356_v12, -inf }
0x10fd   :  { %4819 = vmax.xlane.f32.xlu1 %v4818_v53  ;;  %v4431_v55 = vpop.f32.mrb[22].mxu0 }
0x10fe   :  { %v4735_v63 = vpop.f32.mrb[28].mxu1  ;;  %v6742_v35 = vpop.f32.mrb[23].mxu0  ;;  %v4432_v11 = vadd.f32 %v4431_v55, %v7644_v18 }
0x10ff   :  { %v4736_v36 = vadd.f32 %v4735_v63, %v7644_v18  ;;  %v6762_v0 = vpop.f32.mrb[29].mxu1 }
0x1100   :  { %v4821_v29 = vsel %vm1248_vm3, %v4432_v11, -inf }
0x1101   :  { %v4507_v2 = vpop.f32.mrb[24].mxu0  ;;  %v4833_v4 = vsel %vm1248_vm3, %v4736_v36, -inf }
0x1102   :  { %4834 = vmax.xlane.f32.xlu0 %v4833_v4  ;;  %v6747_v8 = vpop.f32.mrb[25].mxu0  ;;  %v4508_v21 = vadd.f32 %v4507_v2, %v7644_v18 }
0x1104   :  { %v4824_v27 = vsel %vm1248_vm3, %v4508_v21, -inf }
0x1105   :  { %v4583_v24 = vpop.f32.mrb[26].mxu0 }
0x1106   :  { %4816 = vmax.xlane.f32.xlu0 %v4815_v15  ;;  %v6752_v20 = vpop.f32.mrb[27].mxu0  ;;  %v4584_v57 = vadd.f32 %v4583_v24, %v7644_v18 }
0x1108   :  { %v4827_v52 = vsel %vm1248_vm3, %v4584_v57, -inf }
0x1109   :  { %v4659_v31 = vpop.f32.mrb[28].mxu0 }
0x110a   :  { %4822 = vmax.xlane.f32.xlu0 %v4821_v29  ;;  %v6757_v22 = vpop.f32.mrb[29].mxu0  ;;  %v4660_v47 = vadd.f32 %v4659_v31, %v7644_v18 }
0x110c   :  { %v4830_v16 = vsel %vm1248_vm3, %v4660_v47, -inf }
0x110d   :  { %v4811_v60 = vpop.f32.mrb[30].mxu0 }
0x110e   :  { %4825 = vmax.xlane.f32.xlu0 %v4824_v27  ;;  %3915 = vrot.lane.b32.xlu1 %v8003_v14, %s7181_s24  ;;  %v6767_v56 = vpop.f32.mrb[31].mxu0  ;;  %v4812_v33 = vadd.f32 %v4811_v60, %v7644_v18 }
0x1110   :  { %v4836_v25 = vsel %vm1248_vm3, %v4812_v33, -inf }
0x1112   :  { %4828 = vmax.xlane.f32.xlu0 %v4827_v52  ;;  %3919 = vrot.lane.b32.xlu1 %v8001_v23, %s7181_s24 }
0x1128   :  { %3911 = vrot.lane.b32.xlu0 %v7983_v39, %s7181_s24 }
0x1136   :  { %4831 = vmax.xlane.f32.xlu1 %v4830_v16 }
0x113a   :  { %4837 = vmax.xlane.f32.xlu1 %v4836_v25 }
0x114b   :  { %3923 = vrot.lane.b32.xlu1 %v8009_v10, %s7181_s24 }
0x118a   :  { %v4820_v14 = vpop.xlane.xlu1 %4819 }
0x118b   :  { %v4840_v34 = vsub.f32 %v4356_v12, %v4820_v14 }
0x118d   :  { %v4849_v54 = vmul.f32 1.442695, %v4840_v34 }
0x118e   :  { %v3916_v35 = vpop.permute.xlu1 %3915 }
0x118f   :  { %7101 = vpow2.f32 %v4849_v54  ;;  %v4835_v23 = vpop.xlane.xlu0 %4834 }
0x1190   :  { %v4845_v51 = vsub.f32 %v4736_v36, %v4835_v23 }
0x1192   :  { %v4859_v39 = vmul.f32 1.442695, %v4845_v51  ;;  %v3920_v36 = vpop.permute.xlu1 %3919 }
0x1193   :  { %v4817_v59 = vpop.xlane.xlu0 %4816 }
0x1194   :  { %7103 = vpow2.f32 %v4859_v39  ;;  %v4839_v6 = vsub.f32 %v4280_v1, %v4817_v59 }
0x1196   :  { %v4847_v18 = vmul.f32 1.442695, %v4839_v6 }
0x1197   :  { %v4823_v30 = vpop.xlane.xlu0 %4822 }
0x1198   :  { %7105 = vpow2.f32 %v4847_v18  ;;  %v4841_v9 = vsub.f32 %v4432_v11, %v4823_v30 }
0x1199   :  { %v8207_v40 = vpop.eup %7101 }
0x119a   :  { %v4851_v17 = vmul.f32 1.442695, %v4841_v9  ;;  %v4866_v10 = vsel %vm1248_vm3, %v8207_v40, 0.0 }
0x119b   :  { %v4826_v37 = vpop.xlane.xlu0 %4825  ;;  %4867 = vadd.xlane.f32.xlu1 %v4866_v10 }
0x119c   :  { %7107 = vpow2.f32 %v4851_v17  ;;  %v4842_v19 = vsub.f32 %v4508_v21, %v4826_v37 }
0x119e   :  { %v8211_v38 = vpop.eup %7103  ;;  %v4853_v41 = vmul.f32 1.442695, %v4842_v19 }
0x119f   :  { %v4829_v42 = vpop.xlane.xlu0 %4828  ;;  %v4881_v26 = vsel %vm1248_vm3, %v8211_v38, 0.0 }
0x11a0   :  { %7109 = vpow2.f32 %v4853_v41  ;;  %v4843_v43 = vsub.f32 %v4584_v57, %v4829_v42  ;;  %4882 = vadd.xlane.f32.xlu0 %v4881_v26 }
0x11a2   :  { %v8215_v44 = vpop.eup %7105  ;;  %v4855_v46 = vmul.f32 1.442695, %v4843_v43 }
0x11a3   :  { %v4863_v48 = vsel %vm1248_vm3, %v8215_v44, 0.0  ;;  %v3912_v4 = vpop.permute.xlu0 %3911 }
0x11a4   :  { %7111 = vpow2.f32 %v4855_v46  ;;  %4864 = vadd.xlane.f32.xlu0 %v4863_v48  ;;  %v3935_v15 = vcombine.low %v3912_v4, %v3920_v36  ;;  %v3936_v24 = vcombine.high %v3912_v4, %v3920_v36 }
0x11a6   :  { %v8219_v49 = vpop.eup %7107  ;;  %v3943_v22 = vrot.slane %v3935_v15, %v7493_v5  ;;  %v3950_v57 = vrot.slane %v3936_v24, %v7493_v5 }
0x11a7   :  { %v4869_v12 = vsel %vm1248_vm3, %v8219_v49, 0.0 }
0x11a8   :  { %4870 = vadd.xlane.f32.xlu0 %v4869_v12 }
0x11aa   :  { %v8223_v62 = vpop.eup %7109 }
0x11ab   :  { %v4872_v53 = vsel %vm1248_vm3, %v8223_v62, 0.0 }
0x11ac   :  { %4873 = vadd.xlane.f32.xlu1 %v4872_v53 }
0x11ae   :  { %v8227_v55 = vpop.eup %7111 }
0x11af   :  { %v4875_v63 = vsel %vm1248_vm3, %v8227_v55, 0.0 }
0x11b0   :  { %4876 = vadd.xlane.f32.xlu0 %v4875_v63 }
0x11c3   :  { %v4832_v0 = vpop.xlane.xlu1 %4831 }
0x11c4   :  { %v4844_v1 = vsub.f32 %v4660_v47, %v4832_v0 }
0x11c6   :  { %v4857_v2 = vmul.f32 1.442695, %v4844_v1 }
0x11c7   :  { %v4838_v8 = vpop.xlane.xlu1 %4837 }
0x11c8   :  { %7113 = vpow2.f32 %v4857_v2  ;;  %v4846_v11 = vsub.f32 %v4812_v33, %v4838_v8 }
0x11ca   :  { %v4861_v20 = vmul.f32 1.442695, %v4846_v11 }
0x11cb   :  { %v3924_v21 = vpop.permute.xlu1 %3923 }
0x11cc   :  { %7115 = vpow2.f32 %v4861_v20  ;;  %v3951_v29 = vcombine.low %v3916_v35, %v3924_v21  ;;  %v3952_v31 = vcombine.high %v3916_v35, %v3924_v21 }
0x11ce   :  { %v3959_v27 = vrot.slane %v3951_v29, %v7493_v5  ;;  %v3966_v60 = vrot.slane %v3952_v31, %v7493_v5 }
0x11d0   :  { %v3967_v56 = vcombine.low %v3943_v22, %v3959_v27  ;;  %v3968_v52 = vcombine.high %v3943_v22, %v3959_v27  ;;  %v3983_v47 = vcombine.low %v3950_v57, %v3966_v60  ;;  %v3984_v16 = vcombine.high %v3950_v57, %v3966_v60 }
0x11d2   :  { %v8235_v33 = vpop.eup %7113  ;;  %v3975_v25 = vrot.slane %v3967_v56, %v7503_v13  ;;  %v3982_v14 = vrot.slane %v3968_v52, %v7503_v13  ;;  %v3991_v34 = vrot.slane %v3983_v47, %v7503_v13  ;;  %v3998_v54 = vrot.slane %v3984_v16, %v7503_v13 }
0x11d3   :  { %v4878_v23 = vsel %vm1248_vm3, %v8235_v33, 0.0 }
0x11d4   :  { %v4071_v51 = vcombine.low %v3975_v25, %v3982_v14  ;;  %v6353_v39 = vcombine.high %v3975_v25, %v3982_v14  ;;  %v4087_v59 = vcombine.low %v3991_v34, %v3998_v54  ;;  %v6354_v6 = vcombine.high %v3991_v34, %v3998_v54  ;;  %4879 = vadd.xlane.f32.xlu1 %v4878_v23 }
0x11d6   :  { %v8243_v18 = vpop.eup %7115  ;;  %v4078_v30 = vrot.slane %v4071_v51, %v7493_v5  ;;  %v4086_v9 = vrot.slane %v6353_v39, %v7493_v5  ;;  %v4094_v17 = vrot.slane %v4087_v59, %v7493_v5  ;;  %v4102_v10 = vrot.slane %v6354_v6, %v7493_v5 }
0x11d7   :  { %v4884_v37 = vsel %vm1248_vm3, %v8243_v18, 0.0 }
0x11d8   :  { %4885 = vadd.xlane.f32.xlu0 %v4884_v37  ;;  %v4103_v19 = vcombine.low %v4078_v30, %v4086_v9  ;;  %v4119_v41 = vcombine.low %v4094_v17, %v4102_v10  ;;  %v4104_v42 = vcombine.high %v4078_v30, %v4086_v9  ;;  %v4120_v26 = vcombine.high %v4094_v17, %v4102_v10 }
0x11da   :  { %v4111_v43 = vrot.slane %v4103_v19, %v7503_v13  ;;  %v4127_v46 = vrot.slane %v4119_v41, %v7503_v13  ;;  %v4118_v48 = vrot.slane %v4104_v42, %v7503_v13  ;;  %v4134_v12 = vrot.slane %v4120_v26, %v7503_v13 }
0x11dc   :  { %v4135_v53 = vcombine.low %v4111_v43, %v4127_v46  ;;  %v4136_v63 = vcombine.high %v4111_v43, %v4127_v46  ;;  %v4138_v35 = vcombine.high %v4118_v48, %v4134_v12  ;;  %v4137_v36 = vcombine.low %v4118_v48, %v4134_v12 }
0x11de   :  { %6769 = vmatpush3.msra.mxu1 %v4135_v53  ;;  %6774 = vmatpush3.msra.mxu0 %v4136_v63 }
0x11df   :  { %6783 = vmatprep.subr.mxu0 %v7176_v58  ;;  %6778 = vmatprep.subr.mxu1 %v7176_v58 }
0x11e5   :  { %3917 = vrot.lane.b32.xlu1 %v8017_v32, %s7181_s24 }
0x11e9   :  { %3921 = vrot.lane.b32.xlu1 %v8015_v45, %s7181_s24 }
0x11ed   :  { %3925 = vrot.lane.b32.xlu1 %v8023_v28, %s7181_s24 }
0x11ee   :  { %3913 = vrot.lane.b32.xlu0 %v7989_v7, %s7181_s24 }
0x1228   :  { %v4868_v0 = vpop.xlane.xlu1 %4867 }
0x1229   :  { %7117 = vrcp.f32 %v4868_v0 }
0x122d   :  { %v4883_v1 = vpop.xlane.xlu0 %4882 }
0x1231   :  { %v4865_v2 = vpop.xlane.xlu0 %4864 }
0x1232   :  { %7119 = vrcp.f32 %v4865_v2 }
0x1233   :  { %v7118_v4 = vpop.eup %7117 }
0x1234   :  { %v4896_v8 = vmul.f32 %v7118_v4, %v8207_v40 }
0x1235   :  { %v4871_v11 = vpop.xlane.xlu0 %4870 }
0x1236   :  { %7121 = vrcp.f32 %v4871_v11  ;;  %6776 = vmatmul.mubr.msk.f32.vlgmr.msra.gmra.mrb[32].mxu0 %vm1248_vm3, %v4896_v8 }
0x1237   :  { %6784 = vmatpush3.msra.mxu0 %v4138_v35  ;;  %6785 = vmatprep.mubr.msk.f32.mxu0 %vm7177_vm2, %v7176_v58 }
0x1238   :  { %6793 = vmatprep.subr.mxu0 %v7176_v58 }
0x1239   :  { %v4874_v45 = vpop.xlane.xlu1 %4873 }
0x123a   :  { %7123 = vrcp.f32 %v4874_v45 }
0x123c   :  { %v7120_v7 = vpop.eup %7119 }
0x123d   :  { %v4895_v32 = vmul.f32 %v7120_v7, %v8215_v44  ;;  %v4877_v44 = vpop.xlane.xlu0 %4876 }
0x123e   :  { %7125 = vrcp.f32 %v4877_v44 }
0x123f   :  { %6771 = vmatmul.mubr.msk.f32.vlgmr.msra.gmra.mrb[30].mxu1 %vm1248_vm3, %v4895_v32 }
0x1240   :  { %v7122_v28 = vpop.eup %7121  ;;  %6779 = vmatpush3.msra.mxu1 %v4137_v36  ;;  %6780 = vmatprep.mubr.msk.f32.mxu1 %vm7177_vm2, %v7176_v58 }
0x1241   :  { %v4897_v40 = vmul.f32 %v7122_v28, %v8219_v49  ;;  %6788 = vmatprep.subr.mxu1 %v7176_v58 }
0x1243   :  { %6781 = vmatmul.mubr.msk.f32.vlgmr.msra.gmra.mrb[32].mxu1 %vm1248_vm3, %v4897_v40 }
0x1244   :  { %v7124_v15 = vpop.eup %7123  ;;  %6790 = vmatprep.mubr.msk.f32.mxu1 %vm7177_vm2, %v7176_v58 }
0x1245   :  { %v4898_v24 = vmul.f32 %v7124_v15, %v8223_v62 }
0x1247   :  { %6786 = vmatmul.mubr.msk.f32.vlgmr.msra.gmra.mrb[34].mxu0 %vm1248_vm3, %v4898_v24 }
0x1248   :  { %6795 = vmatprep.mubr.msk.f32.mxu0 %vm7177_vm2, %v7176_v58  ;;  %v7126_v42 = vpop.eup %7125 }
0x1249   :  { %v4899_v8 = vmul.f32 %v7126_v42, %v8227_v55 }
0x1261   :  { %v4880_v20 = vpop.xlane.xlu1 %4879 }
0x1262   :  { %7127 = vrcp.f32 %v4880_v20 }
0x1263   :  { %7129 = vrcp.f32 %v4883_v1 }
0x1265   :  { %v4886_v21 = vpop.xlane.xlu0 %4885  ;;  %v3918_v29 = vpop.permute.xlu1 %3917 }
0x1266   :  { %7131 = vrcp.f32 %v4886_v21 }
0x1269   :  { %v3914_v49 = vpop.permute.xlu0 %3913  ;;  %v3922_v31 = vpop.permute.xlu1 %3921 }
0x126a   :  { %v4003_v22 = vcombine.low %v3914_v49, %v3922_v31  ;;  %v4004_v57 = vcombine.high %v3914_v49, %v3922_v31 }
0x126c   :  { %v4011_v52 = vrot.slane %v4003_v22, %v7493_v5  ;;  %v4018_v62 = vrot.slane %v4004_v57, %v7493_v5  ;;  %v7128_v12 = vpop.eup %7127 }
0x126d   :  { %v3926_v27 = vpop.permute.xlu1 %3925  ;;  %v7130_v35 = vpop.eup %7129  ;;  %v4900_v11 = vmul.f32 %v7128_v12, %v8235_v33 }
0x126e   :  { %v4019_v60 = vcombine.low %v3918_v29, %v3926_v27  ;;  %v4020_v56 = vcombine.high %v3918_v29, %v3926_v27  ;;  %v4901_v32 = vmul.f32 %v7130_v35, %v8211_v38 }
0x1270   :  { %v4027_v47 = vrot.slane %v4019_v60, %v7493_v5  ;;  %v4034_v16 = vrot.slane %v4020_v56, %v7493_v5  ;;  %v7132_v4 = vpop.eup %7131 }
0x1271   :  { %v4902_v28 = vmul.f32 %v7132_v4, %v8243_v18 }
0x1272   :  { %v4035_v25 = vcombine.low %v4011_v52, %v4027_v47  ;;  %v4036_v14 = vcombine.high %v4011_v52, %v4027_v47  ;;  %v4051_v34 = vcombine.low %v4018_v62, %v4034_v16  ;;  %v4052_v54 = vcombine.high %v4018_v62, %v4034_v16 }
0x1274   :  { %v4043_v23 = vrot.slane %v4035_v25, %v7503_v13  ;;  %v4050_v51 = vrot.slane %v4036_v14, %v7503_v13  ;;  %v4059_v39 = vrot.slane %v4051_v34, %v7503_v13  ;;  %v4066_v59 = vrot.slane %v4052_v54, %v7503_v13 }
0x1276   :  { %v4139_v6 = vcombine.low %v4043_v23, %v4050_v51  ;;  %v6355_v30 = vcombine.high %v4043_v23, %v4050_v51  ;;  %v4155_v9 = vcombine.low %v4059_v39, %v4066_v59  ;;  %v6356_v17 = vcombine.high %v4059_v39, %v4066_v59 }
0x1278   :  { %v4146_v10 = vrot.slane %v4139_v6, %v7493_v5  ;;  %v4154_v37 = vrot.slane %v6355_v30, %v7493_v5  ;;  %v4162_v19 = vrot.slane %v4155_v9, %v7493_v5  ;;  %v4170_v41 = vrot.slane %v6356_v17, %v7493_v5 }
0x127a   :  { %v4171_v26 = vcombine.low %v4146_v10, %v4154_v37  ;;  %v4187_v43 = vcombine.low %v4162_v19, %v4170_v41  ;;  %v4172_v46 = vcombine.high %v4146_v10, %v4154_v37  ;;  %v4188_v48 = vcombine.high %v4162_v19, %v4170_v41 }
0x127c   :  { %v4179_v53 = vrot.slane %v4171_v26, %v7503_v13  ;;  %v4195_v63 = vrot.slane %v4187_v43, %v7503_v13  ;;  %v4186_v36 = vrot.slane %v4172_v46, %v7503_v13  ;;  %v4202_v0 = vrot.slane %v4188_v48, %v7503_v13 }
0x127e   :  { %v4203_v1 = vcombine.low %v4179_v53, %v4195_v63  ;;  %v4204_v2 = vcombine.high %v4179_v53, %v4195_v63  ;;  %v4205_v45 = vcombine.low %v4186_v36, %v4202_v0  ;;  %v4206_v7 = vcombine.high %v4186_v36, %v4202_v0 }
0x1280   :  { %6789 = vmatpush3.msra.mxu1 %v4203_v1  ;;  %6794 = vmatpush3.msra.mxu0 %v4204_v2 }
0x1281   :  { %6791 = vmatmul.mubr.msk.f32.vlgmr.msra.gmra.mrb[34].mxu1 %vm1248_vm3, %v4899_v8  ;;  %6796 = vmatmul.mubr.msk.f32.vlgmr.msra.gmra.mrb[36].mxu0 %vm1248_vm3, %v4900_v11 }
0x1282   :  { %6798 = vmatprep.subr.mxu1 %v7176_v58  ;;  %6803 = vmatprep.subr.mxu0 %v7176_v58 }
0x1283   :  { %6799 = vmatpush3.msra.mxu1 %v4205_v45  ;;  %6804 = vmatpush3.msra.mxu0 %v4206_v7 }
0x1284   :  { %6800 = vmatprep.mubr.msk.f32.mxu1 %vm7177_vm2, %v7176_v58  ;;  %6805 = vmatprep.mubr.msk.f32.mxu0 %vm7177_vm2, %v7176_v58 }
0x1285   :  { %6801 = vmatmul.mubr.msk.f32.vlgmr.msra.gmra.mrb[36].mxu1 %vm1248_vm3, %v4901_v32  ;;  %6806 = vmatmul.mubr.msk.f32.vlgmr.msra.gmra.mrb[38].mxu0 %vm1248_vm3, %v4902_v28 }
0x1309   :  { %v5045_v55 = vpop.f32.mrb[32].mxu0 }
0x130a   :  { %v6777_v33 = vpop.f32.mrb[33].mxu0 }
0x1312   :  { %v4972_v40 = vpop.f32.mrb[30].mxu1 }
0x1313   :  { %v6772_v15 = vpop.f32.mrb[31].mxu1 }
0x1316   :  { %v5118_v24 = vpop.f32.mrb[32].mxu1 }
0x1317   :  { %v5487_v38 = vcombine.low %v4972_v40, %v5118_v24  ;;  %v5488_v44 = vcombine.high %v4972_v40, %v5118_v24  ;;  %v6782_v18 = vpop.f32.mrb[33].mxu1 }
0x1318   :  { %v6386_v18 = vld [vmem:[%s8521_s9 + $0x28] sm:$0xff] }
0x1319   :  { %v5495_v31 = vrot.slane %v5487_v38, %v7493_v5  ;;  %v5502_v22 = vrot.slane %v5488_v44, %v7493_v5  ;;  %v6385_v44 = vld [vmem:[%s8521_s9 + $0x20] sm:$0xff] }
0x131a   :  { %v5191_v20 = vpop.f32.mrb[34].mxu0 }
0x131b   :  { %v5503_v21 = vcombine.low %v5045_v55, %v5191_v20  ;;  %v5504_v29 = vcombine.high %v5045_v55, %v5191_v20  ;;  %v6787_v49 = vpop.f32.mrb[35].mxu0 }
0x131d   :  { %v5511_v57 = vrot.slane %v5503_v21, %v7493_v5  ;;  %v5518_v27 = vrot.slane %v5504_v29, %v7493_v5 }
0x131f   :  { %v5519_v60 = vcombine.low %v5495_v31, %v5511_v57  ;;  %v5520_v56 = vcombine.high %v5495_v31, %v5511_v57  ;;  %v5535_v52 = vcombine.low %v5502_v22, %v5518_v27  ;;  %v5536_v62 = vcombine.high %v5502_v22, %v5518_v27 }
0x1320   :  { %v6976_v31 = vpack.c.bf16 %v6386_v18, %v6385_v44  ;;  %v6398_v44 = vld [vmem:[%s8525_s13 + $0x28] sm:$0xff] }
0x1321   :  { %v5527_v47 = vrot.slane %v5519_v60, %v7503_v13  ;;  %v5534_v16 = vrot.slane %v5520_v56, %v7503_v13  ;;  %v5543_v25 = vrot.slane %v5535_v52, %v7503_v13  ;;  %v5550_v14 = vrot.slane %v5536_v62, %v7503_v13  ;;  %v6387_v56 = vld [vmem:[%s8521_s9 + $0x30] sm:$0xff]  ;;  %v6388_v52 = vld [vmem:[%s8521_s9 + $0x38] sm:$0xff] }
0x1322   :  { %6977 = vmatprep.subr.bf16.mxu1 %v6976_v31 }
0x1323   :  { %v5623_v34 = vcombine.low %v5527_v47, %v5534_v16  ;;  %v6381_v54 = vcombine.high %v5527_v47, %v5534_v16  ;;  %v5639_v23 = vcombine.low %v5543_v25, %v5550_v14  ;;  %v6382_v51 = vcombine.high %v5543_v25, %v5550_v14  ;;  %6979 = vmatpush3.bf16.msra.mxu1 %v6976_v31 }
0x1324   :  { %v6980_v14 = vpack.c.bf16 %v6388_v52, %v6387_v56  ;;  %v6395_v52 = vld [vmem:[%s8523_s11 + $0x1] ss:$0 sm:$0xff] }
0x1325   :  { %v5630_v39 = vrot.slane %v5623_v34, %v7493_v5  ;;  %v5638_v59 = vrot.slane %v6381_v54, %v7493_v5  ;;  %v5646_v6 = vrot.slane %v5639_v23, %v7493_v5  ;;  %v5654_v30 = vrot.slane %v6382_v51, %v7493_v5 }
0x1326   :  { %6981 = vmatprep.subr.bf16.mxu1 %v6980_v14 }
0x1327   :  { %v5655_v9 = vcombine.low %v5630_v39, %v5638_v59  ;;  %v5671_v17 = vcombine.low %v5646_v6, %v5654_v30  ;;  %v5656_v10 = vcombine.high %v5630_v39, %v5638_v59  ;;  %v5672_v37 = vcombine.high %v5646_v6, %v5654_v30  ;;  %6983 = vmatpush3.bf16.msra.mxu1 %v6980_v14 }
0x1329   :  { %v8326_v19 = vrot.slane %v5655_v9, %v7503_v13  ;;  %v8329_v41 = vrot.slane %v5671_v17, %v7503_v13  ;;  %v5670_v42 = vrot.slane %v5656_v10, %v7503_v13  ;;  %v5686_v26 = vrot.slane %v5672_v37, %v7503_v13 }
0x132b   :  { %v5688_v43 = vcombine.high %v8326_v19, %v8329_v41  ;;  %v5689_v46 = vcombine.low %v5670_v42, %v5686_v26  ;;  %v5690_v48 = vcombine.high %v5670_v42, %v5686_v26  ;;  %v5687_v12 = vcombine.low %v8326_v19, %v8329_v41  ;;  %v6392_v41 = vld [vmem:[%s8522_s10 + $0x1] ss:$0 sm:$0xff] }
0x132d   :  { %5761 = vrot.lane.b32.xlu0 %v5688_v43, %s7182_s23 }
0x1331   :  { %5769 = vrot.lane.b32.xlu0 %v5689_v46, %s7183_s2 }
0x1335   :  { %5777 = vrot.lane.b32.xlu0 %v5690_v48, %s8548_s6 }
0x1354   :  { %v5264_v53 = vpop.f32.mrb[34].mxu1  ;;  %v5337_v63 = vpop.f32.mrb[36].mxu0 }
0x1355   :  { %v6792_v35 = vpop.f32.mrb[35].mxu1  ;;  %v6797_v36 = vpop.f32.mrb[37].mxu0 }
0x1358   :  { %v5410_v0 = vpop.f32.mrb[36].mxu1  ;;  %v5483_v1 = vpop.f32.mrb[38].mxu0 }
0x1359   :  { %v5555_v2 = vcombine.low %v5264_v53, %v5410_v0  ;;  %v5556_v4 = vcombine.high %v5264_v53, %v5410_v0  ;;  %v5571_v8 = vcombine.low %v5337_v63, %v5483_v1  ;;  %v5572_v11 = vcombine.high %v5337_v63, %v5483_v1  ;;  %v6802_v45 = vpop.f32.mrb[37].mxu1  ;;  %v6807_v7 = vpop.f32.mrb[39].mxu0 }
0x135b   :  { %v5563_v32 = vrot.slane %v5555_v2, %v7493_v5  ;;  %v5570_v28 = vrot.slane %v5556_v4, %v7493_v5  ;;  %v5579_v55 = vrot.slane %v5571_v8, %v7493_v5  ;;  %v5586_v33 = vrot.slane %v5572_v11, %v7493_v5 }
0x135d   :  { %v5587_v40 = vcombine.low %v5563_v32, %v5579_v55  ;;  %v5588_v15 = vcombine.high %v5563_v32, %v5579_v55  ;;  %v5603_v24 = vcombine.low %v5570_v28, %v5586_v33  ;;  %v5604_v38 = vcombine.high %v5570_v28, %v5586_v33 }
0x135f   :  { %v5595_v20 = vrot.slane %v5587_v40, %v7503_v13  ;;  %v5602_v21 = vrot.slane %v5588_v15, %v7503_v13  ;;  %v5611_v29 = vrot.slane %v5603_v24, %v7503_v13  ;;  %v5618_v49 = vrot.slane %v5604_v38, %v7503_v13  ;;  %v6397_v38 = vld [vmem:[%s8525_s13 + $0x20] sm:$0xff] }
0x1360   :  { %v6984_v18 = vpack.c.bf16 %v6398_v44, %v6397_v38 }
0x1361   :  { %v5691_v22 = vcombine.low %v5595_v20, %v5602_v21  ;;  %v6383_v57 = vcombine.high %v5595_v20, %v5602_v21  ;;  %v5707_v27 = vcombine.low %v5611_v29, %v5618_v49  ;;  %v6384_v60 = vcombine.high %v5611_v29, %v5618_v49  ;;  %v6399_v20 = vld [vmem:[%s8525_s13 + $0x30] sm:$0xff]  ;;  %v6400_v21 = vld [vmem:[%s8525_s13 + $0x38] sm:$0xff] }
0x1362   :  { %6985 = vmatprep.subr.bf16.mxu0 %v6984_v18  ;;  %v6988_v29 = vpack.c.bf16 %v6400_v21, %v6399_v20  ;;  %v6424_v20 = vld [vmem:[%s8528_s16 + $0x1] ss:$0 sm:$0xff] }
0x1363   :  { %v5698_v62 = vrot.slane %v5691_v22, %v7493_v5  ;;  %v5706_v47 = vrot.slane %v6383_v57, %v7493_v5  ;;  %v5714_v16 = vrot.slane %v5707_v27, %v7493_v5  ;;  %v5722_v25 = vrot.slane %v6384_v60, %v7493_v5  ;;  %6987 = vmatpush3.bf16.msra.mxu0 %v6984_v18 }
0x1364   :  { %6989 = vmatprep.subr.bf16.mxu0 %v6988_v29 }
0x1365   :  { %v5723_v34 = vcombine.low %v5698_v62, %v5706_v47  ;;  %v5739_v54 = vcombine.low %v5714_v16, %v5722_v25  ;;  %v5724_v23 = vcombine.high %v5698_v62, %v5706_v47  ;;  %v5740_v51 = vcombine.high %v5714_v16, %v5722_v25  ;;  %v6396_v47 = vld [vmem:[%s8524_s12 + $0x1] ss:$0 sm:$0xff] }
0x1367   :  { %v5731_v39 = vrot.slane %v5723_v34, %v7503_v13  ;;  %v5747_v59 = vrot.slane %v5739_v54, %v7503_v13  ;;  %v5738_v6 = vrot.slane %v5724_v23, %v7503_v13  ;;  %v5754_v30 = vrot.slane %v5740_v51, %v7503_v13  ;;  %6991 = vmatpush3.bf16.msra.mxu0 %v6988_v29  ;;  %v6407_v51 = vld [vmem:[%s8527_s15 + $0x80] sm:$0xff] }
0x1368   :  { %7024 = vmatprep.subr.bf16.mxu0 %v7171_v3 }
0x1369   :  { %v5756_v9 = vcombine.high %v5731_v39, %v5747_v59  ;;  %v5757_v17 = vcombine.low %v5738_v6, %v5754_v30  ;;  %v5758_v10 = vcombine.high %v5738_v6, %v5754_v30  ;;  %v5755_v5 = vcombine.low %v5731_v39, %v5747_v59  ;;  %v6408_v39 = vld [vmem:[%s8527_s15 + $0x88] sm:$0xff]  ;;  %v6409_v6 = vld [vmem:[%s8527_s15 + $0x90] sm:$0xff]  ;;  %v6410_v30 = vld [vmem:[%s8527_s15 + $0x98] sm:$0xff] }
0x136a   :  { %v6992_v59 = vpack.c.bf16 %v6408_v39, %v6407_v51 }
0x136b   :  { %5763 = vrot.lane.b32.xlu1 %v5756_v9, %s7182_s23  ;;  %v6411_v9 = vld [vmem:[%s8527_s15 + $0xa0] sm:$0xff] }
0x136c   :  { %6993 = vmatprep.subr.bf16.mxu1 %v6992_v59 }
0x136f   :  { %5771 = vrot.lane.b32.xlu1 %v5757_v17, %s7183_s2  ;;  %v6412_v17 = vld [vmem:[%s8527_s15 + $0xa8] sm:$0xff] }
0x1373   :  { %5779 = vrot.lane.b32.xlu1 %v5758_v10, %s8548_s6  ;;  %v7000_v10 = vpack.c.bf16 %v6412_v17, %v6411_v9 }
0x139f   :  { %v5762_v37 = vpop.permute.xlu0 %5761 }
0x13a0   :  { %v5783_v26 = vsel %vm1248_vm3, %v5687_v12, %v5762_v37  ;;  %v6414_v37 = vld [vmem:[%s8527_s15 + $0xb8] sm:$0xff] }
0x13a3   :  { %v5770_v42 = vpop.permute.xlu0 %5769 }
0x13a4   :  { %v5785_v13 = vsel %vm2827_vm5, %v5783_v26, %v5770_v42  ;;  %v6415_v26 = vld [vmem:[%s8527_s15 + $0xc0] sm:$0xff] }
0x13a7   :  { %v5778_v43 = vpop.permute.xlu0 %5777 }
0x13a8   :  { %v5787_v46 = vsel %vm2830_vm6, %v5785_v13, %v5778_v43  ;;  %v6416_v13 = vld [vmem:[%s8527_s15 + $0xc8] sm:$0xff] }
0x13a9   :  { %6816 = vmatprep.mubr.msk.f32.mxu1 %vm180_vm1, %v5787_v46  ;;  %v7008_v43 = vpack.c.bf16 %v6416_v13, %v6415_v26  ;;  %v6417_v46 = vld [vmem:[%s8527_s15 + $0xd0] sm:$0xff] }
0x13dd   :  { %v5764_v48 = vpop.permute.xlu1 %5763 }
0x13de   :  { %v5784_v63 = vsel %vm1248_vm3, %v5755_v5, %v5764_v48  ;;  %v6413_v5 = vld [vmem:[%s8527_s15 + $0xb0] sm:$0xff]  ;;  %v6418_v48 = vld [vmem:[%s8527_s15 + $0xd8] sm:$0xff] }
0x13df   :  { %v7004_v42 = vpack.c.bf16 %v6414_v37, %v6413_v5 }
0x13e1   :  { %v5772_v53 = vpop.permute.xlu1 %5771 }
0x13e2   :  { %v5786_v35 = vsel %vm2827_vm5, %v5784_v63, %v5772_v53  ;;  %v7012_v53 = vpack.c.bf16 %v6418_v48, %v6417_v46  ;;  %v6419_v63 = vld [vmem:[%s8527_s15 + $0xe0] sm:$0xff] }
0x13e5   :  { %v5780_v36 = vpop.permute.xlu1 %5779 }
0x13e6   :  { %v5788_v0 = vsel %vm2830_vm6, %v5786_v35, %v5780_v36  ;;  %v6420_v35 = vld [vmem:[%s8527_s15 + $0xe8] sm:$0xff] }
0x13e7   :  { %6817 = vmatmul.mubr.msk.f32.vlgmr.msra.gmra.mrb[38].mxu1 %vm180_vm1, %v5788_v0  ;;  %v7016_v36 = vpack.c.bf16 %v6420_v35, %v6419_v63  ;;  %v6421_v0 = vld [vmem:[%s8527_s15 + $0xf0] sm:$0xff] }
0x13e8   :  { %6995 = vmatpush3.bf16.msra.mxu1 %v6992_v59  ;;  %v6425_v59 = vld [vmem:[%s8529_s17] ss:$0 sm:$0xff] }
0x14ba   :  { %v6818_v19 = vpop.f32.mrb[38].mxu1 }
0x14bb   :  { %v5876_v12 = vadd.f32 %v6818_v19, %v7945_v50  ;;  %v5866_v1 = vpop.f32.mrb[39].mxu1  ;;  %v6422_v19 = vld [vmem:[%s8527_s15 + $0xf8] sm:$0xff] }
0x14bc   :  { %v5875_v2 = vadd.f32 %v5866_v1, %v7947_v61 }
0x14bd   :  { %v8387_v4 = vadd.f32 %v6392_v41, %v5876_v12  ;;  %v6402_v12 = vld [vmem:[%s8526_s14 + $0x1] ss:$0 sm:$0xff] }
0x14be   :  { %v8389_v8 = vadd.f32 %v6392_v41, %v5875_v2  ;;  %v7020_v41 = vpack.c.bf16 %v6422_v19, %v6421_v0 }
0x14bf   :  { %v5894_v11 = vsel %vm180_vm1, %v8387_v4, 0.0 }
0x14c0   :  { %5895 = vadd.xlane.f32.xlu1 %v5894_v11  ;;  %v5891_v45 = vsel %vm180_vm1, %v8389_v8, 0.0 }
0x14c1   :  { %5892 = vadd.xlane.f32.xlu0 %v5891_v45 }
0x154d   :  { %v5896_v7 = vpop.xlane.xlu1 %5895 }
0x154e   :  { %v5898_v32 = vmul.f32 0.03125, %v5896_v7  ;;  %v5893_v28 = vpop.xlane.xlu0 %5892 }
0x154f   :  { %v5897_v55 = vmul.f32 0.03125, %v5893_v28 }
0x1550   :  { %v5900_v50 = vsub.f32 %v8387_v4, %v5898_v32 }
0x1551   :  { %v5899_v61 = vsub.f32 %v8389_v8, %v5897_v55 }
0x1552   :  { %v5902_v15 = vmul.f32 %v5900_v50, %v5900_v50 }
0x1553   :  { %v5901_v33 = vmul.f32 %v5899_v61, %v5899_v61 }
0x1554   :  { %v5906_v24 = vsel %vm180_vm1, %v5902_v15, 0.0 }
0x1555   :  { %v5903_v40 = vsel %vm180_vm1, %v5901_v33, 0.0 }
0x1556   :  { %5904 = vadd.xlane.f32.xlu0 %v5903_v40 }
0x155a   :  { %5907 = vadd.xlane.f32.xlu0 %v5906_v24 }
0x15e3   :  { %v5905_v49 = vpop.xlane.xlu0 %5904 }
0x15e4   :  { %v5909_v31 = vmul.f32 0.03125, %v5905_v49 }
0x15e6   :  { %v5911_v22 = vadd.f32 1e-05, %v5909_v31 }
0x15e7   :  { %v5908_v57 = vpop.xlane.xlu0 %5907 }
0x15e8   :  { %7133 = vrsqrt.f32 %v5911_v22  ;;  %v5910_v27 = vmul.f32 0.03125, %v5908_v57 }
0x15ea   :  { %v5912_v60 = vadd.f32 1e-05, %v5910_v27 }
0x15ec   :  { %7135 = vrsqrt.f32 %v5912_v60 }
0x15f2   :  { %v7134_v56 = vpop.eup %7133 }
0x15f3   :  { %v5915_v62 = vmul.f32 %v7134_v56, %v5899_v61 }
0x15f5   :  { %v5923_v16 = vmul.f32 %v6395_v52, %v5915_v62 }
0x15f6   :  { %v7136_v25 = vpop.eup %7135 }
0x15f7   :  { %v5916_v14 = vmul.f32 %v7136_v25, %v5900_v50  ;;  %v5931_v34 = vadd.f32 %v6396_v47, %v5923_v16  ;;  %v6182_v25 = vld [vmem:[%s8531_s19 + $0x10] sm:$0xff] }
0x15f9   :  { %v5924_v54 = vmul.f32 %v6395_v52, %v5916_v14  ;;  %6827 = vmatprep.mubr.msk.f32.mxu0 %vm180_vm1, %v5931_v34  ;;  %v6183_v14 = vld [vmem:[%s8531_s19 + $0x18] sm:$0xff] }
0x15fa   :  { %v7028_v34 = vpack.c.bf16 %v6183_v14, %v6182_v25 }
0x15fb   :  { %v5932_v23 = vadd.f32 %v6396_v47, %v5924_v54 }
0x15fd   :  { %6828 = vmatmul.mubr.msk.f32.vlgmr.msra.gmra.mrb[40].mxu0 %vm180_vm1, %v5932_v23 }
0x15fe   :  { %6873 = vmatprep.mubr.msk.f32.mxu0 %vm7177_vm2, %v7176_v58  ;;  %v6996_v58 = vpack.c.bf16 %v6410_v30, %v6409_v6  ;;  %v6426_v6 = vld [vmem:[%s8530_s18] ss:$0 sm:$0xff] }
0x1600   :  { %6997 = vmatprep.subr.bf16.mxu1 %v6996_v58 }
0x1601   :  { %6999 = vmatpush3.bf16.msra.mxu1 %v6996_v58 }
0x1602   :  { %7001 = vmatprep.subr.bf16.mxu1 %v7000_v10 }
0x1605   :  { %7003 = vmatpush3.bf16.msra.mxu1 %v7000_v10 }
0x1606   :  { %7005 = vmatprep.subr.bf16.mxu1 %v7004_v42 }
0x1609   :  { %7007 = vmatpush3.bf16.msra.mxu1 %v7004_v42 }
0x160a   :  { %7009 = vmatprep.subr.bf16.mxu1 %v7008_v43 }
0x160d   :  { %7011 = vmatpush3.bf16.msra.mxu1 %v7008_v43 }
0x160e   :  { %7013 = vmatprep.subr.bf16.mxu1 %v7012_v53 }
0x1611   :  { %7015 = vmatpush3.bf16.msra.mxu1 %v7012_v53 }
0x1612   :  { %7017 = vmatprep.subr.bf16.mxu1 %v7016_v36 }
0x1615   :  { %7019 = vmatpush3.bf16.msra.mxu1 %v7016_v36 }
0x1616   :  { %7021 = vmatprep.subr.bf16.mxu1 %v7020_v41 }
0x1619   :  { %7023 = vmatpush3.bf16.msra.mxu1 %v7020_v41 }
0x16d0   :  { %v6829_v1 = vpop.f32.mrb[40].mxu0 }
0x16d1   :  { %v6024_v2 = vadd.f32 %v6829_v1, %v6402_v12  ;;  %v6018_v11 = vpop.f32.mrb[41].mxu0 }
0x16d2   :  { %v6019_v45 = vadd.f32 %v6402_v12, %v6018_v11 }
0x16d3   :  { %v6406_v7 = vmul.f32 -1.702, %v6024_v2 }
0x16d4   :  { %v6405_v32 = vmul.f32 -1.702, %v6019_v45 }
0x16d5   :  { %v6033_v28 = vmul.f32 1.442695, %v6406_v7 }
0x16d6   :  { %v6031_v55 = vmul.f32 1.442695, %v6405_v32 }
0x16d7   :  { %7137 = vpow2.f32 %v6033_v28 }
0x16d8   :  { %7139 = vpow2.f32 %v6031_v55 }
0x16e1   :  { %v7138_v50 = vpop.eup %7137 }
0x16e2   :  { %v7140_v61 = vpop.eup %7139  ;;  %v6036_v33 = vadd.f32 1.0, %v7138_v50 }
0x16e3   :  { %v6035_v40 = vadd.f32 1.0, %v7140_v61 }
0x16e4   :  { %7141 = vrcp.f32 %v6036_v33 }
0x16e5   :  { %7143 = vrcp.f32 %v6035_v40 }
0x16ee   :  { %v7142_v15 = vpop.eup %7141 }
0x16ef   :  { %v7144_v24 = vpop.eup %7143  ;;  %v6042_v44 = vmul.f32 %v7142_v15, %v6024_v2 }
0x16f0   :  { %v6041_v38 = vmul.f32 %v7144_v24, %v6019_v45 }
0x16f2   :  { %6862 = vmatprep.mubr.f32.mxu1 %v6041_v38 }
0x16f3   :  { %6863 = vmatmul.mubr.f32.vlgmr.msra.gmra.mrb[40].mxu1 %v6042_v44 }
0x17c6   :  { %v6864_v18 = vpop.f32.mrb[40].mxu1 }
0x17c7   :  { %v6136_v21 = vadd.f32 %v6864_v18, %v8387_v4  ;;  %v6126_v29 = vpop.f32.mrb[41].mxu1  ;;  %v6180_v4 = vld [vmem:[%s8531_s19] sm:$0xff] }
0x17c8   :  { %v6135_v49 = vadd.f32 %v6126_v29, %v8389_v8  ;;  %v6181_v8 = vld [vmem:[%s8531_s19 + $0x8] sm:$0xff]  ;;  %s7185_s19 = smov [#allocation3]  }
0x17c9   :  { %v6146_v31 = vadd.f32 %v6424_v20, %v6136_v21  ;;  %v7025_v16 = vpack.c.bf16 %v6181_v8, %v6180_v4  ;;  %s6265_s5 = sshll.u32 %s7185_s19, 4  ;;  %s6266_s5 = int_to_ptr.vmem [resolvable:$true] %s6265_s5 }
0x17ca   :  { %v6145_v22 = vadd.f32 %v6424_v20, %v6135_v49  ;;  %s7147_s13 = scalar_lea.vmem %s6266_s5, 32  ;;  %p7152_p1 = scmp.lt.s32.totalorder %s6266_s5, %s6266_s5 }
0x17cb   :  { %6148 = vst.msk [vmem:[#allocation2 + $0x8] sm:$0xff] %vm180_vm1, %v6146_v31  ;;  %7026 = vmatpush3.bf16.msra.mxu0 %v7025_v16  ;;  %p7148_p0 = scmp.ne.s32.totalorder %s6266_s5, %s7147_s13  ;;  %p7153_p2 = scmp.lt.s32.totalorder %s7147_s13, %s7147_s13 }
0x17cc   :  { %6147 = vst.msk [vmem:[#allocation2] sm:$0xff] %vm180_vm1, %v6145_v22  ;;  %7027 = vmatprep.subr.bf16.mxu0 %v7171_v3 }
0x17cd   :  { %p7154_p3 = por %p7153_p2, %p7152_p1 }
0x17cf   :  { %7029 = vmatpush3.bf16.msra.mxu0 %v7028_v34  ;;  %p7155_p4 = pnand %p7154_p3, %p7148_p0 }
0x17d3   :  { %v6149_v57 = vld [vmem:[#allocation2] ss:$8 sm:$0x3] }
0x17d4   :  { %v6153_v27 = vsel %vm6152_vm7, %v6149_v57, 0.0 }
0x17d5   :  { %6154 = vadd.xlane.f32.xlu0 %v6153_v27 }
0x1862   :  { %v6155_v60 = vpop.xlane.xlu0 %6154 }
0x1863   :  { %v6156_v56 = vmul.f32 0.03125, %v6155_v60 }
0x1865   :  { %v6157_v52 = vsub.f32 %v6149_v57, %v6156_v56 }
0x1867   :  { %v6158_v62 = vmul.f32 %v6157_v52, %v6157_v52 }
0x1869   :  { %v6159_v47 = vsel %vm6152_vm7, %v6158_v62, 0.0 }
0x186a   :  { %6160 = vadd.xlane.f32.xlu1 %v6159_v47 }
0x18f7   :  { %v6161_v54 = vpop.xlane.xlu1 %6160 }
0x18f8   :  { %v6162_v23 = vmul.f32 0.03125, %v6161_v54 }
0x18fa   :  { %v6163_v51 = vadd.f32 1e-05, %v6162_v23 }
0x18fc   :  { %7145 = vrsqrt.f32 %v6163_v51 }
0x1906   :  { %v7146_v39 = vpop.eup %7145 }
0x1907   :  { %v6165_v3 = vmul.f32 %v7146_v39, %v6157_v52 }
0x1909   :  { %v6172_v30 = vmul.f32 %v6425_v59, %v6165_v3 }
0x190b   :  { %v6179_v58 = vadd.f32 %v6426_v6, %v6172_v30 }
0x190d   :  { %6874 = vmatmul.mubr.msk.f32.vlgmr.msra.gmra.mrb[42].mxu0 %vm180_vm1, %v6179_v58 }
0x19e0   :  { %v6253_v9 = vpop.f32.mrb[42].mxu0 }
0x19e1   :  { %6258 = vst.msk [vmem:[#allocation3] sm:$0x3] %vm6257_vm8, %v6253_v9  ;;  %v6875_v17 = vpop.f32.mrb[43].mxu0 }
0x19e2   :  { %7158 = shalt.err (!%p7155_p4)
}
0x19e3   :  { %s7159_s6 = scalar_lea.hbm %s8532_s20, 32 }
0x19e4   :  { %p7160_p5 = scmp.ne.s32.totalorder %s8532_s20, %s7159_s6  ;;  %p7163_p6 = scmp.lt.u32.totalorder %s7159_s6, %s8532_s20 }
0x19e6   :  { %p7165_p7 = pnand %p7163_p6, %p7160_p5 }
0x19e8   :  { %7168 = shalt.err (!%p7165_p7)
}
0x19e9   :  { %6268 = dma.vmem_to_hbm [thread:$0]  %s6266_s5, 32, %s8532_s20, [#allocation4]  }
0x19ea   :  { %7169 = dma.done.wait [#allocation4], 32  }
0x19eb   :  { %7170 = vsyncadd [#allocation4], 4294967264 }
0x19ec   :  { %6272 = vsyncpa [#allocation4], 1 }

</bundles_post_ra>
